<compile_context>
chip_gen: v5e
topology: v5e:2x2
jax: 0.10.0
libtpu: 0.0.40
codegen_flags: <defaults>
</compile_context>

<pallas_src>
import functools

import jax
import jax.numpy as jnp
from jax import lax
from jax.experimental import pallas as pl
from jax.experimental.pallas import tpu as pltpu


# ---------------------------------------------------------------------------
# Fused bidirectional LSTM layer kernel (one batch tile per grid step)
# ---------------------------------------------------------------------------
def _bilstm_layer_kernel(*refs, hidden_dim, is_final):
    """One full bidirectional LSTM layer for one batch tile.

    Ref layout:
      x_ref     (T, tb, D)   bf16   time-major layer input
      w_in_ref  (D, 8H)      bf16   input->gates, per-gate [fwd|bwd] cols, g cols x2
      w_hh_ref  (2H, 8H)     bf16   block-diag hidden->gates, same column order
      bias_ref  (1, 8H)      f32    (b_ih + b_hh) for both dirs, same column order
      len_ref   (tb, 1)      i32    valid lengths
      [w_fc_ref (2H, 1) f32, b_fc_ref (1, 1) f32]          (final layer only)
      outputs:
        final     : pred_ref (tb, 1)  f32
        non-final : y_ref    (T, tb, 2H) bf16   fwd in lanes [0,H), bwd in [H,2H)
      scratch: z_scr (T, tb, 8H) bf16 ; h_scr, c_scr (tb, 2H) f32
    """
    H = hidden_dim

    x_ref, w_in_ref, w_hh_ref, bias_ref, len_ref = refs[0:5]
    pos = 5
    if is_final:
        w_fc_ref, b_fc_ref = refs[pos:pos + 2]
        pos += 2
        pred_ref = refs[pos]
        pos += 1
        y_ref = None
    else:
        y_ref = refs[pos]
        pos += 1
    z_scr, h_scr, c_scr = refs[pos:pos + 3]

    T, tb, D = x_ref.shape
    unroll = True if T <= 16 else 4

    # ---- phase 1: input projection for all T steps and both directions ------
    # Single MXU matmul (no serial dependence on h); result kept in bf16 scratch,
    # bias + hh contribution are added back in f32 inside the recurrence.
    # TODO(synk): chunk the time axis here (and for z_scr) for very long sequences
    # so the (T, tb, 8H) scratch stays within VMEM; not needed at these sizes.
    x_flat = x_ref[...].reshape(T * tb, D)
    z_all = jnp.dot(x_flat, w_in_ref[...], preferred_element_type=jnp.float32)
    z_scr[...] = z_all.reshape(T, tb, 8 * H).astype(z_scr.dtype)

    # ---- phase 2: recurrence (f32 state & gate math; bf16 only into the MXU) --
    h_scr[...] = jnp.zeros_like(h_scr)
    c_scr[...] = jnp.zeros_like(c_scr)

    lens = len_ref[...]                              # (tb, 1) i32, loaded once
    w_hh = w_hh_ref[...]                             # (2H, 8H) bf16, hoisted
    bias = jnp.broadcast_to(bias_ref[...], (tb, 8 * H))          # hoisted broadcast
    # Column selectors (hoisted): a column belongs to the fwd direction iff its
    # position within its 2H-wide gate block is < H.
    col_fwd_8h = (lax.broadcasted_iota(jnp.int32, (1, 8 * H), 1) % (2 * H)) < H
    col_fwd_2h = lax.broadcasted_iota(jnp.int32, (1, 2 * H), 1) < H

    def step(i, _):
        t_f = i
        t_b = T - 1 - i
        h = h_scr[...]                               # (tb, 2H) = [h_f | h_b]
        c = c_scr[...]

        # fwd columns take the t_f pre-activation, bwd columns the t_b one.
        z_in = jnp.where(col_fwd_8h, z_scr[t_f], z_scr[t_b]).astype(jnp.float32)
        z = z_in + bias + jnp.dot(h.astype(w_hh.dtype), w_hh,
                                  preferred_element_type=jnp.float32)

        # One sigmoid over the whole 8H gate block; g columns were pre-scaled by 2
        # at param-prep time so tanh(g) == 2*sigmoid(2g) - 1.
        s = jax.nn.sigmoid(z)
        i_g = s[:, 0:2 * H]
        f_g = s[:, 2 * H:4 * H]
        g_g = 2.0 * s[:, 4 * H:6 * H] - 1.0
        o_g = s[:, 6 * H:8 * H]
        c_new = f_g * c + i_g * g_g                  # (tb, 2H)
        h_new = o_g * jnp.tanh(c_new)

        # Length masking: freeze state past each row's valid length (per direction).
        t_cols = jnp.where(col_fwd_2h, t_f, t_b)     # (1, 2H) i32
        valid = t_cols < lens                        # (tb, 2H) bool
        h_scr[...] = jnp.where(valid, h_new, h)
        c_scr[...] = jnp.where(valid, c_new, c)

        if not is_final:
            vf = t_f < lens                          # (tb, 1)
            vb = t_b < lens
            y_ref[t_f, :, 0:H] = jnp.where(vf, h_new[:, 0:H], 0.0).astype(y_ref.dtype)
            y_ref[t_b, :, H:2 * H] = jnp.where(vb, h_new[:, H:2 * H], 0.0).astype(y_ref.dtype)
        return 0

    lax.fori_loop(0, T, step, 0, unroll=unroll)

    if is_final:
        # hidden = cat(h_fwd, h_bwd) == h_scr; fc + sigmoid fused into the epilogue.
        logit = jnp.dot(h_scr[...], w_fc_ref[...],
                        preferred_element_type=jnp.float32) + b_fc_ref[...]
        pred_ref[...] = jax.nn.sigmoid(logit).astype(pred_ref.dtype)


# ---------------------------------------------------------------------------
# pallas_call wrapper
# ---------------------------------------------------------------------------
def _pick_batch_tile(B):
    """B is a multiple of 8. Aim for >= 4 grid steps (megacore sharding on v7x plus
    DMA/compute pipelining), with the tile capped at 64 rows."""
    for tb in (64, 32, 16, 8):
        if B % tb == 0 and B // tb >= 4:
            return tb
    return 8


def _vmem_limit_bytes():
    """Per-generation VMEM scope: ~96 MiB on 128 MiB chips (v5e/v6e), ~48 MiB on
    64 MiB chips (v7x); conservative 48 MiB if the query is unavailable."""
    try:
        cap = int(getattr(pltpu.get_tpu_info(), "vmem_capacity_bytes",
                          64 * 1024 * 1024))
    except Exception:
        cap = 64 * 1024 * 1024
    return min(96 * 1024 * 1024, (cap // 4) * 3)


def _bilstm_layer(x, layer, lengths2d, *, is_final, fc=None):
    """x: time-major (T, B, D) bf16 layer input (B padded to a multiple of 8)."""
    T, B, D = x.shape
    H = layer["w_hh"].shape[0] // 2
    tb = _pick_batch_tile(B)
    grid = (B // tb,)

    operands = [x, layer["w_in"], layer["w_hh"], layer["bias"], lengths2d]
    in_specs = [pl.BlockSpec((T, tb, D), lambda b: (0, b, 0)),
                pl.BlockSpec(layer["w_in"].shape, lambda b: (0, 0)),
                pl.BlockSpec(layer["w_hh"].shape, lambda b: (0, 0)),
                pl.BlockSpec((1, 8 * H), lambda b: (0, 0)),
                pl.BlockSpec((tb, 1), lambda b: (b, 0))]

    if is_final:
        operands += [fc["w"], fc["b"]]
        in_specs += [pl.BlockSpec((2 * H, 1), lambda b: (0, 0)),
                     pl.BlockSpec((1, 1), lambda b: (0, 0))]
        out_shape = jax.ShapeDtypeStruct((B, 1), jnp.float32)
        out_specs = pl.BlockSpec((tb, 1), lambda b: (b, 0))
    else:
        out_shape = jax.ShapeDtypeStruct((T, B, 2 * H), jnp.bfloat16)
        out_specs = pl.BlockSpec((T, tb, 2 * H), lambda b: (0, b, 0))

    kernel = functools.partial(_bilstm_layer_kernel, hidden_dim=H, is_final=is_final)

    # TODO(synk): for small models it would pay off (esp. on v6e's 128 MiB VMEM) to fuse
    # all layers into one pallas_call and keep the (T, tb, 2H) inter-layer activations
    # VMEM-resident; kept per-layer here for shape generality.
    return pl.pallas_call(
        kernel,
        grid=grid,
        in_specs=in_specs,
        out_specs=out_specs,
        out_shape=out_shape,
        scratch_shapes=[pltpu.VMEM((T, tb, 8 * H), jnp.bfloat16),   # pre-activations
                        pltpu.VMEM((tb, 2 * H), jnp.float32),       # h = [h_f | h_b]
                        pltpu.VMEM((tb, 2 * H), jnp.float32)],      # c = [c_f | c_b]
        compiler_params=pltpu.CompilerParams(
            dimension_semantics=("parallel",),     # batch tiles independent
            vmem_limit_bytes=_vmem_limit_bytes()),
    )(*operands)


# ---------------------------------------------------------------------------
# One-time parameter preparation (transpose / merge / gate-rescale / bf16 cast)
# ---------------------------------------------------------------------------
def prepare_params(params):
    H = params["lstm"][0]["w_hh_f"].shape[1]
    # Pre-scale the g-gate columns by 2: tanh(x) == 2*sigmoid(2x) - 1, letting the
    # kernel apply a single sigmoid over the whole 8H gate block.
    g_scale = jnp.ones((8 * H,), jnp.float32).at[4 * H:6 * H].set(2.0)

    def interleave(wf, wb):
        """(rows, 4H) x2 -> (rows, 8H) with per-gate [fwd | bwd] column blocks."""
        parts = []
        for k in range(4):
            parts.append(wf[:, k * H:(k + 1) * H])
            parts.append(wb[:, k * H:(k + 1) * H])
        return jnp.concatenate(parts, axis=1)

    layers = []
    for layer in params["lstm"]:
        # Input->gates: one (D, 8H) matrix serving both directions.
        w_in = interleave(layer["w_ih_f"].T.astype(jnp.float32),
                          layer["w_ih_b"].T.astype(jnp.float32))
        # Hidden->gates: block-diagonal (2H, 8H) so [h_f | h_b] @ W gives both dirs.
        whh_f_t = layer["w_hh_f"].T.astype(jnp.float32)
        whh_b_t = layer["w_hh_b"].T.astype(jnp.float32)
        zeros = jnp.zeros_like(whh_f_t)
        w_hh = jnp.concatenate([interleave(whh_f_t, zeros),
                                interleave(zeros, whh_b_t)], axis=0)
        # Combined bias in the same column order.
        b_f = (layer["b_ih_f"] + layer["b_hh_f"]).astype(jnp.float32).reshape(1, -1)
        b_b = (layer["b_ih_b"] + layer["b_hh_b"]).astype(jnp.float32).reshape(1, -1)
        bias = interleave(b_f, b_b)
        layers.append(dict(
            w_in=(w_in * g_scale[None, :]).astype(jnp.bfloat16),
            w_hh=(w_hh * g_scale[None, :]).astype(jnp.bfloat16),
            bias=bias * g_scale[None, :],
        ))

    # hidden = [h_f | h_b] matches PyTorch's cat order, so fc weight is just fc_w.T.
    fc = dict(w=params["fc_w"].astype(jnp.float32).T,           # (2H, 1)
              b=params["fc_b"].reshape(1, 1).astype(jnp.float32))

    return dict(embedding=params["embedding"].astype(jnp.bfloat16),
                lstm=layers, fc=fc)


# ---------------------------------------------------------------------------
# Full forward pass (embedding gather in XLA, everything else in Pallas)
# ---------------------------------------------------------------------------
def lstm_sentiment_forward(prepped, text, lengths):
    B0, T = text.shape
    B = max(8, ((B0 + 7) // 8) * 8)
    if B != B0:
        # Pad batch to a multiple of 8; padded rows get token 0 / length 0 (inactive).
        text = jnp.pad(text, ((0, B - B0), (0, 0)))
        lengths = jnp.pad(lengths, (0, B - B0))

    # Embedding gather (data-dependent) + eval-mode dropout (identity) stay in XLA.
    # Gather directly into time-major (T, B, E) to avoid transposing the activation.
    x = jnp.take(prepped["embedding"], text.T, axis=0)          # (T, B, E) bf16
    lengths2d = lengths.reshape(-1, 1).astype(jnp.int32)

    n_layers = len(prepped["lstm"])
    out = None
    for li, layer in enumerate(prepped["lstm"]):
        if li == n_layers - 1:
            out = _bilstm_layer(x, layer, lengths2d, is_final=True, fc=prepped["fc"])
        else:
            x = _bilstm_layer(x, layer, lengths2d, is_final=False)   # packed (T,B,2H)
    return out[:B0]                                              # (B0, 1) f32, sigmoid


# ---------------------------------------------------------------------------
# Deterministic PyTorch-style parameters + pure-JAX f32 reference
# ---------------------------------------------------------------------------
def make_params(key, vocab_size, embedding_dim, hidden_dim, n_layers):
    k_emb, k_lstm, k_fc = jax.random.split(key, 3)
    emb = 0.1 * jax.random.normal(k_emb, (vocab_size, embedding_dim), jnp.float32)
    emb = emb.at[0].set(0.0)  # padding_idx=0

    bound = 1.0 / jnp.sqrt(hidden_dim)
    lstm_layers = []
    keys = jax.random.split(k_lstm, n_layers)
    for l in range(n_layers):
        d_in = embedding_dim if l == 0 else 2 * hidden_dim
        ks = jax.random.split(keys[l], 8)
        u = lambda k, shape: jax.random.uniform(k, shape, jnp.float32, -bound, bound)
        lstm_layers.append(dict(
            w_ih_f=u(ks[0], (4 * hidden_dim, d_in)),
            w_hh_f=u(ks[1], (4 * hidden_dim, hidden_dim)),
            b_ih_f=u(ks[2], (4 * hidden_dim,)),
            b_hh_f=u(ks[3], (4 * hidden_dim,)),
            w_ih_b=u(ks[4], (4 * hidden_dim, d_in)),
            w_hh_b=u(ks[5], (4 * hidden_dim, hidden_dim)),
            b_ih_b=u(ks[6], (4 * hidden_dim,)),
            b_hh_b=u(ks[7], (4 * hidden_dim,)),
        ))

    kfw, kfb = jax.random.split(k_fc)
    fc_bound = 1.0 / jnp.sqrt(2 * hidden_dim)
    fc_w = jax.random.uniform(kfw, (1, 2 * hidden_dim), jnp.float32, -fc_bound, fc_bound)
    fc_b = jax.random.uniform(kfb, (1,), jnp.float32, -fc_bound, fc_bound)

    return dict(embedding=emb, lstm=lstm_layers, fc_w=fc_w, fc_b=fc_b)


def _reference_forward(params, text, lengths):
    """Pure-JAX f32 reference with packed bidirectional LSTM semantics."""
    emb = jnp.take(params["embedding"].astype(jnp.float32), text, axis=0)   # (B, T, E)
    B, T, _ = emb.shape
    x = emb
    h_f_last = h_b_last = None
    for layer in params["lstm"]:
        def run(w_ih, w_hh, b_ih, b_hh, reverse):
            H = w_hh.shape[1]
            h = jnp.zeros((B, H), jnp.float32)
            c = jnp.zeros((B, H), jnp.float32)
            outs = [None] * T
            order = range(T - 1, -1, -1) if reverse else range(T)
            for t in order:
                z = x[:, t, :] @ w_ih.T + h @ w_hh.T + b_ih + b_hh
                i_g = jax.nn.sigmoid(z[:, 0:H])
                f_g = jax.nn.sigmoid(z[:, H:2 * H])
                g_g = jnp.tanh(z[:, 2 * H:3 * H])
                o_g = jax.nn.sigmoid(z[:, 3 * H:4 * H])
                c_new = f_g * c + i_g * g_g
                h_new = o_g * jnp.tanh(c_new)
                valid = (t < lengths)[:, None]
                h = jnp.where(valid, h_new, h)
                c = jnp.where(valid, c_new, c)
                outs[t] = jnp.where(valid, h_new, 0.0)
            return jnp.stack(outs, axis=1), h
        _of, h_f_last = run(layer["w_ih_f"], layer["w_hh_f"],
                            layer["b_ih_f"], layer["b_hh_f"], False)
        _ob, h_b_last = run(layer["w_ih_b"], layer["w_hh_b"],
                            layer["b_ih_b"], layer["b_hh_b"], True)
        x = jnp.concatenate([_of, _ob], axis=-1)
    hidden = jnp.concatenate([h_f_last, h_b_last], axis=1)
    return jax.nn.sigmoid(hidden @ params["fc_w"].T + params["fc_b"])


if __name__ == "__main__":
    VOCAB, EMB, HID, NLAYERS = 50, 32, 32, 2
    B, T = 2, 8

    key = jax.random.PRNGKey(0)
    k_params, k_text = jax.random.split(key)
    params = make_params(k_params, VOCAB, EMB, HID, NLAYERS)
    prepped = prepare_params(params)   # one-time weight prep (not per forward call)

    text = jax.random.randint(k_text, (B, T), 1, VOCAB, dtype=jnp.int32)
    lengths = jnp.array([T, 5], dtype=jnp.int32)
    pad_mask = jnp.arange(T)[None, :] < lengths[:, None]
    text = jnp.where(pad_mask, text, 0)   # padded token ids -> 0 (padding_idx)

    fwd = jax.jit(lambda t, l: lstm_sentiment_forward(prepped, t, l))
    out = fwd(text, lengths)
    out = jax.block_until_ready(out)

    ref = jax.jit(functools.partial(_reference_forward, params))(text, lengths)
    ref = jax.block_until_ready(ref)

    assert out.shape == (B, 1)
    assert bool(jnp.all(jnp.isfinite(out)))
    assert bool(jnp.all((out > 0.0) & (out < 1.0)))        # sigmoid range
    max_err = float(jnp.max(jnp.abs(out.astype(jnp.float32) - ref)))
    assert max_err < 5e-2, f"mismatch vs f32 reference: {max_err}"
    print("KERNEL_OK")
</pallas_src>

<mosaic_0001>
module attributes {stable_mosaic.version = 11 : i64} {
  func.func @_bilstm_layer_kernel(%arg0: i32, %arg1: memref<8x8x64xbf16, #tpu.memory_space<vmem>>, %arg2: memref<64x256xbf16, #tpu.memory_space<vmem>>, %arg3: memref<64x256xbf16, #tpu.memory_space<vmem>>, %arg4: memref<1x256xf32, #tpu.memory_space<vmem>>, %arg5: memref<8x1xi32, #tpu.memory_space<vmem>>, %arg6: memref<64x1xf32, #tpu.memory_space<vmem>>, %arg7: memref<1x1xf32, #tpu.memory_space<vmem>>, %arg8: memref<8x1xf32, #tpu.memory_space<vmem>>, %arg9: memref<8x8x256xbf16, #tpu.memory_space<vmem>>, %arg10: memref<8x64xf32, #tpu.memory_space<vmem>>, %arg11: memref<8x64xf32, #tpu.memory_space<vmem>>) attributes {dimension_semantics = [#tpu.dimension_semantics<parallel>], iteration_bounds = array<i64: 1>, scalar_prefetch = 0 : i64, scratch_operands = 3 : i64, tpu.core_type = #tpu.core_type<tc>, window_params = [{transform_indices = @transform_0, window_bounds = array<i64: 8, 8, 64>}, {pipeline_mode = #tpu.pipeline_mode<synchronous>, transform_indices = @transform_1, window_bounds = array<i64: 64, 256>}, {pipeline_mode = #tpu.pipeline_mode<synchronous>, transform_indices = @transform_2, window_bounds = array<i64: 64, 256>}, {pipeline_mode = #tpu.pipeline_mode<synchronous>, transform_indices = @transform_3, window_bounds = array<i64: 1, 256>}, {transform_indices = @transform_4, window_bounds = array<i64: 8, 1>}, {pipeline_mode = #tpu.pipeline_mode<synchronous>, transform_indices = @transform_5, window_bounds = array<i64: 64, 1>}, {pipeline_mode = #tpu.pipeline_mode<synchronous>, transform_indices = @transform_6, window_bounds = array<i64: 1, 1>}, {transform_indices = @transform_7, window_bounds = array<i64: 8, 1>}]} {
    %c0 = arith.constant 0 : index
    %c0_0 = arith.constant 0 : index
    %c0_1 = arith.constant 0 : index
    %0 = vector.load %arg1[%c0, %c0_0, %c0_1] : memref<8x8x64xbf16, #tpu.memory_space<vmem>>, vector<8x8x64xbf16>
    %1 = vector.shape_cast %0 : vector<8x8x64xbf16> to vector<64x64xbf16>
    %c0_2 = arith.constant 0 : index
    %c0_3 = arith.constant 0 : index
    %2 = vector.load %arg2[%c0_2, %c0_3] : memref<64x256xbf16, #tpu.memory_space<vmem>>, vector<64x256xbf16>
    %cst = arith.constant dense<0.000000e+00> : vector<64x256xf32>
    %3 = tpu.matmul %1, %2, %cst {dimension_numbers = #tpu.dot_dimension_numbers<[1], [0], [0], [1], [0, 0, 1, 1], [], []>} : vector<64x64xbf16>, vector<64x256xbf16>, vector<64x256xf32> -> vector<64x256xf32>
    %4 = vector.shape_cast %3 : vector<64x256xf32> to vector<8x8x256xf32>
    %5 = arith.truncf %4 : vector<8x8x256xf32> to vector<8x8x256xbf16>
    %c0_4 = arith.constant 0 : index
    %c0_5 = arith.constant 0 : index
    %c0_6 = arith.constant 0 : index
    %6 = vector.load %arg9[%c0_4, %c0_5, %c0_6] : memref<8x8x256xbf16, #tpu.memory_space<vmem>>, vector<8x8x256xbf16>
    tpu.vector_store %arg9[%c0_4, %c0_5, %c0_6], %5 {strides = array<i32>} : memref<8x8x256xbf16, #tpu.memory_space<vmem>>, vector<8x8x256xbf16>,
    %cst_7 = arith.constant 0.000000e+00 : f32
    %7 = vector.broadcast %cst_7 : f32 to vector<8x64xf32>
    %c0_8 = arith.constant 0 : index
    %c0_9 = arith.constant 0 : index
    %8 = vector.load %arg10[%c0_8, %c0_9] : memref<8x64xf32, #tpu.memory_space<vmem>>, vector<8x64xf32>
    tpu.vector_store %arg10[%c0_8, %c0_9], %7 {strides = array<i32>} : memref<8x64xf32, #tpu.memory_space<vmem>>, vector<8x64xf32>,
    %cst_10 = arith.constant 0.000000e+00 : f32
    %9 = vector.broadcast %cst_10 : f32 to vector<8x64xf32>
    %c0_11 = arith.constant 0 : index
    %c0_12 = arith.constant 0 : index
    %10 = vector.load %arg11[%c0_11, %c0_12] : memref<8x64xf32, #tpu.memory_space<vmem>>, vector<8x64xf32>
    tpu.vector_store %arg11[%c0_11, %c0_12], %9 {strides = array<i32>} : memref<8x64xf32, #tpu.memory_space<vmem>>, vector<8x64xf32>,
    %c0_13 = arith.constant 0 : index
    %c0_14 = arith.constant 0 : index
    %11 = vector.load %arg5[%c0_13, %c0_14] : memref<8x1xi32, #tpu.memory_space<vmem>>, vector<8x1xi32>
    %c0_15 = arith.constant 0 : index
    %c0_16 = arith.constant 0 : index
    %12 = vector.load %arg3[%c0_15, %c0_16] : memref<64x256xbf16, #tpu.memory_space<vmem>>, vector<64x256xbf16>
    %c0_17 = arith.constant 0 : index
    %c0_18 = arith.constant 0 : index
    %13 = vector.load %arg4[%c0_17, %c0_18] : memref<1x256xf32, #tpu.memory_space<vmem>>, vector<1x256xf32>
    %14 = vector.shape_cast %13 : vector<1x256xf32> to vector<1x256xf32>
    %15 = vector.broadcast %14 : vector<1x256xf32> to vector<8x256xf32>
    %16 = tpu.iota {dimensions = array<i32: 1>} : vector<1x256xi32>
    %c64_i32 = arith.constant 64 : i32
    %c0_i32 = arith.constant 0 : i32
    %17 = arith.cmpi eq, %c64_i32, %c0_i32 : i32
    %c1_i32 = arith.constant 1 : i32
    %18 = arith.select %17, %c1_i32, %c64_i32 : i32
    %19 = vector.broadcast %18 : i32 to vector<1x256xi32>
    %20 = arith.remsi %16, %19 : vector<1x256xi32>
    %c0_i32_19 = arith.constant 0 : i32
    %21 = vector.broadcast %c0_i32_19 : i32 to vector<1x256xi32>
    %22 = arith.cmpi ne, %20, %21 : vector<1x256xi32>
    %c0_i32_20 = arith.constant 0 : i32
    %23 = vector.broadcast %c0_i32_20 : i32 to vector<1x256xi32>
    %24 = arith.cmpi slt, %20, %23 : vector<1x256xi32>
    %c0_i32_21 = arith.constant 0 : i32
    %25 = arith.cmpi slt, %18, %c0_i32_21 : i32
    %26 = vector.broadcast %25 : i1 to vector<1x256xi1>
    %27 = vector.broadcast %26 : vector<1x256xi1> to vector<1x256xi1>
    %28 = arith.xori %24, %27 : vector<1x256xi1>
    %29 = arith.andi %28, %22 : vector<1x256xi1>
    %30 = vector.broadcast %18 : i32 to vector<1x256xi32>
    %31 = arith.addi %20, %30 : vector<1x256xi32>
    %32 = arith.select %29, %31, %20 : vector<1x256xi1>, vector<1x256xi32>
    %c32_i32 = arith.constant 32 : i32
    %33 = vector.broadcast %c32_i32 : i32 to vector<1x256xi32>
    %34 = arith.cmpi slt, %32, %33 : vector<1x256xi32>
    %35 = tpu.iota {dimensions = array<i32: 1>} : vector<1x64xi32>
    %c32_i32_22 = arith.constant 32 : i32
    %36 = vector.broadcast %c32_i32_22 : i32 to vector<1x64xi32>
    %37 = arith.cmpi slt, %35, %36 : vector<1x64xi32>
    %c0_i32_23 = arith.constant 0 : i32
    %c7_i32 = arith.constant 7 : i32
    %38 = arith.subi %c7_i32, %c0_i32_23 : i32
    %c0_24 = arith.constant 0 : index
    %c0_25 = arith.constant 0 : index
    %39 = vector.load %arg10[%c0_24, %c0_25] : memref<8x64xf32, #tpu.memory_space<vmem>>, vector<8x64xf32>
    %c0_26 = arith.constant 0 : index
    %c0_27 = arith.constant 0 : index
    %40 = vector.load %arg11[%c0_26, %c0_27] : memref<8x64xf32, #tpu.memory_space<vmem>>, vector<8x64xf32>
    %41 = arith.index_cast %c0_i32_23 : i32 to index
    %c0_28 = arith.constant 0 : index
    %c0_29 = arith.constant 0 : index
    %42 = vector.load %arg9[%41, %c0_28, %c0_29] : memref<8x8x256xbf16, #tpu.memory_space<vmem>>, vector<1x8x256xbf16>
    %43 = vector.shape_cast %42 : vector<1x8x256xbf16> to vector<8x256xbf16>
    %44 = arith.index_cast %38 : i32 to index
    %c0_30 = arith.constant 0 : index
    %c0_31 = arith.constant 0 : index
    %45 = vector.load %arg9[%44, %c0_30, %c0_31] : memref<8x8x256xbf16, #tpu.memory_space<vmem>>, vector<1x8x256xbf16>
    %46 = vector.shape_cast %45 : vector<1x8x256xbf16> to vector<8x256xbf16>
    %47 = vector.shape_cast %34 : vector<1x256xi1> to vector<1x256xi1>
    %48 = vector.broadcast %47 : vector<1x256xi1> to vector<8x256xi1>
    %49 = arith.select %48, %43, %46 : vector<8x256xi1>, vector<8x256xbf16>
    %50 = arith.extf %49 : vector<8x256xbf16> to vector<8x256xf32>
    %51 = arith.addf %50, %15 : vector<8x256xf32>
    %52 = arith.truncf %39 : vector<8x64xf32> to vector<8x64xbf16>
    %cst_32 = arith.constant dense<0.000000e+00> : vector<8x256xf32>
    %53 = tpu.matmul %52, %12, %cst_32 {dimension_numbers = #tpu.dot_dimension_numbers<[1], [0], [0], [1], [0, 0, 1, 1], [], []>} : vector<8x64xbf16>, vector<64x256xbf16>, vector<8x256xf32> -> vector<8x256xf32>
    %54 = arith.addf %51, %53 : vector<8x256xf32>
    %55 = arith.negf %54 : vector<8x256xf32>
    %56 = math.exp %55 : vector<8x256xf32>
    %cst_33 = arith.constant 1.000000e+00 : f32
    %57 = vector.broadcast %cst_33 : f32 to vector<8x256xf32>
    %58 = arith.addf %57, %56 : vector<8x256xf32>
    %59 = arith.divf %57, %58 : vector<8x256xf32>
    %60 = vector.extract_strided_slice %59 {offsets = [0, 0], sizes = [8, 64], strides = [1, 1]} : vector<8x256xf32> to vector<8x64xf32>
    %61 = vector.extract_strided_slice %59 {offsets = [0, 64], sizes = [8, 64], strides = [1, 1]} : vector<8x256xf32> to vector<8x64xf32>
    %62 = vector.extract_strided_slice %59 {offsets = [0, 128], sizes = [8, 64], strides = [1, 1]} : vector<8x256xf32> to vector<8x64xf32>
    %cst_34 = arith.constant 2.000000e+00 : f32
    %63 = vector.broadcast %cst_34 : f32 to vector<8x64xf32>
    %64 = arith.mulf %63, %62 : vector<8x64xf32>
    %cst_35 = arith.constant 1.000000e+00 : f32
    %65 = vector.broadcast %cst_35 : f32 to vector<8x64xf32>
    %66 = arith.subf %64, %65 : vector<8x64xf32>
    %67 = vector.extract_strided_slice %59 {offsets = [0, 192], sizes = [8, 64], strides = [1, 1]} : vector<8x256xf32> to vector<8x64xf32>
    %68 = arith.mulf %61, %40 : vector<8x64xf32>
    %69 = arith.mulf %60, %66 : vector<8x64xf32>
    %70 = arith.addf %68, %69 : vector<8x64xf32>
    %71 = math.tanh %70 : vector<8x64xf32>
    %72 = arith.mulf %67, %71 : vector<8x64xf32>
    %73 = vector.broadcast %c0_i32_23 : i32 to vector<1x64xi32>
    %74 = vector.broadcast %38 : i32 to vector<1x64xi32>
    %75 = arith.select %37, %73, %74 : vector<1x64xi1>, vector<1x64xi32>
    %76 = vector.broadcast %75 : vector<1x64xi32> to vector<8x64xi32>
    %77 = vector.broadcast %11 : vector<8x1xi32> to vector<8x64xi32>
    %78 = arith.cmpi slt, %76, %77 : vector<8x64xi32>
    %79 = arith.select %78, %72, %39 : vector<8x64xi1>, vector<8x64xf32>
    %c0_36 = arith.constant 0 : index
    %c0_37 = arith.constant 0 : index
    %80 = vector.load %arg10[%c0_36, %c0_37] : memref<8x64xf32, #tpu.memory_space<vmem>>, vector<8x64xf32>
    tpu.vector_store %arg10[%c0_36, %c0_37], %79 {strides = array<i32>} : memref<8x64xf32, #tpu.memory_space<vmem>>, vector<8x64xf32>,
    %81 = arith.select %78, %70, %40 : vector<8x64xi1>, vector<8x64xf32>
    %c0_38 = arith.constant 0 : index
    %c0_39 = arith.constant 0 : index
    %82 = vector.load %arg11[%c0_38, %c0_39] : memref<8x64xf32, #tpu.memory_space<vmem>>, vector<8x64xf32>
    tpu.vector_store %arg11[%c0_38, %c0_39], %81 {strides = array<i32>} : memref<8x64xf32, #tpu.memory_space<vmem>>, vector<8x64xf32>,
    %c1_i32_40 = arith.constant 1 : i32
    %c7_i32_41 = arith.constant 7 : i32
    %83 = arith.subi %c7_i32_41, %c1_i32_40 : i32
    %c0_42 = arith.constant 0 : index
    %c0_43 = arith.constant 0 : index
    %84 = vector.load %arg10[%c0_42, %c0_43] : memref<8x64xf32, #tpu.memory_space<vmem>>, vector<8x64xf32>
    %c0_44 = arith.constant 0 : index
    %c0_45 = arith.constant 0 : index
    %85 = vector.load %arg11[%c0_44, %c0_45] : memref<8x64xf32, #tpu.memory_space<vmem>>, vector<8x64xf32>
    %86 = arith.index_cast %c1_i32_40 : i32 to index
    %c0_46 = arith.constant 0 : index
    %c0_47 = arith.constant 0 : index
    %87 = vector.load %arg9[%86, %c0_46, %c0_47] : memref<8x8x256xbf16, #tpu.memory_space<vmem>>, vector<1x8x256xbf16>
    %88 = vector.shape_cast %87 : vector<1x8x256xbf16> to vector<8x256xbf16>
    %89 = arith.index_cast %83 : i32 to index
    %c0_48 = arith.constant 0 : index
    %c0_49 = arith.constant 0 : index
    %90 = vector.load %arg9[%89, %c0_48, %c0_49] : memref<8x8x256xbf16, #tpu.memory_space<vmem>>, vector<1x8x256xbf16>
    %91 = vector.shape_cast %90 : vector<1x8x256xbf16> to vector<8x256xbf16>
    %92 = vector.shape_cast %34 : vector<1x256xi1> to vector<1x256xi1>
    %93 = vector.broadcast %92 : vector<1x256xi1> to vector<8x256xi1>
    %94 = arith.select %93, %88, %91 : vector<8x256xi1>, vector<8x256xbf16>
    %95 = arith.extf %94 : vector<8x256xbf16> to vector<8x256xf32>
    %96 = arith.addf %95, %15 : vector<8x256xf32>
    %97 = arith.truncf %84 : vector<8x64xf32> to vector<8x64xbf16>
    %cst_50 = arith.constant dense<0.000000e+00> : vector<8x256xf32>
    %98 = tpu.matmul %97, %12, %cst_50 {dimension_numbers = #tpu.dot_dimension_numbers<[1], [0], [0], [1], [0, 0, 1, 1], [], []>} : vector<8x64xbf16>, vector<64x256xbf16>, vector<8x256xf32> -> vector<8x256xf32>
    %99 = arith.addf %96, %98 : vector<8x256xf32>
    %100 = arith.negf %99 : vector<8x256xf32>
    %101 = math.exp %100 : vector<8x256xf32>
    %cst_51 = arith.constant 1.000000e+00 : f32
    %102 = vector.broadcast %cst_51 : f32 to vector<8x256xf32>
    %103 = arith.addf %102, %101 : vector<8x256xf32>
    %104 = arith.divf %102, %103 : vector<8x256xf32>
    %105 = vector.extract_strided_slice %104 {offsets = [0, 0], sizes = [8, 64], strides = [1, 1]} : vector<8x256xf32> to vector<8x64xf32>
    %106 = vector.extract_strided_slice %104 {offsets = [0, 64], sizes = [8, 64], strides = [1, 1]} : vector<8x256xf32> to vector<8x64xf32>
    %107 = vector.extract_strided_slice %104 {offsets = [0, 128], sizes = [8, 64], strides = [1, 1]} : vector<8x256xf32> to vector<8x64xf32>
    %cst_52 = arith.constant 2.000000e+00 : f32
    %108 = vector.broadcast %cst_52 : f32 to vector<8x64xf32>
    %109 = arith.mulf %108, %107 : vector<8x64xf32>
    %cst_53 = arith.constant 1.000000e+00 : f32
    %110 = vector.broadcast %cst_53 : f32 to vector<8x64xf32>
    %111 = arith.subf %109, %110 : vector<8x64xf32>
    %112 = vector.extract_strided_slice %104 {offsets = [0, 192], sizes = [8, 64], strides = [1, 1]} : vector<8x256xf32> to vector<8x64xf32>
    %113 = arith.mulf %106, %85 : vector<8x64xf32>
    %114 = arith.mulf %105, %111 : vector<8x64xf32>
    %115 = arith.addf %113, %114 : vector<8x64xf32>
    %116 = math.tanh %115 : vector<8x64xf32>
    %117 = arith.mulf %112, %116 : vector<8x64xf32>
    %118 = vector.broadcast %c1_i32_40 : i32 to vector<1x64xi32>
    %119 = vector.broadcast %83 : i32 to vector<1x64xi32>
    %120 = arith.select %37, %118, %119 : vector<1x64xi1>, vector<1x64xi32>
    %121 = vector.broadcast %120 : vector<1x64xi32> to vector<8x64xi32>
    %122 = vector.broadcast %11 : vector<8x1xi32> to vector<8x64xi32>
    %123 = arith.cmpi slt, %121, %122 : vector<8x64xi32>
    %124 = arith.select %123, %117, %84 : vector<8x64xi1>, vector<8x64xf32>
    %c0_54 = arith.constant 0 : index
    %c0_55 = arith.constant 0 : index
    %125 = vector.load %arg10[%c0_54, %c0_55] : memref<8x64xf32, #tpu.memory_space<vmem>>, vector<8x64xf32>
    tpu.vector_store %arg10[%c0_54, %c0_55], %124 {strides = array<i32>} : memref<8x64xf32, #tpu.memory_space<vmem>>, vector<8x64xf32>,
    %126 = arith.select %123, %115, %85 : vector<8x64xi1>, vector<8x64xf32>
    %c0_56 = arith.constant 0 : index
    %c0_57 = arith.constant 0 : index
    %127 = vector.load %arg11[%c0_56, %c0_57] : memref<8x64xf32, #tpu.memory_space<vmem>>, vector<8x64xf32>
    tpu.vector_store %arg11[%c0_56, %c0_57], %126 {strides = array<i32>} : memref<8x64xf32, #tpu.memory_space<vmem>>, vector<8x64xf32>,
    %c2_i32 = arith.constant 2 : i32
    %c7_i32_58 = arith.constant 7 : i32
    %128 = arith.subi %c7_i32_58, %c2_i32 : i32
    %c0_59 = arith.constant 0 : index
    %c0_60 = arith.constant 0 : index
    %129 = vector.load %arg10[%c0_59, %c0_60] : memref<8x64xf32, #tpu.memory_space<vmem>>, vector<8x64xf32>
    %c0_61 = arith.constant 0 : index
    %c0_62 = arith.constant 0 : index
    %130 = vector.load %arg11[%c0_61, %c0_62] : memref<8x64xf32, #tpu.memory_space<vmem>>, vector<8x64xf32>
    %131 = arith.index_cast %c2_i32 : i32 to index
    %c0_63 = arith.constant 0 : index
    %c0_64 = arith.constant 0 : index
    %132 = vector.load %arg9[%131, %c0_63, %c0_64] : memref<8x8x256xbf16, #tpu.memory_space<vmem>>, vector<1x8x256xbf16>
    %133 = vector.shape_cast %132 : vector<1x8x256xbf16> to vector<8x256xbf16>
    %134 = arith.index_cast %128 : i32 to index
    %c0_65 = arith.constant 0 : index
    %c0_66 = arith.constant 0 : index
    %135 = vector.load %arg9[%134, %c0_65, %c0_66] : memref<8x8x256xbf16, #tpu.memory_space<vmem>>, vector<1x8x256xbf16>
    %136 = vector.shape_cast %135 : vector<1x8x256xbf16> to vector<8x256xbf16>
    %137 = vector.shape_cast %34 : vector<1x256xi1> to vector<1x256xi1>
    %138 = vector.broadcast %137 : vector<1x256xi1> to vector<8x256xi1>
    %139 = arith.select %138, %133, %136 : vector<8x256xi1>, vector<8x256xbf16>
    %140 = arith.extf %139 : vector<8x256xbf16> to vector<8x256xf32>
    %141 = arith.addf %140, %15 : vector<8x256xf32>
    %142 = arith.truncf %129 : vector<8x64xf32> to vector<8x64xbf16>
    %cst_67 = arith.constant dense<0.000000e+00> : vector<8x256xf32>
    %143 = tpu.matmul %142, %12, %cst_67 {dimension_numbers = #tpu.dot_dimension_numbers<[1], [0], [0], [1], [0, 0, 1, 1], [], []>} : vector<8x64xbf16>, vector<64x256xbf16>, vector<8x256xf32> -> vector<8x256xf32>
    %144 = arith.addf %141, %143 : vector<8x256xf32>
    %145 = arith.negf %144 : vector<8x256xf32>
    %146 = math.exp %145 : vector<8x256xf32>
    %cst_68 = arith.constant 1.000000e+00 : f32
    %147 = vector.broadcast %cst_68 : f32 to vector<8x256xf32>
    %148 = arith.addf %147, %146 : vector<8x256xf32>
    %149 = arith.divf %147, %148 : vector<8x256xf32>
    %150 = vector.extract_strided_slice %149 {offsets = [0, 0], sizes = [8, 64], strides = [1, 1]} : vector<8x256xf32> to vector<8x64xf32>
    %151 = vector.extract_strided_slice %149 {offsets = [0, 64], sizes = [8, 64], strides = [1, 1]} : vector<8x256xf32> to vector<8x64xf32>
    %152 = vector.extract_strided_slice %149 {offsets = [0, 128], sizes = [8, 64], strides = [1, 1]} : vector<8x256xf32> to vector<8x64xf32>
    %cst_69 = arith.constant 2.000000e+00 : f32
    %153 = vector.broadcast %cst_69 : f32 to vector<8x64xf32>
    %154 = arith.mulf %153, %152 : vector<8x64xf32>
    %cst_70 = arith.constant 1.000000e+00 : f32
    %155 = vector.broadcast %cst_70 : f32 to vector<8x64xf32>
    %156 = arith.subf %154, %155 : vector<8x64xf32>
    %157 = vector.extract_strided_slice %149 {offsets = [0, 192], sizes = [8, 64], strides = [1, 1]} : vector<8x256xf32> to vector<8x64xf32>
    %158 = arith.mulf %151, %130 : vector<8x64xf32>
    %159 = arith.mulf %150, %156 : vector<8x64xf32>
    %160 = arith.addf %158, %159 : vector<8x64xf32>
    %161 = math.tanh %160 : vector<8x64xf32>
    %162 = arith.mulf %157, %161 : vector<8x64xf32>
    %163 = vector.broadcast %c2_i32 : i32 to vector<1x64xi32>
    %164 = vector.broadcast %128 : i32 to vector<1x64xi32>
    %165 = arith.select %37, %163, %164 : vector<1x64xi1>, vector<1x64xi32>
    %166 = vector.broadcast %165 : vector<1x64xi32> to vector<8x64xi32>
    %167 = vector.broadcast %11 : vector<8x1xi32> to vector<8x64xi32>
    %168 = arith.cmpi slt, %166, %167 : vector<8x64xi32>
    %169 = arith.select %168, %162, %129 : vector<8x64xi1>, vector<8x64xf32>
    %c0_71 = arith.constant 0 : index
    %c0_72 = arith.constant 0 : index
    %170 = vector.load %arg10[%c0_71, %c0_72] : memref<8x64xf32, #tpu.memory_space<vmem>>, vector<8x64xf32>
    tpu.vector_store %arg10[%c0_71, %c0_72], %169 {strides = array<i32>} : memref<8x64xf32, #tpu.memory_space<vmem>>, vector<8x64xf32>,
    %171 = arith.select %168, %160, %130 : vector<8x64xi1>, vector<8x64xf32>
    %c0_73 = arith.constant 0 : index
    %c0_74 = arith.constant 0 : index
    %172 = vector.load %arg11[%c0_73, %c0_74] : memref<8x64xf32, #tpu.memory_space<vmem>>, vector<8x64xf32>
    tpu.vector_store %arg11[%c0_73, %c0_74], %171 {strides = array<i32>} : memref<8x64xf32, #tpu.memory_space<vmem>>, vector<8x64xf32>,
    %c3_i32 = arith.constant 3 : i32
    %c7_i32_75 = arith.constant 7 : i32
    %173 = arith.subi %c7_i32_75, %c3_i32 : i32
    %c0_76 = arith.constant 0 : index
    %c0_77 = arith.constant 0 : index
    %174 = vector.load %arg10[%c0_76, %c0_77] : memref<8x64xf32, #tpu.memory_space<vmem>>, vector<8x64xf32>
    %c0_78 = arith.constant 0 : index
    %c0_79 = arith.constant 0 : index
    %175 = vector.load %arg11[%c0_78, %c0_79] : memref<8x64xf32, #tpu.memory_space<vmem>>, vector<8x64xf32>
    %176 = arith.index_cast %c3_i32 : i32 to index
    %c0_80 = arith.constant 0 : index
    %c0_81 = arith.constant 0 : index
    %177 = vector.load %arg9[%176, %c0_80, %c0_81] : memref<8x8x256xbf16, #tpu.memory_space<vmem>>, vector<1x8x256xbf16>
    %178 = vector.shape_cast %177 : vector<1x8x256xbf16> to vector<8x256xbf16>
    %179 = arith.index_cast %173 : i32 to index
    %c0_82 = arith.constant 0 : index
    %c0_83 = arith.constant 0 : index
    %180 = vector.load %arg9[%179, %c0_82, %c0_83] : memref<8x8x256xbf16, #tpu.memory_space<vmem>>, vector<1x8x256xbf16>
    %181 = vector.shape_cast %180 : vector<1x8x256xbf16> to vector<8x256xbf16>
    %182 = vector.shape_cast %34 : vector<1x256xi1> to vector<1x256xi1>
    %183 = vector.broadcast %182 : vector<1x256xi1> to vector<8x256xi1>
    %184 = arith.select %183, %178, %181 : vector<8x256xi1>, vector<8x256xbf16>
    %185 = arith.extf %184 : vector<8x256xbf16> to vector<8x256xf32>
    %186 = arith.addf %185, %15 : vector<8x256xf32>
    %187 = arith.truncf %174 : vector<8x64xf32> to vector<8x64xbf16>
    %cst_84 = arith.constant dense<0.000000e+00> : vector<8x256xf32>
    %188 = tpu.matmul %187, %12, %cst_84 {dimension_numbers = #tpu.dot_dimension_numbers<[1], [0], [0], [1], [0, 0, 1, 1], [], []>} : vector<8x64xbf16>, vector<64x256xbf16>, vector<8x256xf32> -> vector<8x256xf32>
    %189 = arith.addf %186, %188 : vector<8x256xf32>
    %190 = arith.negf %189 : vector<8x256xf32>
    %191 = math.exp %190 : vector<8x256xf32>
    %cst_85 = arith.constant 1.000000e+00 : f32
    %192 = vector.broadcast %cst_85 : f32 to vector<8x256xf32>
    %193 = arith.addf %192, %191 : vector<8x256xf32>
    %194 = arith.divf %192, %193 : vector<8x256xf32>
    %195 = vector.extract_strided_slice %194 {offsets = [0, 0], sizes = [8, 64], strides = [1, 1]} : vector<8x256xf32> to vector<8x64xf32>
    %196 = vector.extract_strided_slice %194 {offsets = [0, 64], sizes = [8, 64], strides = [1, 1]} : vector<8x256xf32> to vector<8x64xf32>
    %197 = vector.extract_strided_slice %194 {offsets = [0, 128], sizes = [8, 64], strides = [1, 1]} : vector<8x256xf32> to vector<8x64xf32>
    %cst_86 = arith.constant 2.000000e+00 : f32
    %198 = vector.broadcast %cst_86 : f32 to vector<8x64xf32>
    %199 = arith.mulf %198, %197 : vector<8x64xf32>
    %cst_87 = arith.constant 1.000000e+00 : f32
    %200 = vector.broadcast %cst_87 : f32 to vector<8x64xf32>
    %201 = arith.subf %199, %200 : vector<8x64xf32>
    %202 = vector.extract_strided_slice %194 {offsets = [0, 192], sizes = [8, 64], strides = [1, 1]} : vector<8x256xf32> to vector<8x64xf32>
    %203 = arith.mulf %196, %175 : vector<8x64xf32>
    %204 = arith.mulf %195, %201 : vector<8x64xf32>
    %205 = arith.addf %203, %204 : vector<8x64xf32>
    %206 = math.tanh %205 : vector<8x64xf32>
    %207 = arith.mulf %202, %206 : vector<8x64xf32>
    %208 = vector.broadcast %c3_i32 : i32 to vector<1x64xi32>
    %209 = vector.broadcast %173 : i32 to vector<1x64xi32>
    %210 = arith.select %37, %208, %209 : vector<1x64xi1>, vector<1x64xi32>
    %211 = vector.broadcast %210 : vector<1x64xi32> to vector<8x64xi32>
    %212 = vector.broadcast %11 : vector<8x1xi32> to vector<8x64xi32>
    %213 = arith.cmpi slt, %211, %212 : vector<8x64xi32>
    %214 = arith.select %213, %207, %174 : vector<8x64xi1>, vector<8x64xf32>
    %c0_88 = arith.constant 0 : index
    %c0_89 = arith.constant 0 : index
    %215 = vector.load %arg10[%c0_88, %c0_89] : memref<8x64xf32, #tpu.memory_space<vmem>>, vector<8x64xf32>
    tpu.vector_store %arg10[%c0_88, %c0_89], %214 {strides = array<i32>} : memref<8x64xf32, #tpu.memory_space<vmem>>, vector<8x64xf32>,
    %216 = arith.select %213, %205, %175 : vector<8x64xi1>, vector<8x64xf32>
    %c0_90 = arith.constant 0 : index
    %c0_91 = arith.constant 0 : index
    %217 = vector.load %arg11[%c0_90, %c0_91] : memref<8x64xf32, #tpu.memory_space<vmem>>, vector<8x64xf32>
    tpu.vector_store %arg11[%c0_90, %c0_91], %216 {strides = array<i32>} : memref<8x64xf32, #tpu.memory_space<vmem>>, vector<8x64xf32>,
    %c4_i32 = arith.constant 4 : i32
    %c7_i32_92 = arith.constant 7 : i32
    %218 = arith.subi %c7_i32_92, %c4_i32 : i32
    %c0_93 = arith.constant 0 : index
    %c0_94 = arith.constant 0 : index
    %219 = vector.load %arg10[%c0_93, %c0_94] : memref<8x64xf32, #tpu.memory_space<vmem>>, vector<8x64xf32>
    %c0_95 = arith.constant 0 : index
    %c0_96 = arith.constant 0 : index
    %220 = vector.load %arg11[%c0_95, %c0_96] : memref<8x64xf32, #tpu.memory_space<vmem>>, vector<8x64xf32>
    %221 = arith.index_cast %c4_i32 : i32 to index
    %c0_97 = arith.constant 0 : index
    %c0_98 = arith.constant 0 : index
    %222 = vector.load %arg9[%221, %c0_97, %c0_98] : memref<8x8x256xbf16, #tpu.memory_space<vmem>>, vector<1x8x256xbf16>
    %223 = vector.shape_cast %222 : vector<1x8x256xbf16> to vector<8x256xbf16>
    %224 = arith.index_cast %218 : i32 to index
    %c0_99 = arith.constant 0 : index
    %c0_100 = arith.constant 0 : index
    %225 = vector.load %arg9[%224, %c0_99, %c0_100] : memref<8x8x256xbf16, #tpu.memory_space<vmem>>, vector<1x8x256xbf16>
    %226 = vector.shape_cast %225 : vector<1x8x256xbf16> to vector<8x256xbf16>
    %227 = vector.shape_cast %34 : vector<1x256xi1> to vector<1x256xi1>
    %228 = vector.broadcast %227 : vector<1x256xi1> to vector<8x256xi1>
    %229 = arith.select %228, %223, %226 : vector<8x256xi1>, vector<8x256xbf16>
    %230 = arith.extf %229 : vector<8x256xbf16> to vector<8x256xf32>
    %231 = arith.addf %230, %15 : vector<8x256xf32>
    %232 = arith.truncf %219 : vector<8x64xf32> to vector<8x64xbf16>
    %cst_101 = arith.constant dense<0.000000e+00> : vector<8x256xf32>
    %233 = tpu.matmul %232, %12, %cst_101 {dimension_numbers = #tpu.dot_dimension_numbers<[1], [0], [0], [1], [0, 0, 1, 1], [], []>} : vector<8x64xbf16>, vector<64x256xbf16>, vector<8x256xf32> -> vector<8x256xf32>
    %234 = arith.addf %231, %233 : vector<8x256xf32>
    %235 = arith.negf %234 : vector<8x256xf32>
    %236 = math.exp %235 : vector<8x256xf32>
    %cst_102 = arith.constant 1.000000e+00 : f32
    %237 = vector.broadcast %cst_102 : f32 to vector<8x256xf32>
    %238 = arith.addf %237, %236 : vector<8x256xf32>
    %239 = arith.divf %237, %238 : vector<8x256xf32>
    %240 = vector.extract_strided_slice %239 {offsets = [0, 0], sizes = [8, 64], strides = [1, 1]} : vector<8x256xf32> to vector<8x64xf32>
    %241 = vector.extract_strided_slice %239 {offsets = [0, 64], sizes = [8, 64], strides = [1, 1]} : vector<8x256xf32> to vector<8x64xf32>
    %242 = vector.extract_strided_slice %239 {offsets = [0, 128], sizes = [8, 64], strides = [1, 1]} : vector<8x256xf32> to vector<8x64xf32>
    %cst_103 = arith.constant 2.000000e+00 : f32
    %243 = vector.broadcast %cst_103 : f32 to vector<8x64xf32>
    %244 = arith.mulf %243, %242 : vector<8x64xf32>
    %cst_104 = arith.constant 1.000000e+00 : f32
    %245 = vector.broadcast %cst_104 : f32 to vector<8x64xf32>
    %246 = arith.subf %244, %245 : vector<8x64xf32>
    %247 = vector.extract_strided_slice %239 {offsets = [0, 192], sizes = [8, 64], strides = [1, 1]} : vector<8x256xf32> to vector<8x64xf32>
    %248 = arith.mulf %241, %220 : vector<8x64xf32>
    %249 = arith.mulf %240, %246 : vector<8x64xf32>
    %250 = arith.addf %248, %249 : vector<8x64xf32>
    %251 = math.tanh %250 : vector<8x64xf32>
    %252 = arith.mulf %247, %251 : vector<8x64xf32>
    %253 = vector.broadcast %c4_i32 : i32 to vector<1x64xi32>
    %254 = vector.broadcast %218 : i32 to vector<1x64xi32>
    %255 = arith.select %37, %253, %254 : vector<1x64xi1>, vector<1x64xi32>
    %256 = vector.broadcast %255 : vector<1x64xi32> to vector<8x64xi32>
    %257 = vector.broadcast %11 : vector<8x1xi32> to vector<8x64xi32>
    %258 = arith.cmpi slt, %256, %257 : vector<8x64xi32>
    %259 = arith.select %258, %252, %219 : vector<8x64xi1>, vector<8x64xf32>
    %c0_105 = arith.constant 0 : index
    %c0_106 = arith.constant 0 : index
    %260 = vector.load %arg10[%c0_105, %c0_106] : memref<8x64xf32, #tpu.memory_space<vmem>>, vector<8x64xf32>
    tpu.vector_store %arg10[%c0_105, %c0_106], %259 {strides = array<i32>} : memref<8x64xf32, #tpu.memory_space<vmem>>, vector<8x64xf32>,
    %261 = arith.select %258, %250, %220 : vector<8x64xi1>, vector<8x64xf32>
    %c0_107 = arith.constant 0 : index
    %c0_108 = arith.constant 0 : index
    %262 = vector.load %arg11[%c0_107, %c0_108] : memref<8x64xf32, #tpu.memory_space<vmem>>, vector<8x64xf32>
    tpu.vector_store %arg11[%c0_107, %c0_108], %261 {strides = array<i32>} : memref<8x64xf32, #tpu.memory_space<vmem>>, vector<8x64xf32>,
    %c5_i32 = arith.constant 5 : i32
    %c7_i32_109 = arith.constant 7 : i32
    %263 = arith.subi %c7_i32_109, %c5_i32 : i32
    %c0_110 = arith.constant 0 : index
    %c0_111 = arith.constant 0 : index
    %264 = vector.load %arg10[%c0_110, %c0_111] : memref<8x64xf32, #tpu.memory_space<vmem>>, vector<8x64xf32>
    %c0_112 = arith.constant 0 : index
    %c0_113 = arith.constant 0 : index
    %265 = vector.load %arg11[%c0_112, %c0_113] : memref<8x64xf32, #tpu.memory_space<vmem>>, vector<8x64xf32>
    %266 = arith.index_cast %c5_i32 : i32 to index
    %c0_114 = arith.constant 0 : index
    %c0_115 = arith.constant 0 : index
    %267 = vector.load %arg9[%266, %c0_114, %c0_115] : memref<8x8x256xbf16, #tpu.memory_space<vmem>>, vector<1x8x256xbf16>
    %268 = vector.shape_cast %267 : vector<1x8x256xbf16> to vector<8x256xbf16>
    %269 = arith.index_cast %263 : i32 to index
    %c0_116 = arith.constant 0 : index
    %c0_117 = arith.constant 0 : index
    %270 = vector.load %arg9[%269, %c0_116, %c0_117] : memref<8x8x256xbf16, #tpu.memory_space<vmem>>, vector<1x8x256xbf16>
    %271 = vector.shape_cast %270 : vector<1x8x256xbf16> to vector<8x256xbf16>
    %272 = vector.shape_cast %34 : vector<1x256xi1> to vector<1x256xi1>
    %273 = vector.broadcast %272 : vector<1x256xi1> to vector<8x256xi1>
    %274 = arith.select %273, %268, %271 : vector<8x256xi1>, vector<8x256xbf16>
    %275 = arith.extf %274 : vector<8x256xbf16> to vector<8x256xf32>
    %276 = arith.addf %275, %15 : vector<8x256xf32>
    %277 = arith.truncf %264 : vector<8x64xf32> to vector<8x64xbf16>
    %cst_118 = arith.constant dense<0.000000e+00> : vector<8x256xf32>
    %278 = tpu.matmul %277, %12, %cst_118 {dimension_numbers = #tpu.dot_dimension_numbers<[1], [0], [0], [1], [0, 0, 1, 1], [], []>} : vector<8x64xbf16>, vector<64x256xbf16>, vector<8x256xf32> -> vector<8x256xf32>
    %279 = arith.addf %276, %278 : vector<8x256xf32>
    %280 = arith.negf %279 : vector<8x256xf32>
    %281 = math.exp %280 : vector<8x256xf32>
    %cst_119 = arith.constant 1.000000e+00 : f32
    %282 = vector.broadcast %cst_119 : f32 to vector<8x256xf32>
    %283 = arith.addf %282, %281 : vector<8x256xf32>
    %284 = arith.divf %282, %283 : vector<8x256xf32>
    %285 = vector.extract_strided_slice %284 {offsets = [0, 0], sizes = [8, 64], strides = [1, 1]} : vector<8x256xf32> to vector<8x64xf32>
    %286 = vector.extract_strided_slice %284 {offsets = [0, 64], sizes = [8, 64], strides = [1, 1]} : vector<8x256xf32> to vector<8x64xf32>
    %287 = vector.extract_strided_slice %284 {offsets = [0, 128], sizes = [8, 64], strides = [1, 1]} : vector<8x256xf32> to vector<8x64xf32>
    %cst_120 = arith.constant 2.000000e+00 : f32
    %288 = vector.broadcast %cst_120 : f32 to vector<8x64xf32>
    %289 = arith.mulf %288, %287 : vector<8x64xf32>
    %cst_121 = arith.constant 1.000000e+00 : f32
    %290 = vector.broadcast %cst_121 : f32 to vector<8x64xf32>
    %291 = arith.subf %289, %290 : vector<8x64xf32>
    %292 = vector.extract_strided_slice %284 {offsets = [0, 192], sizes = [8, 64], strides = [1, 1]} : vector<8x256xf32> to vector<8x64xf32>
    %293 = arith.mulf %286, %265 : vector<8x64xf32>
    %294 = arith.mulf %285, %291 : vector<8x64xf32>
    %295 = arith.addf %293, %294 : vector<8x64xf32>
    %296 = math.tanh %295 : vector<8x64xf32>
    %297 = arith.mulf %292, %296 : vector<8x64xf32>
    %298 = vector.broadcast %c5_i32 : i32 to vector<1x64xi32>
    %299 = vector.broadcast %263 : i32 to vector<1x64xi32>
    %300 = arith.select %37, %298, %299 : vector<1x64xi1>, vector<1x64xi32>
    %301 = vector.broadcast %300 : vector<1x64xi32> to vector<8x64xi32>
    %302 = vector.broadcast %11 : vector<8x1xi32> to vector<8x64xi32>
    %303 = arith.cmpi slt, %301, %302 : vector<8x64xi32>
    %304 = arith.select %303, %297, %264 : vector<8x64xi1>, vector<8x64xf32>
    %c0_122 = arith.constant 0 : index
    %c0_123 = arith.constant 0 : index
    %305 = vector.load %arg10[%c0_122, %c0_123] : memref<8x64xf32, #tpu.memory_space<vmem>>, vector<8x64xf32>
    tpu.vector_store %arg10[%c0_122, %c0_123], %304 {strides = array<i32>} : memref<8x64xf32, #tpu.memory_space<vmem>>, vector<8x64xf32>,
    %306 = arith.select %303, %295, %265 : vector<8x64xi1>, vector<8x64xf32>
    %c0_124 = arith.constant 0 : index
    %c0_125 = arith.constant 0 : index
    %307 = vector.load %arg11[%c0_124, %c0_125] : memref<8x64xf32, #tpu.memory_space<vmem>>, vector<8x64xf32>
    tpu.vector_store %arg11[%c0_124, %c0_125], %306 {strides = array<i32>} : memref<8x64xf32, #tpu.memory_space<vmem>>, vector<8x64xf32>,
    %c6_i32 = arith.constant 6 : i32
    %c7_i32_126 = arith.constant 7 : i32
    %308 = arith.subi %c7_i32_126, %c6_i32 : i32
    %c0_127 = arith.constant 0 : index
    %c0_128 = arith.constant 0 : index
    %309 = vector.load %arg10[%c0_127, %c0_128] : memref<8x64xf32, #tpu.memory_space<vmem>>, vector<8x64xf32>
    %c0_129 = arith.constant 0 : index
    %c0_130 = arith.constant 0 : index
    %310 = vector.load %arg11[%c0_129, %c0_130] : memref<8x64xf32, #tpu.memory_space<vmem>>, vector<8x64xf32>
    %311 = arith.index_cast %c6_i32 : i32 to index
    %c0_131 = arith.constant 0 : index
    %c0_132 = arith.constant 0 : index
    %312 = vector.load %arg9[%311, %c0_131, %c0_132] : memref<8x8x256xbf16, #tpu.memory_space<vmem>>, vector<1x8x256xbf16>
    %313 = vector.shape_cast %312 : vector<1x8x256xbf16> to vector<8x256xbf16>
    %314 = arith.index_cast %308 : i32 to index
    %c0_133 = arith.constant 0 : index
    %c0_134 = arith.constant 0 : index
    %315 = vector.load %arg9[%314, %c0_133, %c0_134] : memref<8x8x256xbf16, #tpu.memory_space<vmem>>, vector<1x8x256xbf16>
    %316 = vector.shape_cast %315 : vector<1x8x256xbf16> to vector<8x256xbf16>
    %317 = vector.shape_cast %34 : vector<1x256xi1> to vector<1x256xi1>
    %318 = vector.broadcast %317 : vector<1x256xi1> to vector<8x256xi1>
    %319 = arith.select %318, %313, %316 : vector<8x256xi1>, vector<8x256xbf16>
    %320 = arith.extf %319 : vector<8x256xbf16> to vector<8x256xf32>
    %321 = arith.addf %320, %15 : vector<8x256xf32>
    %322 = arith.truncf %309 : vector<8x64xf32> to vector<8x64xbf16>
    %cst_135 = arith.constant dense<0.000000e+00> : vector<8x256xf32>
    %323 = tpu.matmul %322, %12, %cst_135 {dimension_numbers = #tpu.dot_dimension_numbers<[1], [0], [0], [1], [0, 0, 1, 1], [], []>} : vector<8x64xbf16>, vector<64x256xbf16>, vector<8x256xf32> -> vector<8x256xf32>
    %324 = arith.addf %321, %323 : vector<8x256xf32>
    %325 = arith.negf %324 : vector<8x256xf32>
    %326 = math.exp %325 : vector<8x256xf32>
    %cst_136 = arith.constant 1.000000e+00 : f32
    %327 = vector.broadcast %cst_136 : f32 to vector<8x256xf32>
    %328 = arith.addf %327, %326 : vector<8x256xf32>
    %329 = arith.divf %327, %328 : vector<8x256xf32>
    %330 = vector.extract_strided_slice %329 {offsets = [0, 0], sizes = [8, 64], strides = [1, 1]} : vector<8x256xf32> to vector<8x64xf32>
    %331 = vector.extract_strided_slice %329 {offsets = [0, 64], sizes = [8, 64], strides = [1, 1]} : vector<8x256xf32> to vector<8x64xf32>
    %332 = vector.extract_strided_slice %329 {offsets = [0, 128], sizes = [8, 64], strides = [1, 1]} : vector<8x256xf32> to vector<8x64xf32>
    %cst_137 = arith.constant 2.000000e+00 : f32
    %333 = vector.broadcast %cst_137 : f32 to vector<8x64xf32>
    %334 = arith.mulf %333, %332 : vector<8x64xf32>
    %cst_138 = arith.constant 1.000000e+00 : f32
    %335 = vector.broadcast %cst_138 : f32 to vector<8x64xf32>
    %336 = arith.subf %334, %335 : vector<8x64xf32>
    %337 = vector.extract_strided_slice %329 {offsets = [0, 192], sizes = [8, 64], strides = [1, 1]} : vector<8x256xf32> to vector<8x64xf32>
    %338 = arith.mulf %331, %310 : vector<8x64xf32>
    %339 = arith.mulf %330, %336 : vector<8x64xf32>
    %340 = arith.addf %338, %339 : vector<8x64xf32>
    %341 = math.tanh %340 : vector<8x64xf32>
    %342 = arith.mulf %337, %341 : vector<8x64xf32>
    %343 = vector.broadcast %c6_i32 : i32 to vector<1x64xi32>
    %344 = vector.broadcast %308 : i32 to vector<1x64xi32>
    %345 = arith.select %37, %343, %344 : vector<1x64xi1>, vector<1x64xi32>
    %346 = vector.broadcast %345 : vector<1x64xi32> to vector<8x64xi32>
    %347 = vector.broadcast %11 : vector<8x1xi32> to vector<8x64xi32>
    %348 = arith.cmpi slt, %346, %347 : vector<8x64xi32>
    %349 = arith.select %348, %342, %309 : vector<8x64xi1>, vector<8x64xf32>
    %c0_139 = arith.constant 0 : index
    %c0_140 = arith.constant 0 : index
    %350 = vector.load %arg10[%c0_139, %c0_140] : memref<8x64xf32, #tpu.memory_space<vmem>>, vector<8x64xf32>
    tpu.vector_store %arg10[%c0_139, %c0_140], %349 {strides = array<i32>} : memref<8x64xf32, #tpu.memory_space<vmem>>, vector<8x64xf32>,
    %351 = arith.select %348, %340, %310 : vector<8x64xi1>, vector<8x64xf32>
    %c0_141 = arith.constant 0 : index
    %c0_142 = arith.constant 0 : index
    %352 = vector.load %arg11[%c0_141, %c0_142] : memref<8x64xf32, #tpu.memory_space<vmem>>, vector<8x64xf32>
    tpu.vector_store %arg11[%c0_141, %c0_142], %351 {strides = array<i32>} : memref<8x64xf32, #tpu.memory_space<vmem>>, vector<8x64xf32>,
    %c7_i32_143 = arith.constant 7 : i32
    %c7_i32_144 = arith.constant 7 : i32
    %353 = arith.subi %c7_i32_144, %c7_i32_143 : i32
    %c0_145 = arith.constant 0 : index
    %c0_146 = arith.constant 0 : index
    %354 = vector.load %arg10[%c0_145, %c0_146] : memref<8x64xf32, #tpu.memory_space<vmem>>, vector<8x64xf32>
    %c0_147 = arith.constant 0 : index
    %c0_148 = arith.constant 0 : index
    %355 = vector.load %arg11[%c0_147, %c0_148] : memref<8x64xf32, #tpu.memory_space<vmem>>, vector<8x64xf32>
    %356 = arith.index_cast %c7_i32_143 : i32 to index
    %c0_149 = arith.constant 0 : index
    %c0_150 = arith.constant 0 : index
    %357 = vector.load %arg9[%356, %c0_149, %c0_150] : memref<8x8x256xbf16, #tpu.memory_space<vmem>>, vector<1x8x256xbf16>
    %358 = vector.shape_cast %357 : vector<1x8x256xbf16> to vector<8x256xbf16>
    %359 = arith.index_cast %353 : i32 to index
    %c0_151 = arith.constant 0 : index
    %c0_152 = arith.constant 0 : index
    %360 = vector.load %arg9[%359, %c0_151, %c0_152] : memref<8x8x256xbf16, #tpu.memory_space<vmem>>, vector<1x8x256xbf16>
    %361 = vector.shape_cast %360 : vector<1x8x256xbf16> to vector<8x256xbf16>
    %362 = vector.shape_cast %34 : vector<1x256xi1> to vector<1x256xi1>
    %363 = vector.broadcast %362 : vector<1x256xi1> to vector<8x256xi1>
    %364 = arith.select %363, %358, %361 : vector<8x256xi1>, vector<8x256xbf16>
    %365 = arith.extf %364 : vector<8x256xbf16> to vector<8x256xf32>
    %366 = arith.addf %365, %15 : vector<8x256xf32>
    %367 = arith.truncf %354 : vector<8x64xf32> to vector<8x64xbf16>
    %cst_153 = arith.constant dense<0.000000e+00> : vector<8x256xf32>
    %368 = tpu.matmul %367, %12, %cst_153 {dimension_numbers = #tpu.dot_dimension_numbers<[1], [0], [0], [1], [0, 0, 1, 1], [], []>} : vector<8x64xbf16>, vector<64x256xbf16>, vector<8x256xf32> -> vector<8x256xf32>
    %369 = arith.addf %366, %368 : vector<8x256xf32>
    %370 = arith.negf %369 : vector<8x256xf32>
    %371 = math.exp %370 : vector<8x256xf32>
    %cst_154 = arith.constant 1.000000e+00 : f32
    %372 = vector.broadcast %cst_154 : f32 to vector<8x256xf32>
    %373 = arith.addf %372, %371 : vector<8x256xf32>
    %374 = arith.divf %372, %373 : vector<8x256xf32>
    %375 = vector.extract_strided_slice %374 {offsets = [0, 0], sizes = [8, 64], strides = [1, 1]} : vector<8x256xf32> to vector<8x64xf32>
    %376 = vector.extract_strided_slice %374 {offsets = [0, 64], sizes = [8, 64], strides = [1, 1]} : vector<8x256xf32> to vector<8x64xf32>
    %377 = vector.extract_strided_slice %374 {offsets = [0, 128], sizes = [8, 64], strides = [1, 1]} : vector<8x256xf32> to vector<8x64xf32>
    %cst_155 = arith.constant 2.000000e+00 : f32
    %378 = vector.broadcast %cst_155 : f32 to vector<8x64xf32>
    %379 = arith.mulf %378, %377 : vector<8x64xf32>
    %cst_156 = arith.constant 1.000000e+00 : f32
    %380 = vector.broadcast %cst_156 : f32 to vector<8x64xf32>
    %381 = arith.subf %379, %380 : vector<8x64xf32>
    %382 = vector.extract_strided_slice %374 {offsets = [0, 192], sizes = [8, 64], strides = [1, 1]} : vector<8x256xf32> to vector<8x64xf32>
    %383 = arith.mulf %376, %355 : vector<8x64xf32>
    %384 = arith.mulf %375, %381 : vector<8x64xf32>
    %385 = arith.addf %383, %384 : vector<8x64xf32>
    %386 = math.tanh %385 : vector<8x64xf32>
    %387 = arith.mulf %382, %386 : vector<8x64xf32>
    %388 = vector.broadcast %c7_i32_143 : i32 to vector<1x64xi32>
    %389 = vector.broadcast %353 : i32 to vector<1x64xi32>
    %390 = arith.select %37, %388, %389 : vector<1x64xi1>, vector<1x64xi32>
    %391 = vector.broadcast %390 : vector<1x64xi32> to vector<8x64xi32>
    %392 = vector.broadcast %11 : vector<8x1xi32> to vector<8x64xi32>
    %393 = arith.cmpi slt, %391, %392 : vector<8x64xi32>
    %394 = arith.select %393, %387, %354 : vector<8x64xi1>, vector<8x64xf32>
    %c0_157 = arith.constant 0 : index
    %c0_158 = arith.constant 0 : index
    %395 = vector.load %arg10[%c0_157, %c0_158] : memref<8x64xf32, #tpu.memory_space<vmem>>, vector<8x64xf32>
    tpu.vector_store %arg10[%c0_157, %c0_158], %394 {strides = array<i32>} : memref<8x64xf32, #tpu.memory_space<vmem>>, vector<8x64xf32>,
    %396 = arith.select %393, %385, %355 : vector<8x64xi1>, vector<8x64xf32>
    %c0_159 = arith.constant 0 : index
    %c0_160 = arith.constant 0 : index
    %397 = vector.load %arg11[%c0_159, %c0_160] : memref<8x64xf32, #tpu.memory_space<vmem>>, vector<8x64xf32>
    tpu.vector_store %arg11[%c0_159, %c0_160], %396 {strides = array<i32>} : memref<8x64xf32, #tpu.memory_space<vmem>>, vector<8x64xf32>,
    %c8_i32 = arith.constant 8 : i32
    %c0_161 = arith.constant 0 : index
    %c0_162 = arith.constant 0 : index
    %398 = vector.load %arg10[%c0_161, %c0_162] : memref<8x64xf32, #tpu.memory_space<vmem>>, vector<8x64xf32>
    %c0_163 = arith.constant 0 : index
    %c0_164 = arith.constant 0 : index
    %399 = vector.load %arg6[%c0_163, %c0_164] : memref<64x1xf32, #tpu.memory_space<vmem>>, vector<64x1xf32>
    %cst_165 = arith.constant dense<0.000000e+00> : vector<8x1xf32>
    %400 = tpu.matmul %398, %399, %cst_165 {dimension_numbers = #tpu.dot_dimension_numbers<[1], [0], [0], [1], [0, 0, 1, 1], [], []>} : vector<8x64xf32>, vector<64x1xf32>, vector<8x1xf32> -> vector<8x1xf32>
    %c0_166 = arith.constant 0 : index
    %c0_167 = arith.constant 0 : index
    %401 = vector.load %arg7[%c0_166, %c0_167] : memref<1x1xf32, #tpu.memory_space<vmem>>, vector<1x1xf32>
    %402 = vector.broadcast %401 : vector<1x1xf32> to vector<8x1xf32>
    %403 = arith.addf %400, %402 : vector<8x1xf32>
    %404 = arith.negf %403 : vector<8x1xf32>
    %405 = math.exp %404 : vector<8x1xf32>
    %cst_168 = arith.constant 1.000000e+00 : f32
    %406 = vector.broadcast %cst_168 : f32 to vector<8x1xf32>
    %407 = arith.addf %406, %405 : vector<8x1xf32>
    %408 = arith.divf %406, %407 : vector<8x1xf32>
    %c0_169 = arith.constant 0 : index
    %c0_170 = arith.constant 0 : index
    %409 = vector.load %arg8[%c0_169, %c0_170] : memref<8x1xf32, #tpu.memory_space<vmem>>, vector<8x1xf32>
    tpu.vector_store %arg8[%c0_169, %c0_170], %408 {strides = array<i32>} : memref<8x1xf32, #tpu.memory_space<vmem>>, vector<8x1xf32>,
    return
  }
  func.func @transform_0(%arg0: i32) -> (i32, i32, i32) {
    %c0_i32 = arith.constant 0 : i32
    %c0_i32_0 = arith.constant 0 : i32
    %c0_i32_1 = arith.constant 0 : i32
    return %c0_i32, %arg0, %c0_i32_0 : i32, i32, i32
  }
  func.func @transform_1(%arg0: i32) -> (i32, i32) {
    %c0_i32 = arith.constant 0 : i32
    %c0_i32_0 = arith.constant 0 : i32
    %c0_i32_1 = arith.constant 0 : i32
    return %c0_i32, %c0_i32_0 : i32, i32
  }
  func.func @transform_2(%arg0: i32) -> (i32, i32) {
    %c0_i32 = arith.constant 0 : i32
    %c0_i32_0 = arith.constant 0 : i32
    %c0_i32_1 = arith.constant 0 : i32
    return %c0_i32, %c0_i32_0 : i32, i32
  }
  func.func @transform_3(%arg0: i32) -> (i32, i32) {
    %c0_i32 = arith.constant 0 : i32
    %c0_i32_0 = arith.constant 0 : i32
    %c0_i32_1 = arith.constant 0 : i32
    return %c0_i32, %c0_i32_0 : i32, i32
  }
  func.func @transform_4(%arg0: i32) -> (i32, i32) {
    %c0_i32 = arith.constant 0 : i32
    %c0_i32_0 = arith.constant 0 : i32
    return %arg0, %c0_i32 : i32, i32
  }
  func.func @transform_5(%arg0: i32) -> (i32, i32) {
    %c0_i32 = arith.constant 0 : i32
    %c0_i32_0 = arith.constant 0 : i32
    %c0_i32_1 = arith.constant 0 : i32
    return %c0_i32, %c0_i32_0 : i32, i32
  }
  func.func @transform_6(%arg0: i32) -> (i32, i32) {
    %c0_i32 = arith.constant 0 : i32
    %c0_i32_0 = arith.constant 0 : i32
    %c0_i32_1 = arith.constant 0 : i32
    return %c0_i32, %c0_i32_0 : i32, i32
  }
  func.func @transform_7(%arg0: i32) -> (i32, i32) {
    %c0_i32 = arith.constant 0 : i32
    %c0_i32_0 = arith.constant 0 : i32
    return %arg0, %c0_i32 : i32, i32
  }
}

module attributes {stable_mosaic.version = 11 : i64} {
  func.func @_bilstm_layer_kernel(%arg0: i32, %arg1: memref<8x8x32xbf16, #tpu.memory_space<vmem>>, %arg2: memref<32x256xbf16, #tpu.memory_space<vmem>>, %arg3: memref<64x256xbf16, #tpu.memory_space<vmem>>, %arg4: memref<1x256xf32, #tpu.memory_space<vmem>>, %arg5: memref<8x1xi32, #tpu.memory_space<vmem>>, %arg6: memref<8x8x64xbf16, #tpu.memory_space<vmem>>, %arg7: memref<8x8x256xbf16, #tpu.memory_space<vmem>>, %arg8: memref<8x64xf32, #tpu.memory_space<vmem>>, %arg9: memref<8x64xf32, #tpu.memory_space<vmem>>) attributes {dimension_semantics = [#tpu.dimension_semantics<parallel>], iteration_bounds = array<i64: 1>, scalar_prefetch = 0 : i64, scratch_operands = 3 : i64, tpu.core_type = #tpu.core_type<tc>, window_params = [{transform_indices = @transform_0, window_bounds = array<i64: 8, 8, 32>}, {pipeline_mode = #tpu.pipeline_mode<synchronous>, transform_indices = @transform_1, window_bounds = array<i64: 32, 256>}, {pipeline_mode = #tpu.pipeline_mode<synchronous>, transform_indices = @transform_2, window_bounds = array<i64: 64, 256>}, {pipeline_mode = #tpu.pipeline_mode<synchronous>, transform_indices = @transform_3, window_bounds = array<i64: 1, 256>}, {transform_indices = @transform_4, window_bounds = array<i64: 8, 1>}, {transform_indices = @transform_5, window_bounds = array<i64: 8, 8, 64>}]} {
    %c0 = arith.constant 0 : index
    %c0_0 = arith.constant 0 : index
    %c0_1 = arith.constant 0 : index
    %0 = vector.load %arg1[%c0, %c0_0, %c0_1] : memref<8x8x32xbf16, #tpu.memory_space<vmem>>, vector<8x8x32xbf16>
    %1 = vector.shape_cast %0 : vector<8x8x32xbf16> to vector<64x32xbf16>
    %c0_2 = arith.constant 0 : index
    %c0_3 = arith.constant 0 : index
    %2 = vector.load %arg2[%c0_2, %c0_3] : memref<32x256xbf16, #tpu.memory_space<vmem>>, vector<32x256xbf16>
    %cst = arith.constant dense<0.000000e+00> : vector<64x256xf32>
    %3 = tpu.matmul %1, %2, %cst {dimension_numbers = #tpu.dot_dimension_numbers<[1], [0], [0], [1], [0, 0, 1, 1], [], []>} : vector<64x32xbf16>, vector<32x256xbf16>, vector<64x256xf32> -> vector<64x256xf32>
    %4 = vector.shape_cast %3 : vector<64x256xf32> to vector<8x8x256xf32>
    %5 = arith.truncf %4 : vector<8x8x256xf32> to vector<8x8x256xbf16>
    %c0_4 = arith.constant 0 : index
    %c0_5 = arith.constant 0 : index
    %c0_6 = arith.constant 0 : index
    %6 = vector.load %arg7[%c0_4, %c0_5, %c0_6] : memref<8x8x256xbf16, #tpu.memory_space<vmem>>, vector<8x8x256xbf16>
    tpu.vector_store %arg7[%c0_4, %c0_5, %c0_6], %5 {strides = array<i32>} : memref<8x8x256xbf16, #tpu.memory_space<vmem>>, vector<8x8x256xbf16>,
    %cst_7 = arith.constant 0.000000e+00 : f32
    %7 = vector.broadcast %cst_7 : f32 to vector<8x64xf32>
    %c0_8 = arith.constant 0 : index
    %c0_9 = arith.constant 0 : index
    %8 = vector.load %arg8[%c0_8, %c0_9] : memref<8x64xf32, #tpu.memory_space<vmem>>, vector<8x64xf32>
    tpu.vector_store %arg8[%c0_8, %c0_9], %7 {strides = array<i32>} : memref<8x64xf32, #tpu.memory_space<vmem>>, vector<8x64xf32>,
    %cst_10 = arith.constant 0.000000e+00 : f32
    %9 = vector.broadcast %cst_10 : f32 to vector<8x64xf32>
    %c0_11 = arith.constant 0 : index
    %c0_12 = arith.constant 0 : index
    %10 = vector.load %arg9[%c0_11, %c0_12] : memref<8x64xf32, #tpu.memory_space<vmem>>, vector<8x64xf32>
    tpu.vector_store %arg9[%c0_11, %c0_12], %9 {strides = array<i32>} : memref<8x64xf32, #tpu.memory_space<vmem>>, vector<8x64xf32>,
    %c0_13 = arith.constant 0 : index
    %c0_14 = arith.constant 0 : index
    %11 = vector.load %arg5[%c0_13, %c0_14] : memref<8x1xi32, #tpu.memory_space<vmem>>, vector<8x1xi32>
    %c0_15 = arith.constant 0 : index
    %c0_16 = arith.constant 0 : index
    %12 = vector.load %arg3[%c0_15, %c0_16] : memref<64x256xbf16, #tpu.memory_space<vmem>>, vector<64x256xbf16>
    %c0_17 = arith.constant 0 : index
    %c0_18 = arith.constant 0 : index
    %13 = vector.load %arg4[%c0_17, %c0_18] : memref<1x256xf32, #tpu.memory_space<vmem>>, vector<1x256xf32>
    %14 = vector.shape_cast %13 : vector<1x256xf32> to vector<1x256xf32>
    %15 = vector.broadcast %14 : vector<1x256xf32> to vector<8x256xf32>
    %16 = tpu.iota {dimensions = array<i32: 1>} : vector<1x256xi32>
    %c64_i32 = arith.constant 64 : i32
    %c0_i32 = arith.constant 0 : i32
    %17 = arith.cmpi eq, %c64_i32, %c0_i32 : i32
    %c1_i32 = arith.constant 1 : i32
    %18 = arith.select %17, %c1_i32, %c64_i32 : i32
    %19 = vector.broadcast %18 : i32 to vector<1x256xi32>
    %20 = arith.remsi %16, %19 : vector<1x256xi32>
    %c0_i32_19 = arith.constant 0 : i32
    %21 = vector.broadcast %c0_i32_19 : i32 to vector<1x256xi32>
    %22 = arith.cmpi ne, %20, %21 : vector<1x256xi32>
    %c0_i32_20 = arith.constant 0 : i32
    %23 = vector.broadcast %c0_i32_20 : i32 to vector<1x256xi32>
    %24 = arith.cmpi slt, %20, %23 : vector<1x256xi32>
    %c0_i32_21 = arith.constant 0 : i32
    %25 = arith.cmpi slt, %18, %c0_i32_21 : i32
    %26 = vector.broadcast %25 : i1 to vector<1x256xi1>
    %27 = vector.broadcast %26 : vector<1x256xi1> to vector<1x256xi1>
    %28 = arith.xori %24, %27 : vector<1x256xi1>
    %29 = arith.andi %28, %22 : vector<1x256xi1>
    %30 = vector.broadcast %18 : i32 to vector<1x256xi32>
    %31 = arith.addi %20, %30 : vector<1x256xi32>
    %32 = arith.select %29, %31, %20 : vector<1x256xi1>, vector<1x256xi32>
    %c32_i32 = arith.constant 32 : i32
    %33 = vector.broadcast %c32_i32 : i32 to vector<1x256xi32>
    %34 = arith.cmpi slt, %32, %33 : vector<1x256xi32>
    %35 = tpu.iota {dimensions = array<i32: 1>} : vector<1x64xi32>
    %c32_i32_22 = arith.constant 32 : i32
    %36 = vector.broadcast %c32_i32_22 : i32 to vector<1x64xi32>
    %37 = arith.cmpi slt, %35, %36 : vector<1x64xi32>
    %c0_i32_23 = arith.constant 0 : i32
    %c7_i32 = arith.constant 7 : i32
    %38 = arith.subi %c7_i32, %c0_i32_23 : i32
    %c0_24 = arith.constant 0 : index
    %c0_25 = arith.constant 0 : index
    %39 = vector.load %arg8[%c0_24, %c0_25] : memref<8x64xf32, #tpu.memory_space<vmem>>, vector<8x64xf32>
    %c0_26 = arith.constant 0 : index
    %c0_27 = arith.constant 0 : index
    %40 = vector.load %arg9[%c0_26, %c0_27] : memref<8x64xf32, #tpu.memory_space<vmem>>, vector<8x64xf32>
    %41 = arith.index_cast %c0_i32_23 : i32 to index
    %c0_28 = arith.constant 0 : index
    %c0_29 = arith.constant 0 : index
    %42 = vector.load %arg7[%41, %c0_28, %c0_29] : memref<8x8x256xbf16, #tpu.memory_space<vmem>>, vector<1x8x256xbf16>
    %43 = vector.shape_cast %42 : vector<1x8x256xbf16> to vector<8x256xbf16>
    %44 = arith.index_cast %38 : i32 to index
    %c0_30 = arith.constant 0 : index
    %c0_31 = arith.constant 0 : index
    %45 = vector.load %arg7[%44, %c0_30, %c0_31] : memref<8x8x256xbf16, #tpu.memory_space<vmem>>, vector<1x8x256xbf16>
    %46 = vector.shape_cast %45 : vector<1x8x256xbf16> to vector<8x256xbf16>
    %47 = vector.shape_cast %34 : vector<1x256xi1> to vector<1x256xi1>
    %48 = vector.broadcast %47 : vector<1x256xi1> to vector<8x256xi1>
    %49 = arith.select %48, %43, %46 : vector<8x256xi1>, vector<8x256xbf16>
    %50 = arith.extf %49 : vector<8x256xbf16> to vector<8x256xf32>
    %51 = arith.addf %50, %15 : vector<8x256xf32>
    %52 = arith.truncf %39 : vector<8x64xf32> to vector<8x64xbf16>
    %cst_32 = arith.constant dense<0.000000e+00> : vector<8x256xf32>
    %53 = tpu.matmul %52, %12, %cst_32 {dimension_numbers = #tpu.dot_dimension_numbers<[1], [0], [0], [1], [0, 0, 1, 1], [], []>} : vector<8x64xbf16>, vector<64x256xbf16>, vector<8x256xf32> -> vector<8x256xf32>
    %54 = arith.addf %51, %53 : vector<8x256xf32>
    %55 = arith.negf %54 : vector<8x256xf32>
    %56 = math.exp %55 : vector<8x256xf32>
    %cst_33 = arith.constant 1.000000e+00 : f32
    %57 = vector.broadcast %cst_33 : f32 to vector<8x256xf32>
    %58 = arith.addf %57, %56 : vector<8x256xf32>
    %59 = arith.divf %57, %58 : vector<8x256xf32>
    %60 = vector.extract_strided_slice %59 {offsets = [0, 0], sizes = [8, 64], strides = [1, 1]} : vector<8x256xf32> to vector<8x64xf32>
    %61 = vector.extract_strided_slice %59 {offsets = [0, 64], sizes = [8, 64], strides = [1, 1]} : vector<8x256xf32> to vector<8x64xf32>
    %62 = vector.extract_strided_slice %59 {offsets = [0, 128], sizes = [8, 64], strides = [1, 1]} : vector<8x256xf32> to vector<8x64xf32>
    %cst_34 = arith.constant 2.000000e+00 : f32
    %63 = vector.broadcast %cst_34 : f32 to vector<8x64xf32>
    %64 = arith.mulf %63, %62 : vector<8x64xf32>
    %cst_35 = arith.constant 1.000000e+00 : f32
    %65 = vector.broadcast %cst_35 : f32 to vector<8x64xf32>
    %66 = arith.subf %64, %65 : vector<8x64xf32>
    %67 = vector.extract_strided_slice %59 {offsets = [0, 192], sizes = [8, 64], strides = [1, 1]} : vector<8x256xf32> to vector<8x64xf32>
    %68 = arith.mulf %61, %40 : vector<8x64xf32>
    %69 = arith.mulf %60, %66 : vector<8x64xf32>
    %70 = arith.addf %68, %69 : vector<8x64xf32>
    %71 = math.tanh %70 : vector<8x64xf32>
    %72 = arith.mulf %67, %71 : vector<8x64xf32>
    %73 = vector.broadcast %c0_i32_23 : i32 to vector<1x64xi32>
    %74 = vector.broadcast %38 : i32 to vector<1x64xi32>
    %75 = arith.select %37, %73, %74 : vector<1x64xi1>, vector<1x64xi32>
    %76 = vector.broadcast %75 : vector<1x64xi32> to vector<8x64xi32>
    %77 = vector.broadcast %11 : vector<8x1xi32> to vector<8x64xi32>
    %78 = arith.cmpi slt, %76, %77 : vector<8x64xi32>
    %79 = arith.select %78, %72, %39 : vector<8x64xi1>, vector<8x64xf32>
    %c0_36 = arith.constant 0 : index
    %c0_37 = arith.constant 0 : index
    %80 = vector.load %arg8[%c0_36, %c0_37] : memref<8x64xf32, #tpu.memory_space<vmem>>, vector<8x64xf32>
    tpu.vector_store %arg8[%c0_36, %c0_37], %79 {strides = array<i32>} : memref<8x64xf32, #tpu.memory_space<vmem>>, vector<8x64xf32>,
    %81 = arith.select %78, %70, %40 : vector<8x64xi1>, vector<8x64xf32>
    %c0_38 = arith.constant 0 : index
    %c0_39 = arith.constant 0 : index
    %82 = vector.load %arg9[%c0_38, %c0_39] : memref<8x64xf32, #tpu.memory_space<vmem>>, vector<8x64xf32>
    tpu.vector_store %arg9[%c0_38, %c0_39], %81 {strides = array<i32>} : memref<8x64xf32, #tpu.memory_space<vmem>>, vector<8x64xf32>,
    %83 = vector.broadcast %c0_i32_23 : i32 to vector<8x1xi32>
    %84 = arith.cmpi slt, %83, %11 : vector<8x1xi32>
    %85 = vector.broadcast %38 : i32 to vector<8x1xi32>
    %86 = arith.cmpi slt, %85, %11 : vector<8x1xi32>
    %87 = vector.extract_strided_slice %72 {offsets = [0, 0], sizes = [8, 32], strides = [1, 1]} : vector<8x64xf32> to vector<8x32xf32>
    %cst_40 = arith.constant 0.000000e+00 : f32
    %88 = vector.shape_cast %84 : vector<8x1xi1> to vector<8x1xi1>
    %89 = vector.broadcast %88 : vector<8x1xi1> to vector<8x32xi1>
    %90 = vector.broadcast %cst_40 : f32 to vector<8x32xf32>
    %91 = arith.select %89, %87, %90 : vector<8x32xi1>, vector<8x32xf32>
    %92 = arith.truncf %91 : vector<8x32xf32> to vector<8x32xbf16>
    %93 = arith.index_cast %c0_i32_23 : i32 to index
    %c0_41 = arith.constant 0 : index
    %c0_42 = arith.constant 0 : index
    %94 = vector.load %arg6[%93, %c0_41, %c0_42] : memref<8x8x64xbf16, #tpu.memory_space<vmem>>, vector<1x8x32xbf16>
    %95 = vector.shape_cast %94 : vector<1x8x32xbf16> to vector<8x32xbf16>
    %96 = vector.shape_cast %92 : vector<8x32xbf16> to vector<1x8x32xbf16>
    tpu.vector_store %arg6[%93, %c0_41, %c0_42], %96 {strides = array<i32>} : memref<8x8x64xbf16, #tpu.memory_space<vmem>>, vector<1x8x32xbf16>,
    %97 = vector.extract_strided_slice %72 {offsets = [0, 32], sizes = [8, 32], strides = [1, 1]} : vector<8x64xf32> to vector<8x32xf32>
    %cst_43 = arith.constant 0.000000e+00 : f32
    %98 = vector.shape_cast %86 : vector<8x1xi1> to vector<8x1xi1>
    %99 = vector.broadcast %98 : vector<8x1xi1> to vector<8x32xi1>
    %100 = vector.broadcast %cst_43 : f32 to vector<8x32xf32>
    %101 = arith.select %99, %97, %100 : vector<8x32xi1>, vector<8x32xf32>
    %102 = arith.truncf %101 : vector<8x32xf32> to vector<8x32xbf16>
    %103 = arith.index_cast %38 : i32 to index
    %c0_44 = arith.constant 0 : index
    %c32 = arith.constant 32 : index
    %104 = vector.load %arg6[%103, %c0_44, %c32] : memref<8x8x64xbf16, #tpu.memory_space<vmem>>, vector<1x8x32xbf16>
    %105 = vector.shape_cast %104 : vector<1x8x32xbf16> to vector<8x32xbf16>
    %106 = vector.shape_cast %102 : vector<8x32xbf16> to vector<1x8x32xbf16>
    tpu.vector_store %arg6[%103, %c0_44, %c32], %106 {strides = array<i32>} : memref<8x8x64xbf16, #tpu.memory_space<vmem>>, vector<1x8x32xbf16>,
    %c1_i32_45 = arith.constant 1 : i32
    %c7_i32_46 = arith.constant 7 : i32
    %107 = arith.subi %c7_i32_46, %c1_i32_45 : i32
    %c0_47 = arith.constant 0 : index
    %c0_48 = arith.constant 0 : index
    %108 = vector.load %arg8[%c0_47, %c0_48] : memref<8x64xf32, #tpu.memory_space<vmem>>, vector<8x64xf32>
    %c0_49 = arith.constant 0 : index
    %c0_50 = arith.constant 0 : index
    %109 = vector.load %arg9[%c0_49, %c0_50] : memref<8x64xf32, #tpu.memory_space<vmem>>, vector<8x64xf32>
    %110 = arith.index_cast %c1_i32_45 : i32 to index
    %c0_51 = arith.constant 0 : index
    %c0_52 = arith.constant 0 : index
    %111 = vector.load %arg7[%110, %c0_51, %c0_52] : memref<8x8x256xbf16, #tpu.memory_space<vmem>>, vector<1x8x256xbf16>
    %112 = vector.shape_cast %111 : vector<1x8x256xbf16> to vector<8x256xbf16>
    %113 = arith.index_cast %107 : i32 to index
    %c0_53 = arith.constant 0 : index
    %c0_54 = arith.constant 0 : index
    %114 = vector.load %arg7[%113, %c0_53, %c0_54] : memref<8x8x256xbf16, #tpu.memory_space<vmem>>, vector<1x8x256xbf16>
    %115 = vector.shape_cast %114 : vector<1x8x256xbf16> to vector<8x256xbf16>
    %116 = vector.shape_cast %34 : vector<1x256xi1> to vector<1x256xi1>
    %117 = vector.broadcast %116 : vector<1x256xi1> to vector<8x256xi1>
    %118 = arith.select %117, %112, %115 : vector<8x256xi1>, vector<8x256xbf16>
    %119 = arith.extf %118 : vector<8x256xbf16> to vector<8x256xf32>
    %120 = arith.addf %119, %15 : vector<8x256xf32>
    %121 = arith.truncf %108 : vector<8x64xf32> to vector<8x64xbf16>
    %cst_55 = arith.constant dense<0.000000e+00> : vector<8x256xf32>
    %122 = tpu.matmul %121, %12, %cst_55 {dimension_numbers = #tpu.dot_dimension_numbers<[1], [0], [0], [1], [0, 0, 1, 1], [], []>} : vector<8x64xbf16>, vector<64x256xbf16>, vector<8x256xf32> -> vector<8x256xf32>
    %123 = arith.addf %120, %122 : vector<8x256xf32>
    %124 = arith.negf %123 : vector<8x256xf32>
    %125 = math.exp %124 : vector<8x256xf32>
    %cst_56 = arith.constant 1.000000e+00 : f32
    %126 = vector.broadcast %cst_56 : f32 to vector<8x256xf32>
    %127 = arith.addf %126, %125 : vector<8x256xf32>
    %128 = arith.divf %126, %127 : vector<8x256xf32>
    %129 = vector.extract_strided_slice %128 {offsets = [0, 0], sizes = [8, 64], strides = [1, 1]} : vector<8x256xf32> to vector<8x64xf32>
    %130 = vector.extract_strided_slice %128 {offsets = [0, 64], sizes = [8, 64], strides = [1, 1]} : vector<8x256xf32> to vector<8x64xf32>
    %131 = vector.extract_strided_slice %128 {offsets = [0, 128], sizes = [8, 64], strides = [1, 1]} : vector<8x256xf32> to vector<8x64xf32>
    %cst_57 = arith.constant 2.000000e+00 : f32
    %132 = vector.broadcast %cst_57 : f32 to vector<8x64xf32>
    %133 = arith.mulf %132, %131 : vector<8x64xf32>
    %cst_58 = arith.constant 1.000000e+00 : f32
    %134 = vector.broadcast %cst_58 : f32 to vector<8x64xf32>
    %135 = arith.subf %133, %134 : vector<8x64xf32>
    %136 = vector.extract_strided_slice %128 {offsets = [0, 192], sizes = [8, 64], strides = [1, 1]} : vector<8x256xf32> to vector<8x64xf32>
    %137 = arith.mulf %130, %109 : vector<8x64xf32>
    %138 = arith.mulf %129, %135 : vector<8x64xf32>
    %139 = arith.addf %137, %138 : vector<8x64xf32>
    %140 = math.tanh %139 : vector<8x64xf32>
    %141 = arith.mulf %136, %140 : vector<8x64xf32>
    %142 = vector.broadcast %c1_i32_45 : i32 to vector<1x64xi32>
    %143 = vector.broadcast %107 : i32 to vector<1x64xi32>
    %144 = arith.select %37, %142, %143 : vector<1x64xi1>, vector<1x64xi32>
    %145 = vector.broadcast %144 : vector<1x64xi32> to vector<8x64xi32>
    %146 = vector.broadcast %11 : vector<8x1xi32> to vector<8x64xi32>
    %147 = arith.cmpi slt, %145, %146 : vector<8x64xi32>
    %148 = arith.select %147, %141, %108 : vector<8x64xi1>, vector<8x64xf32>
    %c0_59 = arith.constant 0 : index
    %c0_60 = arith.constant 0 : index
    %149 = vector.load %arg8[%c0_59, %c0_60] : memref<8x64xf32, #tpu.memory_space<vmem>>, vector<8x64xf32>
    tpu.vector_store %arg8[%c0_59, %c0_60], %148 {strides = array<i32>} : memref<8x64xf32, #tpu.memory_space<vmem>>, vector<8x64xf32>,
    %150 = arith.select %147, %139, %109 : vector<8x64xi1>, vector<8x64xf32>
    %c0_61 = arith.constant 0 : index
    %c0_62 = arith.constant 0 : index
    %151 = vector.load %arg9[%c0_61, %c0_62] : memref<8x64xf32, #tpu.memory_space<vmem>>, vector<8x64xf32>
    tpu.vector_store %arg9[%c0_61, %c0_62], %150 {strides = array<i32>} : memref<8x64xf32, #tpu.memory_space<vmem>>, vector<8x64xf32>,
    %152 = vector.broadcast %c1_i32_45 : i32 to vector<8x1xi32>
    %153 = arith.cmpi slt, %152, %11 : vector<8x1xi32>
    %154 = vector.broadcast %107 : i32 to vector<8x1xi32>
    %155 = arith.cmpi slt, %154, %11 : vector<8x1xi32>
    %156 = vector.extract_strided_slice %141 {offsets = [0, 0], sizes = [8, 32], strides = [1, 1]} : vector<8x64xf32> to vector<8x32xf32>
    %cst_63 = arith.constant 0.000000e+00 : f32
    %157 = vector.shape_cast %153 : vector<8x1xi1> to vector<8x1xi1>
    %158 = vector.broadcast %157 : vector<8x1xi1> to vector<8x32xi1>
    %159 = vector.broadcast %cst_63 : f32 to vector<8x32xf32>
    %160 = arith.select %158, %156, %159 : vector<8x32xi1>, vector<8x32xf32>
    %161 = arith.truncf %160 : vector<8x32xf32> to vector<8x32xbf16>
    %162 = arith.index_cast %c1_i32_45 : i32 to index
    %c0_64 = arith.constant 0 : index
    %c0_65 = arith.constant 0 : index
    %163 = vector.load %arg6[%162, %c0_64, %c0_65] : memref<8x8x64xbf16, #tpu.memory_space<vmem>>, vector<1x8x32xbf16>
    %164 = vector.shape_cast %163 : vector<1x8x32xbf16> to vector<8x32xbf16>
    %165 = vector.shape_cast %161 : vector<8x32xbf16> to vector<1x8x32xbf16>
    tpu.vector_store %arg6[%162, %c0_64, %c0_65], %165 {strides = array<i32>} : memref<8x8x64xbf16, #tpu.memory_space<vmem>>, vector<1x8x32xbf16>,
    %166 = vector.extract_strided_slice %141 {offsets = [0, 32], sizes = [8, 32], strides = [1, 1]} : vector<8x64xf32> to vector<8x32xf32>
    %cst_66 = arith.constant 0.000000e+00 : f32
    %167 = vector.shape_cast %155 : vector<8x1xi1> to vector<8x1xi1>
    %168 = vector.broadcast %167 : vector<8x1xi1> to vector<8x32xi1>
    %169 = vector.broadcast %cst_66 : f32 to vector<8x32xf32>
    %170 = arith.select %168, %166, %169 : vector<8x32xi1>, vector<8x32xf32>
    %171 = arith.truncf %170 : vector<8x32xf32> to vector<8x32xbf16>
    %172 = arith.index_cast %107 : i32 to index
    %c0_67 = arith.constant 0 : index
    %c32_68 = arith.constant 32 : index
    %173 = vector.load %arg6[%172, %c0_67, %c32_68] : memref<8x8x64xbf16, #tpu.memory_space<vmem>>, vector<1x8x32xbf16>
    %174 = vector.shape_cast %173 : vector<1x8x32xbf16> to vector<8x32xbf16>
    %175 = vector.shape_cast %171 : vector<8x32xbf16> to vector<1x8x32xbf16>
    tpu.vector_store %arg6[%172, %c0_67, %c32_68], %175 {strides = array<i32>} : memref<8x8x64xbf16, #tpu.memory_space<vmem>>, vector<1x8x32xbf16>,
    %c2_i32 = arith.constant 2 : i32
    %c7_i32_69 = arith.constant 7 : i32
    %176 = arith.subi %c7_i32_69, %c2_i32 : i32
    %c0_70 = arith.constant 0 : index
    %c0_71 = arith.constant 0 : index
    %177 = vector.load %arg8[%c0_70, %c0_71] : memref<8x64xf32, #tpu.memory_space<vmem>>, vector<8x64xf32>
    %c0_72 = arith.constant 0 : index
    %c0_73 = arith.constant 0 : index
    %178 = vector.load %arg9[%c0_72, %c0_73] : memref<8x64xf32, #tpu.memory_space<vmem>>, vector<8x64xf32>
    %179 = arith.index_cast %c2_i32 : i32 to index
    %c0_74 = arith.constant 0 : index
    %c0_75 = arith.constant 0 : index
    %180 = vector.load %arg7[%179, %c0_74, %c0_75] : memref<8x8x256xbf16, #tpu.memory_space<vmem>>, vector<1x8x256xbf16>
    %181 = vector.shape_cast %180 : vector<1x8x256xbf16> to vector<8x256xbf16>
    %182 = arith.index_cast %176 : i32 to index
    %c0_76 = arith.constant 0 : index
    %c0_77 = arith.constant 0 : index
    %183 = vector.load %arg7[%182, %c0_76, %c0_77] : memref<8x8x256xbf16, #tpu.memory_space<vmem>>, vector<1x8x256xbf16>
    %184 = vector.shape_cast %183 : vector<1x8x256xbf16> to vector<8x256xbf16>
    %185 = vector.shape_cast %34 : vector<1x256xi1> to vector<1x256xi1>
    %186 = vector.broadcast %185 : vector<1x256xi1> to vector<8x256xi1>
    %187 = arith.select %186, %181, %184 : vector<8x256xi1>, vector<8x256xbf16>
    %188 = arith.extf %187 : vector<8x256xbf16> to vector<8x256xf32>
    %189 = arith.addf %188, %15 : vector<8x256xf32>
    %190 = arith.truncf %177 : vector<8x64xf32> to vector<8x64xbf16>
    %cst_78 = arith.constant dense<0.000000e+00> : vector<8x256xf32>
    %191 = tpu.matmul %190, %12, %cst_78 {dimension_numbers = #tpu.dot_dimension_numbers<[1], [0], [0], [1], [0, 0, 1, 1], [], []>} : vector<8x64xbf16>, vector<64x256xbf16>, vector<8x256xf32> -> vector<8x256xf32>
    %192 = arith.addf %189, %191 : vector<8x256xf32>
    %193 = arith.negf %192 : vector<8x256xf32>
    %194 = math.exp %193 : vector<8x256xf32>
    %cst_79 = arith.constant 1.000000e+00 : f32
    %195 = vector.broadcast %cst_79 : f32 to vector<8x256xf32>
    %196 = arith.addf %195, %194 : vector<8x256xf32>
    %197 = arith.divf %195, %196 : vector<8x256xf32>
    %198 = vector.extract_strided_slice %197 {offsets = [0, 0], sizes = [8, 64], strides = [1, 1]} : vector<8x256xf32> to vector<8x64xf32>
    %199 = vector.extract_strided_slice %197 {offsets = [0, 64], sizes = [8, 64], strides = [1, 1]} : vector<8x256xf32> to vector<8x64xf32>
    %200 = vector.extract_strided_slice %197 {offsets = [0, 128], sizes = [8, 64], strides = [1, 1]} : vector<8x256xf32> to vector<8x64xf32>
    %cst_80 = arith.constant 2.000000e+00 : f32
    %201 = vector.broadcast %cst_80 : f32 to vector<8x64xf32>
    %202 = arith.mulf %201, %200 : vector<8x64xf32>
    %cst_81 = arith.constant 1.000000e+00 : f32
    %203 = vector.broadcast %cst_81 : f32 to vector<8x64xf32>
    %204 = arith.subf %202, %203 : vector<8x64xf32>
    %205 = vector.extract_strided_slice %197 {offsets = [0, 192], sizes = [8, 64], strides = [1, 1]} : vector<8x256xf32> to vector<8x64xf32>
    %206 = arith.mulf %199, %178 : vector<8x64xf32>
    %207 = arith.mulf %198, %204 : vector<8x64xf32>
    %208 = arith.addf %206, %207 : vector<8x64xf32>
    %209 = math.tanh %208 : vector<8x64xf32>
    %210 = arith.mulf %205, %209 : vector<8x64xf32>
    %211 = vector.broadcast %c2_i32 : i32 to vector<1x64xi32>
    %212 = vector.broadcast %176 : i32 to vector<1x64xi32>
    %213 = arith.select %37, %211, %212 : vector<1x64xi1>, vector<1x64xi32>
    %214 = vector.broadcast %213 : vector<1x64xi32> to vector<8x64xi32>
    %215 = vector.broadcast %11 : vector<8x1xi32> to vector<8x64xi32>
    %216 = arith.cmpi slt, %214, %215 : vector<8x64xi32>
    %217 = arith.select %216, %210, %177 : vector<8x64xi1>, vector<8x64xf32>
    %c0_82 = arith.constant 0 : index
    %c0_83 = arith.constant 0 : index
    %218 = vector.load %arg8[%c0_82, %c0_83] : memref<8x64xf32, #tpu.memory_space<vmem>>, vector<8x64xf32>
    tpu.vector_store %arg8[%c0_82, %c0_83], %217 {strides = array<i32>} : memref<8x64xf32, #tpu.memory_space<vmem>>, vector<8x64xf32>,
    %219 = arith.select %216, %208, %178 : vector<8x64xi1>, vector<8x64xf32>
    %c0_84 = arith.constant 0 : index
    %c0_85 = arith.constant 0 : index
    %220 = vector.load %arg9[%c0_84, %c0_85] : memref<8x64xf32, #tpu.memory_space<vmem>>, vector<8x64xf32>
    tpu.vector_store %arg9[%c0_84, %c0_85], %219 {strides = array<i32>} : memref<8x64xf32, #tpu.memory_space<vmem>>, vector<8x64xf32>,
    %221 = vector.broadcast %c2_i32 : i32 to vector<8x1xi32>
    %222 = arith.cmpi slt, %221, %11 : vector<8x1xi32>
    %223 = vector.broadcast %176 : i32 to vector<8x1xi32>
    %224 = arith.cmpi slt, %223, %11 : vector<8x1xi32>
    %225 = vector.extract_strided_slice %210 {offsets = [0, 0], sizes = [8, 32], strides = [1, 1]} : vector<8x64xf32> to vector<8x32xf32>
    %cst_86 = arith.constant 0.000000e+00 : f32
    %226 = vector.shape_cast %222 : vector<8x1xi1> to vector<8x1xi1>
    %227 = vector.broadcast %226 : vector<8x1xi1> to vector<8x32xi1>
    %228 = vector.broadcast %cst_86 : f32 to vector<8x32xf32>
    %229 = arith.select %227, %225, %228 : vector<8x32xi1>, vector<8x32xf32>
    %230 = arith.truncf %229 : vector<8x32xf32> to vector<8x32xbf16>
    %231 = arith.index_cast %c2_i32 : i32 to index
    %c0_87 = arith.constant 0 : index
    %c0_88 = arith.constant 0 : index
    %232 = vector.load %arg6[%231, %c0_87, %c0_88] : memref<8x8x64xbf16, #tpu.memory_space<vmem>>, vector<1x8x32xbf16>
    %233 = vector.shape_cast %232 : vector<1x8x32xbf16> to vector<8x32xbf16>
    %234 = vector.shape_cast %230 : vector<8x32xbf16> to vector<1x8x32xbf16>
    tpu.vector_store %arg6[%231, %c0_87, %c0_88], %234 {strides = array<i32>} : memref<8x8x64xbf16, #tpu.memory_space<vmem>>, vector<1x8x32xbf16>,
    %235 = vector.extract_strided_slice %210 {offsets = [0, 32], sizes = [8, 32], strides = [1, 1]} : vector<8x64xf32> to vector<8x32xf32>
    %cst_89 = arith.constant 0.000000e+00 : f32
    %236 = vector.shape_cast %224 : vector<8x1xi1> to vector<8x1xi1>
    %237 = vector.broadcast %236 : vector<8x1xi1> to vector<8x32xi1>
    %238 = vector.broadcast %cst_89 : f32 to vector<8x32xf32>
    %239 = arith.select %237, %235, %238 : vector<8x32xi1>, vector<8x32xf32>
    %240 = arith.truncf %239 : vector<8x32xf32> to vector<8x32xbf16>
    %241 = arith.index_cast %176 : i32 to index
    %c0_90 = arith.constant 0 : index
    %c32_91 = arith.constant 32 : index
    %242 = vector.load %arg6[%241, %c0_90, %c32_91] : memref<8x8x64xbf16, #tpu.memory_space<vmem>>, vector<1x8x32xbf16>
    %243 = vector.shape_cast %242 : vector<1x8x32xbf16> to vector<8x32xbf16>
    %244 = vector.shape_cast %240 : vector<8x32xbf16> to vector<1x8x32xbf16>
    tpu.vector_store %arg6[%241, %c0_90, %c32_91], %244 {strides = array<i32>} : memref<8x8x64xbf16, #tpu.memory_space<vmem>>, vector<1x8x32xbf16>,
    %c3_i32 = arith.constant 3 : i32
    %c7_i32_92 = arith.constant 7 : i32
    %245 = arith.subi %c7_i32_92, %c3_i32 : i32
    %c0_93 = arith.constant 0 : index
    %c0_94 = arith.constant 0 : index
    %246 = vector.load %arg8[%c0_93, %c0_94] : memref<8x64xf32, #tpu.memory_space<vmem>>, vector<8x64xf32>
    %c0_95 = arith.constant 0 : index
    %c0_96 = arith.constant 0 : index
    %247 = vector.load %arg9[%c0_95, %c0_96] : memref<8x64xf32, #tpu.memory_space<vmem>>, vector<8x64xf32>
    %248 = arith.index_cast %c3_i32 : i32 to index
    %c0_97 = arith.constant 0 : index
    %c0_98 = arith.constant 0 : index
    %249 = vector.load %arg7[%248, %c0_97, %c0_98] : memref<8x8x256xbf16, #tpu.memory_space<vmem>>, vector<1x8x256xbf16>
    %250 = vector.shape_cast %249 : vector<1x8x256xbf16> to vector<8x256xbf16>
    %251 = arith.index_cast %245 : i32 to index
    %c0_99 = arith.constant 0 : index
    %c0_100 = arith.constant 0 : index
    %252 = vector.load %arg7[%251, %c0_99, %c0_100] : memref<8x8x256xbf16, #tpu.memory_space<vmem>>, vector<1x8x256xbf16>
    %253 = vector.shape_cast %252 : vector<1x8x256xbf16> to vector<8x256xbf16>
    %254 = vector.shape_cast %34 : vector<1x256xi1> to vector<1x256xi1>
    %255 = vector.broadcast %254 : vector<1x256xi1> to vector<8x256xi1>
    %256 = arith.select %255, %250, %253 : vector<8x256xi1>, vector<8x256xbf16>
    %257 = arith.extf %256 : vector<8x256xbf16> to vector<8x256xf32>
    %258 = arith.addf %257, %15 : vector<8x256xf32>
    %259 = arith.truncf %246 : vector<8x64xf32> to vector<8x64xbf16>
    %cst_101 = arith.constant dense<0.000000e+00> : vector<8x256xf32>
    %260 = tpu.matmul %259, %12, %cst_101 {dimension_numbers = #tpu.dot_dimension_numbers<[1], [0], [0], [1], [0, 0, 1, 1], [], []>} : vector<8x64xbf16>, vector<64x256xbf16>, vector<8x256xf32> -> vector<8x256xf32>
    %261 = arith.addf %258, %260 : vector<8x256xf32>
    %262 = arith.negf %261 : vector<8x256xf32>
    %263 = math.exp %262 : vector<8x256xf32>
    %cst_102 = arith.constant 1.000000e+00 : f32
    %264 = vector.broadcast %cst_102 : f32 to vector<8x256xf32>
    %265 = arith.addf %264, %263 : vector<8x256xf32>
    %266 = arith.divf %264, %265 : vector<8x256xf32>
    %267 = vector.extract_strided_slice %266 {offsets = [0, 0], sizes = [8, 64], strides = [1, 1]} : vector<8x256xf32> to vector<8x64xf32>
    %268 = vector.extract_strided_slice %266 {offsets = [0, 64], sizes = [8, 64], strides = [1, 1]} : vector<8x256xf32> to vector<8x64xf32>
    %269 = vector.extract_strided_slice %266 {offsets = [0, 128], sizes = [8, 64], strides = [1, 1]} : vector<8x256xf32> to vector<8x64xf32>
    %cst_103 = arith.constant 2.000000e+00 : f32
    %270 = vector.broadcast %cst_103 : f32 to vector<8x64xf32>
    %271 = arith.mulf %270, %269 : vector<8x64xf32>
    %cst_104 = arith.constant 1.000000e+00 : f32
    %272 = vector.broadcast %cst_104 : f32 to vector<8x64xf32>
    %273 = arith.subf %271, %272 : vector<8x64xf32>
    %274 = vector.extract_strided_slice %266 {offsets = [0, 192], sizes = [8, 64], strides = [1, 1]} : vector<8x256xf32> to vector<8x64xf32>
    %275 = arith.mulf %268, %247 : vector<8x64xf32>
    %276 = arith.mulf %267, %273 : vector<8x64xf32>
    %277 = arith.addf %275, %276 : vector<8x64xf32>
    %278 = math.tanh %277 : vector<8x64xf32>
    %279 = arith.mulf %274, %278 : vector<8x64xf32>
    %280 = vector.broadcast %c3_i32 : i32 to vector<1x64xi32>
    %281 = vector.broadcast %245 : i32 to vector<1x64xi32>
    %282 = arith.select %37, %280, %281 : vector<1x64xi1>, vector<1x64xi32>
    %283 = vector.broadcast %282 : vector<1x64xi32> to vector<8x64xi32>
    %284 = vector.broadcast %11 : vector<8x1xi32> to vector<8x64xi32>
    %285 = arith.cmpi slt, %283, %284 : vector<8x64xi32>
    %286 = arith.select %285, %279, %246 : vector<8x64xi1>, vector<8x64xf32>
    %c0_105 = arith.constant 0 : index
    %c0_106 = arith.constant 0 : index
    %287 = vector.load %arg8[%c0_105, %c0_106] : memref<8x64xf32, #tpu.memory_space<vmem>>, vector<8x64xf32>
    tpu.vector_store %arg8[%c0_105, %c0_106], %286 {strides = array<i32>} : memref<8x64xf32, #tpu.memory_space<vmem>>, vector<8x64xf32>,
    %288 = arith.select %285, %277, %247 : vector<8x64xi1>, vector<8x64xf32>
    %c0_107 = arith.constant 0 : index
    %c0_108 = arith.constant 0 : index
    %289 = vector.load %arg9[%c0_107, %c0_108] : memref<8x64xf32, #tpu.memory_space<vmem>>, vector<8x64xf32>
    tpu.vector_store %arg9[%c0_107, %c0_108], %288 {strides = array<i32>} : memref<8x64xf32, #tpu.memory_space<vmem>>, vector<8x64xf32>,
    %290 = vector.broadcast %c3_i32 : i32 to vector<8x1xi32>
    %291 = arith.cmpi slt, %290, %11 : vector<8x1xi32>
    %292 = vector.broadcast %245 : i32 to vector<8x1xi32>
    %293 = arith.cmpi slt, %292, %11 : vector<8x1xi32>
    %294 = vector.extract_strided_slice %279 {offsets = [0, 0], sizes = [8, 32], strides = [1, 1]} : vector<8x64xf32> to vector<8x32xf32>
    %cst_109 = arith.constant 0.000000e+00 : f32
    %295 = vector.shape_cast %291 : vector<8x1xi1> to vector<8x1xi1>
    %296 = vector.broadcast %295 : vector<8x1xi1> to vector<8x32xi1>
    %297 = vector.broadcast %cst_109 : f32 to vector<8x32xf32>
    %298 = arith.select %296, %294, %297 : vector<8x32xi1>, vector<8x32xf32>
    %299 = arith.truncf %298 : vector<8x32xf32> to vector<8x32xbf16>
    %300 = arith.index_cast %c3_i32 : i32 to index
    %c0_110 = arith.constant 0 : index
    %c0_111 = arith.constant 0 : index
    %301 = vector.load %arg6[%300, %c0_110, %c0_111] : memref<8x8x64xbf16, #tpu.memory_space<vmem>>, vector<1x8x32xbf16>
    %302 = vector.shape_cast %301 : vector<1x8x32xbf16> to vector<8x32xbf16>
    %303 = vector.shape_cast %299 : vector<8x32xbf16> to vector<1x8x32xbf16>
    tpu.vector_store %arg6[%300, %c0_110, %c0_111], %303 {strides = array<i32>} : memref<8x8x64xbf16, #tpu.memory_space<vmem>>, vector<1x8x32xbf16>,
    %304 = vector.extract_strided_slice %279 {offsets = [0, 32], sizes = [8, 32], strides = [1, 1]} : vector<8x64xf32> to vector<8x32xf32>
    %cst_112 = arith.constant 0.000000e+00 : f32
    %305 = vector.shape_cast %293 : vector<8x1xi1> to vector<8x1xi1>
    %306 = vector.broadcast %305 : vector<8x1xi1> to vector<8x32xi1>
    %307 = vector.broadcast %cst_112 : f32 to vector<8x32xf32>
    %308 = arith.select %306, %304, %307 : vector<8x32xi1>, vector<8x32xf32>
    %309 = arith.truncf %308 : vector<8x32xf32> to vector<8x32xbf16>
    %310 = arith.index_cast %245 : i32 to index
    %c0_113 = arith.constant 0 : index
    %c32_114 = arith.constant 32 : index
    %311 = vector.load %arg6[%310, %c0_113, %c32_114] : memref<8x8x64xbf16, #tpu.memory_space<vmem>>, vector<1x8x32xbf16>
    %312 = vector.shape_cast %311 : vector<1x8x32xbf16> to vector<8x32xbf16>
    %313 = vector.shape_cast %309 : vector<8x32xbf16> to vector<1x8x32xbf16>
    tpu.vector_store %arg6[%310, %c0_113, %c32_114], %313 {strides = array<i32>} : memref<8x8x64xbf16, #tpu.memory_space<vmem>>, vector<1x8x32xbf16>,
    %c4_i32 = arith.constant 4 : i32
    %c7_i32_115 = arith.constant 7 : i32
    %314 = arith.subi %c7_i32_115, %c4_i32 : i32
    %c0_116 = arith.constant 0 : index
    %c0_117 = arith.constant 0 : index
    %315 = vector.load %arg8[%c0_116, %c0_117] : memref<8x64xf32, #tpu.memory_space<vmem>>, vector<8x64xf32>
    %c0_118 = arith.constant 0 : index
    %c0_119 = arith.constant 0 : index
    %316 = vector.load %arg9[%c0_118, %c0_119] : memref<8x64xf32, #tpu.memory_space<vmem>>, vector<8x64xf32>
    %317 = arith.index_cast %c4_i32 : i32 to index
    %c0_120 = arith.constant 0 : index
    %c0_121 = arith.constant 0 : index
    %318 = vector.load %arg7[%317, %c0_120, %c0_121] : memref<8x8x256xbf16, #tpu.memory_space<vmem>>, vector<1x8x256xbf16>
    %319 = vector.shape_cast %318 : vector<1x8x256xbf16> to vector<8x256xbf16>
    %320 = arith.index_cast %314 : i32 to index
    %c0_122 = arith.constant 0 : index
    %c0_123 = arith.constant 0 : index
    %321 = vector.load %arg7[%320, %c0_122, %c0_123] : memref<8x8x256xbf16, #tpu.memory_space<vmem>>, vector<1x8x256xbf16>
    %322 = vector.shape_cast %321 : vector<1x8x256xbf16> to vector<8x256xbf16>
    %323 = vector.shape_cast %34 : vector<1x256xi1> to vector<1x256xi1>
    %324 = vector.broadcast %323 : vector<1x256xi1> to vector<8x256xi1>
    %325 = arith.select %324, %319, %322 : vector<8x256xi1>, vector<8x256xbf16>
    %326 = arith.extf %325 : vector<8x256xbf16> to vector<8x256xf32>
    %327 = arith.addf %326, %15 : vector<8x256xf32>
    %328 = arith.truncf %315 : vector<8x64xf32> to vector<8x64xbf16>
    %cst_124 = arith.constant dense<0.000000e+00> : vector<8x256xf32>
    %329 = tpu.matmul %328, %12, %cst_124 {dimension_numbers = #tpu.dot_dimension_numbers<[1], [0], [0], [1], [0, 0, 1, 1], [], []>} : vector<8x64xbf16>, vector<64x256xbf16>, vector<8x256xf32> -> vector<8x256xf32>
    %330 = arith.addf %327, %329 : vector<8x256xf32>
    %331 = arith.negf %330 : vector<8x256xf32>
    %332 = math.exp %331 : vector<8x256xf32>
    %cst_125 = arith.constant 1.000000e+00 : f32
    %333 = vector.broadcast %cst_125 : f32 to vector<8x256xf32>
    %334 = arith.addf %333, %332 : vector<8x256xf32>
    %335 = arith.divf %333, %334 : vector<8x256xf32>
    %336 = vector.extract_strided_slice %335 {offsets = [0, 0], sizes = [8, 64], strides = [1, 1]} : vector<8x256xf32> to vector<8x64xf32>
    %337 = vector.extract_strided_slice %335 {offsets = [0, 64], sizes = [8, 64], strides = [1, 1]} : vector<8x256xf32> to vector<8x64xf32>
    %338 = vector.extract_strided_slice %335 {offsets = [0, 128], sizes = [8, 64], strides = [1, 1]} : vector<8x256xf32> to vector<8x64xf32>
    %cst_126 = arith.constant 2.000000e+00 : f32
    %339 = vector.broadcast %cst_126 : f32 to vector<8x64xf32>
    %340 = arith.mulf %339, %338 : vector<8x64xf32>
    %cst_127 = arith.constant 1.000000e+00 : f32
    %341 = vector.broadcast %cst_127 : f32 to vector<8x64xf32>
    %342 = arith.subf %340, %341 : vector<8x64xf32>
    %343 = vector.extract_strided_slice %335 {offsets = [0, 192], sizes = [8, 64], strides = [1, 1]} : vector<8x256xf32> to vector<8x64xf32>
    %344 = arith.mulf %337, %316 : vector<8x64xf32>
    %345 = arith.mulf %336, %342 : vector<8x64xf32>
    %346 = arith.addf %344, %345 : vector<8x64xf32>
    %347 = math.tanh %346 : vector<8x64xf32>
    %348 = arith.mulf %343, %347 : vector<8x64xf32>
    %349 = vector.broadcast %c4_i32 : i32 to vector<1x64xi32>
    %350 = vector.broadcast %314 : i32 to vector<1x64xi32>
    %351 = arith.select %37, %349, %350 : vector<1x64xi1>, vector<1x64xi32>
    %352 = vector.broadcast %351 : vector<1x64xi32> to vector<8x64xi32>
    %353 = vector.broadcast %11 : vector<8x1xi32> to vector<8x64xi32>
    %354 = arith.cmpi slt, %352, %353 : vector<8x64xi32>
    %355 = arith.select %354, %348, %315 : vector<8x64xi1>, vector<8x64xf32>
    %c0_128 = arith.constant 0 : index
    %c0_129 = arith.constant 0 : index
    %356 = vector.load %arg8[%c0_128, %c0_129] : memref<8x64xf32, #tpu.memory_space<vmem>>, vector<8x64xf32>
    tpu.vector_store %arg8[%c0_128, %c0_129], %355 {strides = array<i32>} : memref<8x64xf32, #tpu.memory_space<vmem>>, vector<8x64xf32>,
    %357 = arith.select %354, %346, %316 : vector<8x64xi1>, vector<8x64xf32>
    %c0_130 = arith.constant 0 : index
    %c0_131 = arith.constant 0 : index
    %358 = vector.load %arg9[%c0_130, %c0_131] : memref<8x64xf32, #tpu.memory_space<vmem>>, vector<8x64xf32>
    tpu.vector_store %arg9[%c0_130, %c0_131], %357 {strides = array<i32>} : memref<8x64xf32, #tpu.memory_space<vmem>>, vector<8x64xf32>,
    %359 = vector.broadcast %c4_i32 : i32 to vector<8x1xi32>
    %360 = arith.cmpi slt, %359, %11 : vector<8x1xi32>
    %361 = vector.broadcast %314 : i32 to vector<8x1xi32>
    %362 = arith.cmpi slt, %361, %11 : vector<8x1xi32>
    %363 = vector.extract_strided_slice %348 {offsets = [0, 0], sizes = [8, 32], strides = [1, 1]} : vector<8x64xf32> to vector<8x32xf32>
    %cst_132 = arith.constant 0.000000e+00 : f32
    %364 = vector.shape_cast %360 : vector<8x1xi1> to vector<8x1xi1>
    %365 = vector.broadcast %364 : vector<8x1xi1> to vector<8x32xi1>
    %366 = vector.broadcast %cst_132 : f32 to vector<8x32xf32>
    %367 = arith.select %365, %363, %366 : vector<8x32xi1>, vector<8x32xf32>
    %368 = arith.truncf %367 : vector<8x32xf32> to vector<8x32xbf16>
    %369 = arith.index_cast %c4_i32 : i32 to index
    %c0_133 = arith.constant 0 : index
    %c0_134 = arith.constant 0 : index
    %370 = vector.load %arg6[%369, %c0_133, %c0_134] : memref<8x8x64xbf16, #tpu.memory_space<vmem>>, vector<1x8x32xbf16>
    %371 = vector.shape_cast %370 : vector<1x8x32xbf16> to vector<8x32xbf16>
    %372 = vector.shape_cast %368 : vector<8x32xbf16> to vector<1x8x32xbf16>
    tpu.vector_store %arg6[%369, %c0_133, %c0_134], %372 {strides = array<i32>} : memref<8x8x64xbf16, #tpu.memory_space<vmem>>, vector<1x8x32xbf16>,
    %373 = vector.extract_strided_slice %348 {offsets = [0, 32], sizes = [8, 32], strides = [1, 1]} : vector<8x64xf32> to vector<8x32xf32>
    %cst_135 = arith.constant 0.000000e+00 : f32
    %374 = vector.shape_cast %362 : vector<8x1xi1> to vector<8x1xi1>
    %375 = vector.broadcast %374 : vector<8x1xi1> to vector<8x32xi1>
    %376 = vector.broadcast %cst_135 : f32 to vector<8x32xf32>
    %377 = arith.select %375, %373, %376 : vector<8x32xi1>, vector<8x32xf32>
    %378 = arith.truncf %377 : vector<8x32xf32> to vector<8x32xbf16>
    %379 = arith.index_cast %314 : i32 to index
    %c0_136 = arith.constant 0 : index
    %c32_137 = arith.constant 32 : index
    %380 = vector.load %arg6[%379, %c0_136, %c32_137] : memref<8x8x64xbf16, #tpu.memory_space<vmem>>, vector<1x8x32xbf16>
    %381 = vector.shape_cast %380 : vector<1x8x32xbf16> to vector<8x32xbf16>
    %382 = vector.shape_cast %378 : vector<8x32xbf16> to vector<1x8x32xbf16>
    tpu.vector_store %arg6[%379, %c0_136, %c32_137], %382 {strides = array<i32>} : memref<8x8x64xbf16, #tpu.memory_space<vmem>>, vector<1x8x32xbf16>,
    %c5_i32 = arith.constant 5 : i32
    %c7_i32_138 = arith.constant 7 : i32
    %383 = arith.subi %c7_i32_138, %c5_i32 : i32
    %c0_139 = arith.constant 0 : index
    %c0_140 = arith.constant 0 : index
    %384 = vector.load %arg8[%c0_139, %c0_140] : memref<8x64xf32, #tpu.memory_space<vmem>>, vector<8x64xf32>
    %c0_141 = arith.constant 0 : index
    %c0_142 = arith.constant 0 : index
    %385 = vector.load %arg9[%c0_141, %c0_142] : memref<8x64xf32, #tpu.memory_space<vmem>>, vector<8x64xf32>
    %386 = arith.index_cast %c5_i32 : i32 to index
    %c0_143 = arith.constant 0 : index
    %c0_144 = arith.constant 0 : index
    %387 = vector.load %arg7[%386, %c0_143, %c0_144] : memref<8x8x256xbf16, #tpu.memory_space<vmem>>, vector<1x8x256xbf16>
    %388 = vector.shape_cast %387 : vector<1x8x256xbf16> to vector<8x256xbf16>
    %389 = arith.index_cast %383 : i32 to index
    %c0_145 = arith.constant 0 : index
    %c0_146 = arith.constant 0 : index
    %390 = vector.load %arg7[%389, %c0_145, %c0_146] : memref<8x8x256xbf16, #tpu.memory_space<vmem>>, vector<1x8x256xbf16>
    %391 = vector.shape_cast %390 : vector<1x8x256xbf16> to vector<8x256xbf16>
    %392 = vector.shape_cast %34 : vector<1x256xi1> to vector<1x256xi1>
    %393 = vector.broadcast %392 : vector<1x256xi1> to vector<8x256xi1>
    %394 = arith.select %393, %388, %391 : vector<8x256xi1>, vector<8x256xbf16>
    %395 = arith.extf %394 : vector<8x256xbf16> to vector<8x256xf32>
    %396 = arith.addf %395, %15 : vector<8x256xf32>
    %397 = arith.truncf %384 : vector<8x64xf32> to vector<8x64xbf16>
    %cst_147 = arith.constant dense<0.000000e+00> : vector<8x256xf32>
    %398 = tpu.matmul %397, %12, %cst_147 {dimension_numbers = #tpu.dot_dimension_numbers<[1], [0], [0], [1], [0, 0, 1, 1], [], []>} : vector<8x64xbf16>, vector<64x256xbf16>, vector<8x256xf32> -> vector<8x256xf32>
    %399 = arith.addf %396, %398 : vector<8x256xf32>
    %400 = arith.negf %399 : vector<8x256xf32>
    %401 = math.exp %400 : vector<8x256xf32>
    %cst_148 = arith.constant 1.000000e+00 : f32
    %402 = vector.broadcast %cst_148 : f32 to vector<8x256xf32>
    %403 = arith.addf %402, %401 : vector<8x256xf32>
    %404 = arith.divf %402, %403 : vector<8x256xf32>
    %405 = vector.extract_strided_slice %404 {offsets = [0, 0], sizes = [8, 64], strides = [1, 1]} : vector<8x256xf32> to vector<8x64xf32>
    %406 = vector.extract_strided_slice %404 {offsets = [0, 64], sizes = [8, 64], strides = [1, 1]} : vector<8x256xf32> to vector<8x64xf32>
    %407 = vector.extract_strided_slice %404 {offsets = [0, 128], sizes = [8, 64], strides = [1, 1]} : vector<8x256xf32> to vector<8x64xf32>
    %cst_149 = arith.constant 2.000000e+00 : f32
    %408 = vector.broadcast %cst_149 : f32 to vector<8x64xf32>
    %409 = arith.mulf %408, %407 : vector<8x64xf32>
    %cst_150 = arith.constant 1.000000e+00 : f32
    %410 = vector.broadcast %cst_150 : f32 to vector<8x64xf32>
    %411 = arith.subf %409, %410 : vector<8x64xf32>
    %412 = vector.extract_strided_slice %404 {offsets = [0, 192], sizes = [8, 64], strides = [1, 1]} : vector<8x256xf32> to vector<8x64xf32>
    %413 = arith.mulf %406, %385 : vector<8x64xf32>
    %414 = arith.mulf %405, %411 : vector<8x64xf32>
    %415 = arith.addf %413, %414 : vector<8x64xf32>
    %416 = math.tanh %415 : vector<8x64xf32>
    %417 = arith.mulf %412, %416 : vector<8x64xf32>
    %418 = vector.broadcast %c5_i32 : i32 to vector<1x64xi32>
    %419 = vector.broadcast %383 : i32 to vector<1x64xi32>
    %420 = arith.select %37, %418, %419 : vector<1x64xi1>, vector<1x64xi32>
    %421 = vector.broadcast %420 : vector<1x64xi32> to vector<8x64xi32>
    %422 = vector.broadcast %11 : vector<8x1xi32> to vector<8x64xi32>
    %423 = arith.cmpi slt, %421, %422 : vector<8x64xi32>
    %424 = arith.select %423, %417, %384 : vector<8x64xi1>, vector<8x64xf32>
    %c0_151 = arith.constant 0 : index
    %c0_152 = arith.constant 0 : index
    %425 = vector.load %arg8[%c0_151, %c0_152] : memref<8x64xf32, #tpu.memory_space<vmem>>, vector<8x64xf32>
    tpu.vector_store %arg8[%c0_151, %c0_152], %424 {strides = array<i32>} : memref<8x64xf32, #tpu.memory_space<vmem>>, vector<8x64xf32>,
    %426 = arith.select %423, %415, %385 : vector<8x64xi1>, vector<8x64xf32>
    %c0_153 = arith.constant 0 : index
    %c0_154 = arith.constant 0 : index
    %427 = vector.load %arg9[%c0_153, %c0_154] : memref<8x64xf32, #tpu.memory_space<vmem>>, vector<8x64xf32>
    tpu.vector_store %arg9[%c0_153, %c0_154], %426 {strides = array<i32>} : memref<8x64xf32, #tpu.memory_space<vmem>>, vector<8x64xf32>,
    %428 = vector.broadcast %c5_i32 : i32 to vector<8x1xi32>
    %429 = arith.cmpi slt, %428, %11 : vector<8x1xi32>
    %430 = vector.broadcast %383 : i32 to vector<8x1xi32>
    %431 = arith.cmpi slt, %430, %11 : vector<8x1xi32>
    %432 = vector.extract_strided_slice %417 {offsets = [0, 0], sizes = [8, 32], strides = [1, 1]} : vector<8x64xf32> to vector<8x32xf32>
    %cst_155 = arith.constant 0.000000e+00 : f32
    %433 = vector.shape_cast %429 : vector<8x1xi1> to vector<8x1xi1>
    %434 = vector.broadcast %433 : vector<8x1xi1> to vector<8x32xi1>
    %435 = vector.broadcast %cst_155 : f32 to vector<8x32xf32>
    %436 = arith.select %434, %432, %435 : vector<8x32xi1>, vector<8x32xf32>
    %437 = arith.truncf %436 : vector<8x32xf32> to vector<8x32xbf16>
    %438 = arith.index_cast %c5_i32 : i32 to index
    %c0_156 = arith.constant 0 : index
    %c0_157 = arith.constant 0 : index
    %439 = vector.load %arg6[%438, %c0_156, %c0_157] : memref<8x8x64xbf16, #tpu.memory_space<vmem>>, vector<1x8x32xbf16>
    %440 = vector.shape_cast %439 : vector<1x8x32xbf16> to vector<8x32xbf16>
    %441 = vector.shape_cast %437 : vector<8x32xbf16> to vector<1x8x32xbf16>
    tpu.vector_store %arg6[%438, %c0_156, %c0_157], %441 {strides = array<i32>} : memref<8x8x64xbf16, #tpu.memory_space<vmem>>, vector<1x8x32xbf16>,
    %442 = vector.extract_strided_slice %417 {offsets = [0, 32], sizes = [8, 32], strides = [1, 1]} : vector<8x64xf32> to vector<8x32xf32>
    %cst_158 = arith.constant 0.000000e+00 : f32
    %443 = vector.shape_cast %431 : vector<8x1xi1> to vector<8x1xi1>
    %444 = vector.broadcast %443 : vector<8x1xi1> to vector<8x32xi1>
    %445 = vector.broadcast %cst_158 : f32 to vector<8x32xf32>
    %446 = arith.select %444, %442, %445 : vector<8x32xi1>, vector<8x32xf32>
    %447 = arith.truncf %446 : vector<8x32xf32> to vector<8x32xbf16>
    %448 = arith.index_cast %383 : i32 to index
    %c0_159 = arith.constant 0 : index
    %c32_160 = arith.constant 32 : index
    %449 = vector.load %arg6[%448, %c0_159, %c32_160] : memref<8x8x64xbf16, #tpu.memory_space<vmem>>, vector<1x8x32xbf16>
    %450 = vector.shape_cast %449 : vector<1x8x32xbf16> to vector<8x32xbf16>
    %451 = vector.shape_cast %447 : vector<8x32xbf16> to vector<1x8x32xbf16>
    tpu.vector_store %arg6[%448, %c0_159, %c32_160], %451 {strides = array<i32>} : memref<8x8x64xbf16, #tpu.memory_space<vmem>>, vector<1x8x32xbf16>,
    %c6_i32 = arith.constant 6 : i32
    %c7_i32_161 = arith.constant 7 : i32
    %452 = arith.subi %c7_i32_161, %c6_i32 : i32
    %c0_162 = arith.constant 0 : index
    %c0_163 = arith.constant 0 : index
    %453 = vector.load %arg8[%c0_162, %c0_163] : memref<8x64xf32, #tpu.memory_space<vmem>>, vector<8x64xf32>
    %c0_164 = arith.constant 0 : index
    %c0_165 = arith.constant 0 : index
    %454 = vector.load %arg9[%c0_164, %c0_165] : memref<8x64xf32, #tpu.memory_space<vmem>>, vector<8x64xf32>
    %455 = arith.index_cast %c6_i32 : i32 to index
    %c0_166 = arith.constant 0 : index
    %c0_167 = arith.constant 0 : index
    %456 = vector.load %arg7[%455, %c0_166, %c0_167] : memref<8x8x256xbf16, #tpu.memory_space<vmem>>, vector<1x8x256xbf16>
    %457 = vector.shape_cast %456 : vector<1x8x256xbf16> to vector<8x256xbf16>
    %458 = arith.index_cast %452 : i32 to index
    %c0_168 = arith.constant 0 : index
    %c0_169 = arith.constant 0 : index
    %459 = vector.load %arg7[%458, %c0_168, %c0_169] : memref<8x8x256xbf16, #tpu.memory_space<vmem>>, vector<1x8x256xbf16>
    %460 = vector.shape_cast %459 : vector<1x8x256xbf16> to vector<8x256xbf16>
    %461 = vector.shape_cast %34 : vector<1x256xi1> to vector<1x256xi1>
    %462 = vector.broadcast %461 : vector<1x256xi1> to vector<8x256xi1>
    %463 = arith.select %462, %457, %460 : vector<8x256xi1>, vector<8x256xbf16>
    %464 = arith.extf %463 : vector<8x256xbf16> to vector<8x256xf32>
    %465 = arith.addf %464, %15 : vector<8x256xf32>
    %466 = arith.truncf %453 : vector<8x64xf32> to vector<8x64xbf16>
    %cst_170 = arith.constant dense<0.000000e+00> : vector<8x256xf32>
    %467 = tpu.matmul %466, %12, %cst_170 {dimension_numbers = #tpu.dot_dimension_numbers<[1], [0], [0], [1], [0, 0, 1, 1], [], []>} : vector<8x64xbf16>, vector<64x256xbf16>, vector<8x256xf32> -> vector<8x256xf32>
    %468 = arith.addf %465, %467 : vector<8x256xf32>
    %469 = arith.negf %468 : vector<8x256xf32>
    %470 = math.exp %469 : vector<8x256xf32>
    %cst_171 = arith.constant 1.000000e+00 : f32
    %471 = vector.broadcast %cst_171 : f32 to vector<8x256xf32>
    %472 = arith.addf %471, %470 : vector<8x256xf32>
    %473 = arith.divf %471, %472 : vector<8x256xf32>
    %474 = vector.extract_strided_slice %473 {offsets = [0, 0], sizes = [8, 64], strides = [1, 1]} : vector<8x256xf32> to vector<8x64xf32>
    %475 = vector.extract_strided_slice %473 {offsets = [0, 64], sizes = [8, 64], strides = [1, 1]} : vector<8x256xf32> to vector<8x64xf32>
    %476 = vector.extract_strided_slice %473 {offsets = [0, 128], sizes = [8, 64], strides = [1, 1]} : vector<8x256xf32> to vector<8x64xf32>
    %cst_172 = arith.constant 2.000000e+00 : f32
    %477 = vector.broadcast %cst_172 : f32 to vector<8x64xf32>
    %478 = arith.mulf %477, %476 : vector<8x64xf32>
    %cst_173 = arith.constant 1.000000e+00 : f32
    %479 = vector.broadcast %cst_173 : f32 to vector<8x64xf32>
    %480 = arith.subf %478, %479 : vector<8x64xf32>
    %481 = vector.extract_strided_slice %473 {offsets = [0, 192], sizes = [8, 64], strides = [1, 1]} : vector<8x256xf32> to vector<8x64xf32>
    %482 = arith.mulf %475, %454 : vector<8x64xf32>
    %483 = arith.mulf %474, %480 : vector<8x64xf32>
    %484 = arith.addf %482, %483 : vector<8x64xf32>
    %485 = math.tanh %484 : vector<8x64xf32>
    %486 = arith.mulf %481, %485 : vector<8x64xf32>
    %487 = vector.broadcast %c6_i32 : i32 to vector<1x64xi32>
    %488 = vector.broadcast %452 : i32 to vector<1x64xi32>
    %489 = arith.select %37, %487, %488 : vector<1x64xi1>, vector<1x64xi32>
    %490 = vector.broadcast %489 : vector<1x64xi32> to vector<8x64xi32>
    %491 = vector.broadcast %11 : vector<8x1xi32> to vector<8x64xi32>
    %492 = arith.cmpi slt, %490, %491 : vector<8x64xi32>
    %493 = arith.select %492, %486, %453 : vector<8x64xi1>, vector<8x64xf32>
    %c0_174 = arith.constant 0 : index
    %c0_175 = arith.constant 0 : index
    %494 = vector.load %arg8[%c0_174, %c0_175] : memref<8x64xf32, #tpu.memory_space<vmem>>, vector<8x64xf32>
    tpu.vector_store %arg8[%c0_174, %c0_175], %493 {strides = array<i32>} : memref<8x64xf32, #tpu.memory_space<vmem>>, vector<8x64xf32>,
    %495 = arith.select %492, %484, %454 : vector<8x64xi1>, vector<8x64xf32>
    %c0_176 = arith.constant 0 : index
    %c0_177 = arith.constant 0 : index
    %496 = vector.load %arg9[%c0_176, %c0_177] : memref<8x64xf32, #tpu.memory_space<vmem>>, vector<8x64xf32>
    tpu.vector_store %arg9[%c0_176, %c0_177], %495 {strides = array<i32>} : memref<8x64xf32, #tpu.memory_space<vmem>>, vector<8x64xf32>,
    %497 = vector.broadcast %c6_i32 : i32 to vector<8x1xi32>
    %498 = arith.cmpi slt, %497, %11 : vector<8x1xi32>
    %499 = vector.broadcast %452 : i32 to vector<8x1xi32>
    %500 = arith.cmpi slt, %499, %11 : vector<8x1xi32>
    %501 = vector.extract_strided_slice %486 {offsets = [0, 0], sizes = [8, 32], strides = [1, 1]} : vector<8x64xf32> to vector<8x32xf32>
    %cst_178 = arith.constant 0.000000e+00 : f32
    %502 = vector.shape_cast %498 : vector<8x1xi1> to vector<8x1xi1>
    %503 = vector.broadcast %502 : vector<8x1xi1> to vector<8x32xi1>
    %504 = vector.broadcast %cst_178 : f32 to vector<8x32xf32>
    %505 = arith.select %503, %501, %504 : vector<8x32xi1>, vector<8x32xf32>
    %506 = arith.truncf %505 : vector<8x32xf32> to vector<8x32xbf16>
    %507 = arith.index_cast %c6_i32 : i32 to index
    %c0_179 = arith.constant 0 : index
    %c0_180 = arith.constant 0 : index
    %508 = vector.load %arg6[%507, %c0_179, %c0_180] : memref<8x8x64xbf16, #tpu.memory_space<vmem>>, vector<1x8x32xbf16>
    %509 = vector.shape_cast %508 : vector<1x8x32xbf16> to vector<8x32xbf16>
    %510 = vector.shape_cast %506 : vector<8x32xbf16> to vector<1x8x32xbf16>
    tpu.vector_store %arg6[%507, %c0_179, %c0_180], %510 {strides = array<i32>} : memref<8x8x64xbf16, #tpu.memory_space<vmem>>, vector<1x8x32xbf16>,
    %511 = vector.extract_strided_slice %486 {offsets = [0, 32], sizes = [8, 32], strides = [1, 1]} : vector<8x64xf32> to vector<8x32xf32>
    %cst_181 = arith.constant 0.000000e+00 : f32
    %512 = vector.shape_cast %500 : vector<8x1xi1> to vector<8x1xi1>
    %513 = vector.broadcast %512 : vector<8x1xi1> to vector<8x32xi1>
    %514 = vector.broadcast %cst_181 : f32 to vector<8x32xf32>
    %515 = arith.select %513, %511, %514 : vector<8x32xi1>, vector<8x32xf32>
    %516 = arith.truncf %515 : vector<8x32xf32> to vector<8x32xbf16>
    %517 = arith.index_cast %452 : i32 to index
    %c0_182 = arith.constant 0 : index
    %c32_183 = arith.constant 32 : index
    %518 = vector.load %arg6[%517, %c0_182, %c32_183] : memref<8x8x64xbf16, #tpu.memory_space<vmem>>, vector<1x8x32xbf16>
    %519 = vector.shape_cast %518 : vector<1x8x32xbf16> to vector<8x32xbf16>
    %520 = vector.shape_cast %516 : vector<8x32xbf16> to vector<1x8x32xbf16>
    tpu.vector_store %arg6[%517, %c0_182, %c32_183], %520 {strides = array<i32>} : memref<8x8x64xbf16, #tpu.memory_space<vmem>>, vector<1x8x32xbf16>,
    %c7_i32_184 = arith.constant 7 : i32
    %c7_i32_185 = arith.constant 7 : i32
    %521 = arith.subi %c7_i32_185, %c7_i32_184 : i32
    %c0_186 = arith.constant 0 : index
    %c0_187 = arith.constant 0 : index
    %522 = vector.load %arg8[%c0_186, %c0_187] : memref<8x64xf32, #tpu.memory_space<vmem>>, vector<8x64xf32>
    %c0_188 = arith.constant 0 : index
    %c0_189 = arith.constant 0 : index
    %523 = vector.load %arg9[%c0_188, %c0_189] : memref<8x64xf32, #tpu.memory_space<vmem>>, vector<8x64xf32>
    %524 = arith.index_cast %c7_i32_184 : i32 to index
    %c0_190 = arith.constant 0 : index
    %c0_191 = arith.constant 0 : index
    %525 = vector.load %arg7[%524, %c0_190, %c0_191] : memref<8x8x256xbf16, #tpu.memory_space<vmem>>, vector<1x8x256xbf16>
    %526 = vector.shape_cast %525 : vector<1x8x256xbf16> to vector<8x256xbf16>
    %527 = arith.index_cast %521 : i32 to index
    %c0_192 = arith.constant 0 : index
    %c0_193 = arith.constant 0 : index
    %528 = vector.load %arg7[%527, %c0_192, %c0_193] : memref<8x8x256xbf16, #tpu.memory_space<vmem>>, vector<1x8x256xbf16>
    %529 = vector.shape_cast %528 : vector<1x8x256xbf16> to vector<8x256xbf16>
    %530 = vector.shape_cast %34 : vector<1x256xi1> to vector<1x256xi1>
    %531 = vector.broadcast %530 : vector<1x256xi1> to vector<8x256xi1>
    %532 = arith.select %531, %526, %529 : vector<8x256xi1>, vector<8x256xbf16>
    %533 = arith.extf %532 : vector<8x256xbf16> to vector<8x256xf32>
    %534 = arith.addf %533, %15 : vector<8x256xf32>
    %535 = arith.truncf %522 : vector<8x64xf32> to vector<8x64xbf16>
    %cst_194 = arith.constant dense<0.000000e+00> : vector<8x256xf32>
    %536 = tpu.matmul %535, %12, %cst_194 {dimension_numbers = #tpu.dot_dimension_numbers<[1], [0], [0], [1], [0, 0, 1, 1], [], []>} : vector<8x64xbf16>, vector<64x256xbf16>, vector<8x256xf32> -> vector<8x256xf32>
    %537 = arith.addf %534, %536 : vector<8x256xf32>
    %538 = arith.negf %537 : vector<8x256xf32>
    %539 = math.exp %538 : vector<8x256xf32>
    %cst_195 = arith.constant 1.000000e+00 : f32
    %540 = vector.broadcast %cst_195 : f32 to vector<8x256xf32>
    %541 = arith.addf %540, %539 : vector<8x256xf32>
    %542 = arith.divf %540, %541 : vector<8x256xf32>
    %543 = vector.extract_strided_slice %542 {offsets = [0, 0], sizes = [8, 64], strides = [1, 1]} : vector<8x256xf32> to vector<8x64xf32>
    %544 = vector.extract_strided_slice %542 {offsets = [0, 64], sizes = [8, 64], strides = [1, 1]} : vector<8x256xf32> to vector<8x64xf32>
    %545 = vector.extract_strided_slice %542 {offsets = [0, 128], sizes = [8, 64], strides = [1, 1]} : vector<8x256xf32> to vector<8x64xf32>
    %cst_196 = arith.constant 2.000000e+00 : f32
    %546 = vector.broadcast %cst_196 : f32 to vector<8x64xf32>
    %547 = arith.mulf %546, %545 : vector<8x64xf32>
    %cst_197 = arith.constant 1.000000e+00 : f32
    %548 = vector.broadcast %cst_197 : f32 to vector<8x64xf32>
    %549 = arith.subf %547, %548 : vector<8x64xf32>
    %550 = vector.extract_strided_slice %542 {offsets = [0, 192], sizes = [8, 64], strides = [1, 1]} : vector<8x256xf32> to vector<8x64xf32>
    %551 = arith.mulf %544, %523 : vector<8x64xf32>
    %552 = arith.mulf %543, %549 : vector<8x64xf32>
    %553 = arith.addf %551, %552 : vector<8x64xf32>
    %554 = math.tanh %553 : vector<8x64xf32>
    %555 = arith.mulf %550, %554 : vector<8x64xf32>
    %556 = vector.broadcast %c7_i32_184 : i32 to vector<1x64xi32>
    %557 = vector.broadcast %521 : i32 to vector<1x64xi32>
    %558 = arith.select %37, %556, %557 : vector<1x64xi1>, vector<1x64xi32>
    %559 = vector.broadcast %558 : vector<1x64xi32> to vector<8x64xi32>
    %560 = vector.broadcast %11 : vector<8x1xi32> to vector<8x64xi32>
    %561 = arith.cmpi slt, %559, %560 : vector<8x64xi32>
    %562 = arith.select %561, %555, %522 : vector<8x64xi1>, vector<8x64xf32>
    %c0_198 = arith.constant 0 : index
    %c0_199 = arith.constant 0 : index
    %563 = vector.load %arg8[%c0_198, %c0_199] : memref<8x64xf32, #tpu.memory_space<vmem>>, vector<8x64xf32>
    tpu.vector_store %arg8[%c0_198, %c0_199], %562 {strides = array<i32>} : memref<8x64xf32, #tpu.memory_space<vmem>>, vector<8x64xf32>,
    %564 = arith.select %561, %553, %523 : vector<8x64xi1>, vector<8x64xf32>
    %c0_200 = arith.constant 0 : index
    %c0_201 = arith.constant 0 : index
    %565 = vector.load %arg9[%c0_200, %c0_201] : memref<8x64xf32, #tpu.memory_space<vmem>>, vector<8x64xf32>
    tpu.vector_store %arg9[%c0_200, %c0_201], %564 {strides = array<i32>} : memref<8x64xf32, #tpu.memory_space<vmem>>, vector<8x64xf32>,
    %566 = vector.broadcast %c7_i32_184 : i32 to vector<8x1xi32>
    %567 = arith.cmpi slt, %566, %11 : vector<8x1xi32>
    %568 = vector.broadcast %521 : i32 to vector<8x1xi32>
    %569 = arith.cmpi slt, %568, %11 : vector<8x1xi32>
    %570 = vector.extract_strided_slice %555 {offsets = [0, 0], sizes = [8, 32], strides = [1, 1]} : vector<8x64xf32> to vector<8x32xf32>
    %cst_202 = arith.constant 0.000000e+00 : f32
    %571 = vector.shape_cast %567 : vector<8x1xi1> to vector<8x1xi1>
    %572 = vector.broadcast %571 : vector<8x1xi1> to vector<8x32xi1>
    %573 = vector.broadcast %cst_202 : f32 to vector<8x32xf32>
    %574 = arith.select %572, %570, %573 : vector<8x32xi1>, vector<8x32xf32>
    %575 = arith.truncf %574 : vector<8x32xf32> to vector<8x32xbf16>
    %576 = arith.index_cast %c7_i32_184 : i32 to index
    %c0_203 = arith.constant 0 : index
    %c0_204 = arith.constant 0 : index
    %577 = vector.load %arg6[%576, %c0_203, %c0_204] : memref<8x8x64xbf16, #tpu.memory_space<vmem>>, vector<1x8x32xbf16>
    %578 = vector.shape_cast %577 : vector<1x8x32xbf16> to vector<8x32xbf16>
    %579 = vector.shape_cast %575 : vector<8x32xbf16> to vector<1x8x32xbf16>
    tpu.vector_store %arg6[%576, %c0_203, %c0_204], %579 {strides = array<i32>} : memref<8x8x64xbf16, #tpu.memory_space<vmem>>, vector<1x8x32xbf16>,
    %580 = vector.extract_strided_slice %555 {offsets = [0, 32], sizes = [8, 32], strides = [1, 1]} : vector<8x64xf32> to vector<8x32xf32>
    %cst_205 = arith.constant 0.000000e+00 : f32
    %581 = vector.shape_cast %569 : vector<8x1xi1> to vector<8x1xi1>
    %582 = vector.broadcast %581 : vector<8x1xi1> to vector<8x32xi1>
    %583 = vector.broadcast %cst_205 : f32 to vector<8x32xf32>
    %584 = arith.select %582, %580, %583 : vector<8x32xi1>, vector<8x32xf32>
    %585 = arith.truncf %584 : vector<8x32xf32> to vector<8x32xbf16>
    %586 = arith.index_cast %521 : i32 to index
    %c0_206 = arith.constant 0 : index
    %c32_207 = arith.constant 32 : index
    %587 = vector.load %arg6[%586, %c0_206, %c32_207] : memref<8x8x64xbf16, #tpu.memory_space<vmem>>, vector<1x8x32xbf16>
    %588 = vector.shape_cast %587 : vector<1x8x32xbf16> to vector<8x32xbf16>
    %589 = vector.shape_cast %585 : vector<8x32xbf16> to vector<1x8x32xbf16>
    tpu.vector_store %arg6[%586, %c0_206, %c32_207], %589 {strides = array<i32>} : memref<8x8x64xbf16, #tpu.memory_space<vmem>>, vector<1x8x32xbf16>,
    %c8_i32 = arith.constant 8 : i32
    return
  }
  func.func @transform_0(%arg0: i32) -> (i32, i32, i32) {
    %c0_i32 = arith.constant 0 : i32
    %c0_i32_0 = arith.constant 0 : i32
    %c0_i32_1 = arith.constant 0 : i32
    return %c0_i32, %arg0, %c0_i32_0 : i32, i32, i32
  }
  func.func @transform_1(%arg0: i32) -> (i32, i32) {
    %c0_i32 = arith.constant 0 : i32
    %c0_i32_0 = arith.constant 0 : i32
    %c0_i32_1 = arith.constant 0 : i32
    return %c0_i32, %c0_i32_0 : i32, i32
  }
  func.func @transform_2(%arg0: i32) -> (i32, i32) {
    %c0_i32 = arith.constant 0 : i32
    %c0_i32_0 = arith.constant 0 : i32
    %c0_i32_1 = arith.constant 0 : i32
    return %c0_i32, %c0_i32_0 : i32, i32
  }
  func.func @transform_3(%arg0: i32) -> (i32, i32) {
    %c0_i32 = arith.constant 0 : i32
    %c0_i32_0 = arith.constant 0 : i32
    %c0_i32_1 = arith.constant 0 : i32
    return %c0_i32, %c0_i32_0 : i32, i32
  }
  func.func @transform_4(%arg0: i32) -> (i32, i32) {
    %c0_i32 = arith.constant 0 : i32
    %c0_i32_0 = arith.constant 0 : i32
    return %arg0, %c0_i32 : i32, i32
  }
  func.func @transform_5(%arg0: i32) -> (i32, i32, i32) {
    %c0_i32 = arith.constant 0 : i32
    %c0_i32_0 = arith.constant 0 : i32
    %c0_i32_1 = arith.constant 0 : i32
    return %c0_i32, %arg0, %c0_i32_0 : i32, i32, i32
  }
}

</mosaic_0001>

<bundles_post_ra>
// kernel: _lambda_.3
= control target key start
LH: loop header
LB: loop body
LE: loop exit
PB: predicated region body
PF: predicated region fallthrough
CT: control target
= control target key end

     0   :  { %vm105_vm0 = vcmask 523264   ;;  %v1466_v45 = vmov 0.0   ;;  %s1467_s21 = smov 64   ;;  %v209_v61 = vlaneseq  ;;  %s1999_s1 = inlined_call_operand.vmem [shape: bf16[64,256], index: 1, kind: input, shape index: {}]   ;;  %s2000_s0 = inlined_call_operand.vmem [shape: bf16[8,8,64], index: 0, kind: input, shape index: {}]   ;;  %s2001_s2 = inlined_call_operand.vmem [shape: bf16[64,256], index: 2, kind: input, shape index: {}]   ;;  %s2002_s3 = inlined_call_operand.vmem [shape: f32[1,256], index: 3, kind: input, shape index: {}]   ;;  %s2003_s4 = inlined_call_operand.vmem [shape: s32[8,1], index: 4, kind: input, shape index: {}]   ;;  %s2004_s5 = inlined_call_operand.vmem [shape: f32[64,1], index: 5, kind: input, shape index: {}]   ;;  %s2005_s6 = inlined_call_operand.<no memory space> [shape: f32[1,1], index: 6, kind: input, shape index: {}]   ;;  %s2006_s7 = inlined_call_operand.vmem [shape: f32[8,1], index: 7, kind: output, shape index: {}]  }
   0x1   :  { %v1261_v0 = vld [vmem:[%s1999_s1 + $0x30] sm:$0xf]  ;;  %v1360_v1 = vld [vmem:[%s1999_s1 + $0x34] sm:$0xf0]  ;;  %v1359_v2 = vld [vmem:[%s1999_s1 + $0x34] sm:$0xf] }
   0x2   :  { %v1262_v3 = vor.u32 %v1360_v1, %v1261_v0  ;;  %v1263_v4 = vld [vmem:[%s1999_s1 + $0x38] sm:$0xf0]  ;;  %v1253_v5 = vld [vmem:[%s1999_s1 + $0x20] sm:$0xf]  ;;  %v1358_v6 = vld [vmem:[%s1999_s1 + $0x24] sm:$0xf0] }
   0x3   :  { %v1266_v7 = vor.u32 %v1359_v2, %v1263_v4  ;;  %v1357_v8 = vld [vmem:[%s1999_s1 + $0x24] sm:$0xf]  ;;  %v1255_v9 = vld [vmem:[%s1999_s1 + $0x28] sm:$0xf0]  ;;  %v1254_v10 = vor.u32 %v1358_v6, %v1253_v5  ;;  %v1245_v12 = vld [vmem:[%s1999_s1 + $0x10] sm:$0xf] }
   0x4   :  { %122 = vmatpush.bf16.msra.mxu0 %v1262_v3  ;;  %v1258_v11 = vor.u32 %v1357_v8, %v1255_v9  ;;  %v1356_v13 = vld [vmem:[%s1999_s1 + $0x14] sm:$0xf0]  ;;  %v1355_v14 = vld [vmem:[%s1999_s1 + $0x14] sm:$0xf]  ;;  %v1247_v15 = vld [vmem:[%s1999_s1 + $0x18] sm:$0xf0] }
   0x5   :  { %151 = vmatpush.bf16.msra.mxu1 %v1266_v7  ;;  %v1246_v16 = vor.u32 %v1356_v13, %v1245_v12  ;;  %v1250_v17 = vor.u32 %v1355_v14, %v1247_v15  ;;  %v1237_v18 = vld [vmem:[%s1999_s1] sm:$0xf]  ;;  %v1354_v19 = vld [vmem:[%s1999_s1 + $0x4] sm:$0xf0]  ;;  %v1353_v20 = vld [vmem:[%s1999_s1 + $0x4] sm:$0xf] }
   0x6   :  { %v1239_v21 = vld [vmem:[%s1999_s1 + $0x8] sm:$0xf0]  ;;  %v1238_v22 = vor.u32 %v1354_v19, %v1237_v18  ;;  %v1349_v24 = vld [vmem:[%s2000_s0] sm:$0xff]  ;;  %v1367_v25 = vld [vmem:[%s2001_s2 + $0x34] sm:$0xf]  ;;  %192 = vst.msk [vmem:[#allocation3] sm:$0xff] %vm105_vm0, %v1466_v45 }
   0x7   :  { %v1242_v23 = vor.u32 %v1353_v20, %v1239_v21  ;;  %v1303_v26 = vld [vmem:[%s2001_s2 + $0x38] sm:$0xf0]  ;;  %v1301_v28 = vld [vmem:[%s2001_s2 + $0x30] sm:$0xf]  ;;  %v1368_v29 = vld [vmem:[%s2001_s2 + $0x34] sm:$0xf0] }
   0x8   :  { %123 = vmatpush.bf16.msra.mxu0 %v1254_v10  ;;  %v1575_v27 = vor.u32 %v1367_v25, %v1303_v26  ;;  %v1365_v30 = vld [vmem:[%s2001_s2 + $0x24] sm:$0xf]  ;;  %v1586_v31 = vor.u32 %v1368_v29, %v1301_v28  ;;  %v1295_v32 = vld [vmem:[%s2001_s2 + $0x28] sm:$0xf0]  ;;  %v1293_v33 = vld [vmem:[%s2001_s2 + $0x20] sm:$0xf] }
   0x9   :  { %152 = vmatpush.bf16.msra.mxu1 %v1258_v11  ;;  %v1366_v34 = vld [vmem:[%s2001_s2 + $0x24] sm:$0xf0]  ;;  %v1598_v35 = vor.u32 %v1365_v30, %v1295_v32  ;;  %v1363_v37 = vld [vmem:[%s2001_s2 + $0x14] sm:$0xf]  ;;  %v1287_v38 = vld [vmem:[%s2001_s2 + $0x18] sm:$0xf0] }
   0xa   :  { %315 = vmatpush.bf16.msra.mxu3 %v1575_v27  ;;  %302 = vmatpush.bf16.msra.mxu2 %v1586_v31  ;;  %v1602_v36 = vor.u32 %v1366_v34, %v1293_v33  ;;  %v1285_v39 = vld [vmem:[%s2001_s2 + $0x10] sm:$0xf]  ;;  %v1364_v40 = vld [vmem:[%s2001_s2 + $0x14] sm:$0xf0]  ;;  %v1618_v41 = vor.u32 %v1363_v37, %v1287_v38  ;;  %v1361_v43 = vld [vmem:[%s2001_s2 + $0x4] sm:$0xf] }
   0xb   :  { %v1622_v42 = vor.u32 %v1364_v40, %v1285_v39  ;;  %v1279_v44 = vld [vmem:[%s2001_s2 + $0x8] sm:$0xf0]  ;;  %193 = vst.msk [vmem:[#allocation4] sm:$0xff] %vm105_vm0, %v1466_v45  ;;  %v1277_v50 = vld [vmem:[%s2001_s2] sm:$0xf]  ;;  %v1351_v54 = vld [vmem:[%s2000_s0 + $0x10] sm:$0xff] }
   0xc   :  { %124 = vmatpush.bf16.msra.mxu0 %v1246_v16  ;;  %v1634_v46 = vor.u32 %v1361_v43, %v1279_v44  ;;  %v1350_v47 = vld [vmem:[%s2000_s0 + $0x8] sm:$0xff]  ;;  %v1352_v55 = vld [vmem:[%s2000_s0 + $0x18] sm:$0xff]  ;;  %v1704_v1 = vand.u32 127, %v209_v61  ;;  %v203_v11 = vld [vmem:[%s2002_s3] sm:$0x3] }
   0xd   :  { %153 = vmatpush.bf16.msra.mxu1 %v1250_v17  ;;  %v1643_v48 = vld [vmem:[#allocation3] sm:$0xff]  ;;  %v1362_v51 = vld [vmem:[%s2001_s2 + $0x4] sm:$0xf0]  ;;  %v206_v16 = vperm.slane %v203_v11, 1  ;;  %v205_v17 = vperm.slane %v203_v11, 0 }
   0xe   :  { %316 = vmatpush.bf16.msra.mxu3 %v1598_v35  ;;  %303 = vmatpush.bf16.msra.mxu2 %v1602_v36  ;;  %v254_v49 = vpack.c.bf16 %v1643_v48, %v1643_v48  ;;  %v1657_v52 = vor.u32 %v1362_v51, %v1277_v50  ;;  %v211_v2 = vadd.s32 128, %v1704_v1  ;;  %v216_v7 = vand.u32 63, %v1704_v1  ;;  %v194_v14 = vld [vmem:[%s2003_s4] sm:$0xff] }
   0xf   :  { %vm238_vm12 = vcmp.lt.s32.totalorder %v1704_v1, 32  ;;  %v1160_v1 = vld [vmem:[%s2004_s5 + $0x8] sm:$0xff] }
  0x10   :  { %125 = vmatpush.bf16.msra.mxu0 %v1238_v22  ;;  %v223_v8 = vand.u32 63, %v211_v2  ;;  %vm236_vm1 = vcmp.lt.s32.totalorder %v216_v7, 32 }
  0x11   :  { %154 = vmatpush.bf16.msra.mxu1 %v1242_v23 }
  0x12   :  { %317 = vmatpush.bf16.msra.mxu3 %v1618_v41  ;;  %304 = vmatpush.bf16.msra.mxu2 %v1622_v42  ;;  %v1659_v53 = vld [vmem:[#allocation4] sm:$0xff]  ;;  %vm237_vm2 = vcmp.lt.s32.totalorder %v223_v8, 32 }
  0x13   :  { %1267 = vmatmul.msk.bf16.vlgmr.msra.gmra.mxu0 %vm105_vm0, %v1349_v24  ;;  %367 = vrot.lane.b32.xlu0 %v1659_v53, %s1467_s21  ;;  %vm1715_vm3 = vmpackc.low %vm237_vm2, %vm236_vm1 }
  0x14   :  { %1271 = vmatmul.msk.bf16.vlgmr.msra.gmra.mxu1 %vm105_vm0, %v1349_v24  ;;  %743 = vmatpush.bf16.msrb.mxu0 %v1586_v31 }
  0x15   :  { %756 = vmatpush.bf16.msrb.mxu1 %v1575_v27 }
  0x16   :  { %318 = vmatpush.bf16.msra.mxu3 %v1634_v46  ;;  %305 = vmatpush.bf16.msra.mxu2 %v1657_v52 }
  0x18   :  { %744 = vmatpush.bf16.msrb.mxu0 %v1602_v36 }
  0x19   :  { %757 = vmatpush.bf16.msrb.mxu1 %v1598_v35  ;;  %1308 = vmatmul.msk.bf16.vlgmr.msra.gmra.mxu3 %vm105_vm0, %v254_v49 }
  0x1a   :  { %428 = vmatpush.bf16.msrb.mxu3 %v1575_v27  ;;  %415 = vmatpush.bf16.msrb.mxu2 %v1586_v31 }
  0x1b   :  { %1307 = vmatmul.msk.bf16.vlgmr.msra.gmra.mxu2 %vm105_vm0, %v254_v49 }
  0x1c   :  { %745 = vmatpush.bf16.msrb.mxu0 %v1622_v42 }
  0x1d   :  { %758 = vmatpush.bf16.msrb.mxu1 %v1618_v41 }
  0x1e   :  { %429 = vmatpush.bf16.msrb.mxu3 %v1598_v35  ;;  %416 = vmatpush.bf16.msrb.mxu2 %v1602_v36 }
  0x20   :  { %746 = vmatpush.bf16.msrb.mxu0 %v1657_v52 }
  0x21   :  { %759 = vmatpush.bf16.msrb.mxu1 %v1634_v46 }
  0x22   :  { %430 = vmatpush.bf16.msrb.mxu3 %v1618_v41  ;;  %417 = vmatpush.bf16.msrb.mxu2 %v1622_v42 }
  0x23   :  { %1268 = vmatmul.msk.bf16.gmra.mxu0 %vm105_vm0, %v1350_v47 }
  0x24   :  { %1272 = vmatmul.msk.bf16.gmra.mxu1 %vm105_vm0, %v1350_v47  ;;  %959 = vmatpush.bf16.msra.mxu0 %v1586_v31 }
  0x25   :  { %972 = vmatpush.bf16.msra.mxu1 %v1575_v27 }
  0x26   :  { %431 = vmatpush.bf16.msrb.mxu3 %v1634_v46  ;;  %418 = vmatpush.bf16.msrb.mxu2 %v1657_v52 }
  0x28   :  { %960 = vmatpush.bf16.msra.mxu0 %v1602_v36 }
  0x29   :  { %973 = vmatpush.bf16.msra.mxu1 %v1598_v35 }
  0x2a   :  { %538 = vmatpush.bf16.msra.mxu3 %v1575_v27  ;;  %525 = vmatpush.bf16.msra.mxu2 %v1586_v31 }
  0x2c   :  { %961 = vmatpush.bf16.msra.mxu0 %v1622_v42 }
  0x2d   :  { %974 = vmatpush.bf16.msra.mxu1 %v1618_v41 }
  0x2e   :  { %539 = vmatpush.bf16.msra.mxu3 %v1598_v35  ;;  %526 = vmatpush.bf16.msra.mxu2 %v1602_v36 }
  0x30   :  { %962 = vmatpush.bf16.msra.mxu0 %v1657_v52 }
  0x31   :  { %975 = vmatpush.bf16.msra.mxu1 %v1634_v46 }
  0x32   :  { %540 = vmatpush.bf16.msra.mxu3 %v1618_v41  ;;  %527 = vmatpush.bf16.msra.mxu2 %v1622_v42 }
  0x33   :  { %1269 = vmatmul.msk.bf16.gmra.mxu0 %vm105_vm0, %v1351_v54 }
  0x34   :  { %1273 = vmatmul.msk.bf16.gmra.mxu1 %vm105_vm0, %v1351_v54 }
  0x36   :  { %541 = vmatpush.bf16.msra.mxu3 %v1634_v46  ;;  %528 = vmatpush.bf16.msra.mxu2 %v1657_v52 }
  0x43   :  { %1270 = vmatmul.msk.bf16.gmra.mxu0 %vm105_vm0, %v1352_v55 }
  0x44   :  { %1274 = vmatmul.msk.bf16.gmra.mxu1 %vm105_vm0, %v1352_v55 }
  0x90   :  { %v1700_v56 = vpop.f32.mrf.mxu0 }
  0x91   :  { %v1702_v57 = vpop.f32.mrf.mxu1 }
  0x92   :  { %v176_v8 = vpack.c.bf16 %v1702_v57, %v1700_v56 }
  0x98   :  { %v129_v58 = vpop.f32.mrf.mxu0 }
  0x99   :  { %v158_v59 = vpop.f32.mrf.mxu1 }
  0x9a   :  { %v177_v60 = vpack.c.bf16 %v158_v59, %v129_v58 }
  0x9c   :  { %v1707_v4 = vpop.f32.mrf.mxu3 }
  0x9e   :  { %v1710_v9 = vpop.f32.mrf.mxu2 }
  0xa0   :  { %v132_v62 = vpop.f32.mrf.mxu0 }
  0xa1   :  { %v161_v63 = vpop.f32.mrf.mxu1 }
  0xa2   :  { %v178_v0 = vpack.c.bf16 %v161_v63, %v132_v62 }
  0xa4   :  { %v322_v12 = vpop.f32.mrf.mxu3 }
  0xa6   :  { %v309_v20 = vpop.f32.mrf.mxu2 }
  0xa8   :  { %v134_v3 = vpop.f32.mrf.mxu0 }
  0xa9   :  { %v163_v5 = vpop.f32.mrf.mxu1 }
  0xaa   :  { %v179_v6 = vpack.c.bf16 %v163_v5, %v134_v3 }
  0xb0   :  { %v137_v10 = vpop.f32.mrf.mxu0 }
  0xb1   :  { %v166_v13 = vpop.f32.mrf.mxu1 }
  0xb2   :  { %v180_v15 = vpack.c.bf16 %v166_v13, %v137_v10 }
  0xb4   :  { %v622_v18 = vsel %vm1715_vm3, %v179_v6, %v180_v15  ;;  %v730_v19 = vsel %vm1715_vm3, %v180_v15, %v179_v6 }
  0xb5   :  { %v623_v21 = vunpack.c.l.bf16 %v622_v18  ;;  %v624_v22 = vunpack.c.h.bf16 %v622_v18  ;;  %v731_v23 = vunpack.c.l.bf16 %v730_v19  ;;  %v732_v24 = vunpack.c.h.bf16 %v730_v19 }
  0xb7   :  { %v1723_v25 = vadd.f32 %v623_v21, %v205_v17  ;;  %v1725_v26 = vadd.f32 %v624_v22, %v206_v16  ;;  %v1727_v28 = vadd.f32 %v731_v23, %v205_v17  ;;  %v1729_v29 = vadd.f32 %v732_v24, %v206_v16 }
  0xb8   :  { %v139_v30 = vpop.f32.mrf.mxu0 }
  0xb9   :  { %v168_v32 = vpop.f32.mrf.mxu1 }
  0xba   :  { %v181_v33 = vpack.c.bf16 %v168_v32, %v139_v30  ;;  %v1468_v30 = vmov 0  }
  0xbb   :  { %1379 = vset.pattern.permute.xlu1 %v1468_v30  ;;  %1380 = vset.pattern.permute.xlu0 %v1468_v30 }
  0xbc   :  { %v512_v34 = vsel %vm1715_vm3, %v178_v0, %v181_v33  ;;  %v838_v37 = vsel %vm1715_vm3, %v181_v33, %v178_v0  ;;  %381 = vperm.xlu1 %1379, %v194_v14  }
  0xbd   :  { %v513_v38 = vunpack.c.l.bf16 %v512_v34  ;;  %v514_v39 = vunpack.c.h.bf16 %v512_v34  ;;  %v839_v40 = vunpack.c.l.bf16 %v838_v37  ;;  %v840_v43 = vunpack.c.h.bf16 %v838_v37 }
  0xbf   :  { %v1735_v44 = vadd.f32 %v513_v38, %v205_v17  ;;  %v1737_v45 = vadd.f32 %v514_v39, %v206_v16  ;;  %v1739_v47 = vadd.f32 %v839_v40, %v205_v17  ;;  %v1741_v49 = vadd.f32 %v840_v43, %v206_v16 }
  0xc0   :  { %v142_v50 = vpop.f32.mrf.mxu0 }
  0xc1   :  { %v171_v51 = vpop.f32.mrf.mxu1 }
  0xc2   :  { %v182_v54 = vpack.c.bf16 %v171_v51, %v142_v50 }
  0xc4   :  { %v402_v55 = vsel %vm1715_vm3, %v177_v60, %v182_v54  ;;  %v946_v58 = vsel %vm1715_vm3, %v182_v54, %v177_v60 }
  0xc5   :  { %v403_v59 = vunpack.c.l.bf16 %v402_v55  ;;  %v404_v61 = vunpack.c.h.bf16 %v402_v55  ;;  %v947_v62 = vunpack.c.l.bf16 %v946_v58  ;;  %v948_v63 = vunpack.c.h.bf16 %v946_v58 }
  0xc7   :  { %v1747_v0 = vadd.f32 %v403_v59, %v205_v17  ;;  %v1749_v2 = vadd.f32 %v404_v61, %v206_v16  ;;  %v1751_v3 = vadd.f32 %v947_v62, %v205_v17  ;;  %v1753_v5 = vadd.f32 %v948_v63, %v206_v16 }
  0xc8   :  { %v144_v6 = vpop.f32.mrf.mxu0 }
  0xc9   :  { %v173_v7 = vpop.f32.mrf.mxu1 }
  0xca   :  { %v183_v10 = vpack.c.bf16 %v173_v7, %v144_v6 }
  0xcc   :  { %v249_v60 = vsel %vm1715_vm3, %v176_v8, %v183_v10  ;;  %v1054_v11 = vsel %vm1715_vm3, %v183_v10, %v176_v8 }
  0xcd   :  { %v251_v12 = vunpack.c.h.bf16 %v249_v60  ;;  %v250_v13 = vunpack.c.l.bf16 %v249_v60  ;;  %v1055_v15 = vunpack.c.l.bf16 %v1054_v11  ;;  %v1056_v18 = vunpack.c.h.bf16 %v1054_v11 }
  0xcf   :  { %v253_v19 = vadd.f32 %v251_v12, %v206_v16  ;;  %v252_v20 = vadd.f32 %v250_v13, %v205_v17  ;;  %v1761_v21 = vadd.f32 %v1055_v15, %v205_v17  ;;  %v1763_v22 = vadd.f32 %v1056_v18, %v206_v16  ;;  %v368_v12 = vpop.permute.xlu0 %367 }
  0xd1   :  { %v325_v23 = vadd.f32 %v1707_v4, %v253_v19  ;;  %v324_v56 = vadd.f32 %v1710_v9, %v252_v20 }
  0xd3   :  { %v1310_v57 = vmul.f32 -1.442695, %v325_v23  ;;  %v1309_v24 = vmul.f32 -1.442695, %v324_v56  ;;  %v1469_v56 = vmov 7  }
  0xd5   :  { %1382 = vpow2.f32 %v1310_v57  ;;  %v379_v57 = vsel %vm238_vm12, 0, %v1469_v56 }
  0xd6   :  { %1384 = vpow2.f32 %v1309_v24 }
  0xdb   :  { %v1383_v16 = vpop.eup %1382 }
  0xdc   :  { %v1385_v17 = vpop.eup %1384  ;;  %v333_v32 = vadd.f32 1.0, %v1383_v16 }
  0xdd   :  { %v332_v4 = vadd.f32 1.0, %v1385_v17 }
  0xde   :  { %1386 = vrcp.f32 %v333_v32  ;;  %v360_v40 = vand.u32 2147483648, %v333_v32  ;;  %v358_v50 = vand.u32 2147483647, %v333_v32  ;;  %vm354_vm6 = vweird.f32 %v333_v32 }
  0xdf   :  { %1388 = vrcp.f32 %v332_v4  ;;  %v345_v58 = vand.u32 2147483648, %v332_v4  ;;  %vm339_vm8 = vweird.f32 %v332_v4  ;;  %v343_v61 = vand.u32 2147483647, %v332_v4 }
  0xe0   :  { %v361_v59 = vor.u32 1.1754944e-38, %v360_v40  ;;  %vm359_vm9 = vcmp.eq.f32.partialorder %v358_v50, 8.507059e+37 }
  0xe1   :  { %v346_v8 = vor.u32 1.1754944e-38, %v345_v58  ;;  %vm344_vm11 = vcmp.eq.f32.partialorder %v343_v61, 8.507059e+37 }
  0xe4   :  { %v1387_v9 = vpop.eup %1386 }
  0xe5   :  { %v1389_v33 = vpop.eup %1388  ;;  %v350_v34 = vmul.f32 %v1387_v9, %v333_v32  ;;  %vm355_vm4 = vweird.f32 %v1387_v9 }
  0xe6   :  { %v335_v37 = vmul.f32 %v1389_v33, %v332_v4  ;;  %vm340_vm5 = vweird.f32 %v1389_v33  ;;  %vm356_vm7 = vmor %vm354_vm6, %vm355_vm4 }
  0xe7   :  { %v351_v38 = vsub.f32 1.0, %v350_v34  ;;  %vm341_vm10 = vmor %vm339_vm8, %vm340_vm5 }
  0xe8   :  { %v336_v39 = vsub.f32 1.0, %v335_v37 }
  0xe9   :  { %v352_v43 = vmul.f32 %v1387_v9, %v351_v38 }
  0xea   :  { %v337_v51 = vmul.f32 %v1389_v33, %v336_v39 }
  0xeb   :  { %v353_v54 = vadd.f32 %v1387_v9, %v352_v43 }
  0xec   :  { %v338_v55 = vadd.f32 %v1389_v33, %v337_v51 }
  0xed   :  { %v357_v62 = vsel %vm356_vm7, %v1387_v9, %v353_v54 }
  0xee   :  { %v362_v63 = vsel %vm359_vm9, %v361_v59, %v357_v62  ;;  %v342_v6 = vsel %vm341_vm10, %v1389_v33, %v338_v55 }
  0xef   :  { %v364_v7 = vmul.f32 2.0, %v362_v63  ;;  %v347_v60 = vsel %vm344_vm11, %v346_v8, %v342_v6 }
  0xf0   :  { %v370_v13 = vmul.f32 %v368_v12, %v347_v60 }
  0xf1   :  { %v1311_v10 = vadd.f32 -1.0, %v364_v7 }
  0xf3   :  { %v371_v11 = vmul.f32 %v1311_v10, %v347_v60 }
  0xf5   :  { %373 = vrot.lane.b32.xlu0 %v371_v11, %s1467_s21 }
 0x12e   :  { %v1776_v23 = vpop.permute.xlu1 %381 }
 0x12f   :  { %vm383_vm13 = vcmp.lt.s32.totalorder %v379_v57, %v1776_v23 }
 0x167   :  { %v374_v15 = vpop.permute.xlu0 %373 }
 0x168   :  { %v376_v18 = vadd.f32 %v374_v15, %v370_v13 }
 0x16a   :  { %1390 = vtanh.f32 %v376_v18  ;;  %391 = vrot.lane.b32.xlu2 %v376_v18, %s1467_s21 }
 0x170   :  { %v1391_v19 = vpop.eup %1390 }
 0x171   :  { %v378_v20 = vmul.f32 %v1391_v19, %v362_v63 }
 0x173   :  { %385 = vrot.lane.b32.xlu1 %v378_v20, %s1467_s21 }
 0x1c4   :  { %v392_v24 = vpop.permute.xlu2 %391 }
 0x1c5   :  { %v394_v14 = vsel %vm383_vm13, %v392_v24, %v1659_v53 }
 0x1c6   :  { %395 = vst.msk [vmem:[#allocation4] sm:$0xff] %vm105_vm0, %v394_v14 }
 0x1cd   :  { %v1783_v16 = vld [vmem:[#allocation4] sm:$0xff] }
 0x1ce   :  { %480 = vrot.lane.b32.xlu2 %v1783_v16, %s1467_s21 }
 0x1e5   :  { %v386_v17 = vpop.permute.xlu1 %385 }
 0x1e6   :  { %v388_v32 = vsel %vm383_vm13, %v386_v17, %v1643_v48 }
 0x1e7   :  { %389 = vst.msk [vmem:[#allocation3] sm:$0xff] %vm105_vm0, %v388_v32 }
 0x1ee   :  { %v1789_v4 = vld [vmem:[#allocation3] sm:$0xff] }
 0x1ef   :  { %v407_v9 = vpack.c.bf16 %v1789_v4, %v1789_v4 }
 0x1f1   :  { %1312 = vmatmul.msk.bf16.vlgmr.msrb.gmra.mxu2 %vm105_vm0, %v407_v9  ;;  %1313 = vmatmul.msk.bf16.vlgmr.msrb.gmra.mxu3 %vm105_vm0, %v407_v9 }
 0x1f2   :  { %648 = vmatpush.bf16.msrb.mxu3 %v1575_v27  ;;  %635 = vmatpush.bf16.msrb.mxu2 %v1586_v31 }
 0x1f6   :  { %649 = vmatpush.bf16.msrb.mxu3 %v1598_v35  ;;  %636 = vmatpush.bf16.msrb.mxu2 %v1602_v36 }
 0x1fa   :  { %650 = vmatpush.bf16.msrb.mxu3 %v1618_v41  ;;  %637 = vmatpush.bf16.msrb.mxu2 %v1622_v42 }
 0x1fe   :  { %651 = vmatpush.bf16.msrb.mxu3 %v1634_v46  ;;  %638 = vmatpush.bf16.msrb.mxu2 %v1657_v52 }
 0x228   :  { %v481_v14 = vpop.permute.xlu2 %480 }
 0x274   :  { %v420_v48 = vpop.f32.mrf.mxu2  ;;  %v433_v53 = vpop.f32.mrf.mxu3 }
 0x275   :  { %v437_v33 = vadd.f32 %v420_v48, %v1747_v0  ;;  %v438_v34 = vadd.f32 %v433_v53, %v1749_v2 }
 0x277   :  { %v1314_v37 = vmul.f32 -1.442695, %v437_v33  ;;  %v1315_v38 = vmul.f32 -1.442695, %v438_v34  ;;  %v1470_v33 = vmov 6  }
 0x278   :  { %v492_v34 = vsel %vm238_vm12, 1, %v1470_v33 }
 0x279   :  { %1392 = vpow2.f32 %v1314_v37  ;;  %vm493_vm7 = vcmp.lt.s32.totalorder %v492_v34, %v1776_v23 }
 0x27a   :  { %1394 = vpow2.f32 %v1315_v38 }
 0x27c   :  { %v422_v39 = vpop.f32.mrf.mxu2  ;;  %v435_v40 = vpop.f32.mrf.mxu3 }
 0x27f   :  { %v1393_v43 = vpop.eup %1392 }
 0x280   :  { %v1395_v50 = vpop.eup %1394  ;;  %v445_v51 = vadd.f32 1.0, %v1393_v43 }
 0x281   :  { %v446_v54 = vadd.f32 1.0, %v1395_v50 }
 0x282   :  { %1396 = vrcp.f32 %v445_v51  ;;  %v458_v60 = vand.u32 2147483648, %v445_v51  ;;  %vm452_vm3 = vweird.f32 %v445_v51  ;;  %v456_v12 = vand.u32 2147483647, %v445_v51 }
 0x283   :  { %1398 = vrcp.f32 %v446_v54  ;;  %v473_v2 = vand.u32 2147483648, %v446_v54  ;;  %v471_v7 = vand.u32 2147483647, %v446_v54  ;;  %vm467_vm1 = vweird.f32 %v446_v54 }
 0x284   :  { %v459_v20 = vor.u32 1.1754944e-38, %v458_v60  ;;  %vm457_vm6 = vcmp.eq.f32.partialorder %v456_v12, 8.507059e+37 }
 0x285   :  { %v474_v11 = vor.u32 1.1754944e-38, %v473_v2  ;;  %vm472_vm4 = vcmp.eq.f32.partialorder %v471_v7, 8.507059e+37 }
 0x288   :  { %v1397_v55 = vpop.eup %1396 }
 0x289   :  { %v1399_v58 = vpop.eup %1398  ;;  %v448_v59 = vmul.f32 %v1397_v55, %v445_v51  ;;  %vm453_vm15 = vweird.f32 %v1397_v55 }
 0x28a   :  { %v463_v61 = vmul.f32 %v1399_v58, %v446_v54  ;;  %vm468_vm14 = vweird.f32 %v1399_v58  ;;  %vm454_vm5 = vmor %vm452_vm3, %vm453_vm15 }
 0x28b   :  { %v449_v62 = vsub.f32 1.0, %v448_v59  ;;  %vm469_vm2 = vmor %vm467_vm1, %vm468_vm14 }
 0x28c   :  { %v464_v0 = vsub.f32 1.0, %v463_v61 }
 0x28d   :  { %v450_v63 = vmul.f32 %v1397_v55, %v449_v62 }
 0x28e   :  { %v465_v6 = vmul.f32 %v1399_v58, %v464_v0 }
 0x28f   :  { %v451_v8 = vadd.f32 %v1397_v55, %v450_v63 }
 0x290   :  { %v466_v10 = vadd.f32 %v1399_v58, %v465_v6 }
 0x291   :  { %v455_v18 = vsel %vm454_vm5, %v1397_v55, %v451_v8 }
 0x292   :  { %v470_v13 = vsel %vm469_vm2, %v1399_v58, %v466_v10  ;;  %v460_v57 = vsel %vm457_vm6, %v459_v20, %v455_v18 }
 0x293   :  { %v475_v15 = vsel %vm472_vm4, %v474_v11, %v470_v13  ;;  %v483_v17 = vmul.f32 %v481_v14, %v460_v57 }
 0x294   :  { %v477_v19 = vmul.f32 2.0, %v475_v15 }
 0x296   :  { %v1316_v56 = vadd.f32 -1.0, %v477_v19 }
 0x298   :  { %v484_v24 = vmul.f32 %v1316_v56, %v460_v57 }
 0x29a   :  { %486 = vrot.lane.b32.xlu0 %v484_v24, %s1467_s21 }
 0x30c   :  { %v487_v32 = vpop.permute.xlu0 %486 }
 0x30d   :  { %v489_v9 = vadd.f32 %v487_v32, %v483_v17 }
 0x30f   :  { %1400 = vtanh.f32 %v489_v9  ;;  %501 = vrot.lane.b32.xlu2 %v489_v9, %s1467_s21 }
 0x315   :  { %v1401_v48 = vpop.eup %1400 }
 0x316   :  { %v491_v53 = vmul.f32 %v1401_v48, %v475_v15 }
 0x318   :  { %495 = vrot.lane.b32.xlu1 %v491_v53, %s1467_s21 }
 0x369   :  { %v502_v37 = vpop.permute.xlu2 %501 }
 0x36a   :  { %v504_v38 = vsel %vm493_vm7, %v502_v37, %v1783_v16 }
 0x36b   :  { %505 = vst.msk [vmem:[#allocation4] sm:$0xff] %vm105_vm0, %v504_v38 }
 0x372   :  { %v1813_v39 = vld [vmem:[#allocation4] sm:$0xff] }
 0x373   :  { %590 = vrot.lane.b32.xlu0 %v1813_v39, %s1467_s21 }
 0x38a   :  { %v496_v40 = vpop.permute.xlu1 %495 }
 0x38b   :  { %v498_v43 = vsel %vm493_vm7, %v496_v40, %v1789_v4 }
 0x38c   :  { %499 = vst.msk [vmem:[#allocation3] sm:$0xff] %vm105_vm0, %v498_v43 }
 0x393   :  { %v1819_v50 = vld [vmem:[#allocation3] sm:$0xff] }
 0x394   :  { %v517_v51 = vpack.c.bf16 %v1819_v50, %v1819_v50 }
 0x396   :  { %1317 = vmatmul.msk.bf16.vlgmr.msra.gmra.mxu2 %vm105_vm0, %v517_v51  ;;  %1318 = vmatmul.msk.bf16.vlgmr.msra.gmra.mxu3 %vm105_vm0, %v517_v51 }
 0x397   :  { %864 = vmatpush.bf16.msra.mxu3 %v1575_v27  ;;  %851 = vmatpush.bf16.msra.mxu2 %v1586_v31 }
 0x39b   :  { %865 = vmatpush.bf16.msra.mxu3 %v1598_v35  ;;  %852 = vmatpush.bf16.msra.mxu2 %v1602_v36 }
 0x39f   :  { %866 = vmatpush.bf16.msra.mxu3 %v1618_v41  ;;  %853 = vmatpush.bf16.msra.mxu2 %v1622_v42 }
 0x3a3   :  { %867 = vmatpush.bf16.msra.mxu3 %v1634_v46  ;;  %854 = vmatpush.bf16.msra.mxu2 %v1657_v52 }
 0x3e5   :  { %v591_v34 = vpop.permute.xlu0 %590 }
 0x419   :  { %v530_v16 = vpop.f32.mrf.mxu2  ;;  %v543_v4 = vpop.f32.mrf.mxu3 }
 0x41a   :  { %v547_v54 = vadd.f32 %v530_v16, %v1735_v44  ;;  %v548_v55 = vadd.f32 %v543_v4, %v1737_v45  ;;  %v1471_v16 = vmov 5  }
 0x41b   :  { %v602_v4 = vsel %vm238_vm12, 2, %v1471_v16 }
 0x41c   :  { %v1319_v58 = vmul.f32 -1.442695, %v547_v54  ;;  %v1320_v59 = vmul.f32 -1.442695, %v548_v55  ;;  %vm603_vm2 = vcmp.lt.s32.totalorder %v602_v4, %v1776_v23 }
 0x41e   :  { %1402 = vpow2.f32 %v1319_v58 }
 0x41f   :  { %1404 = vpow2.f32 %v1320_v59 }
 0x421   :  { %v532_v61 = vpop.f32.mrf.mxu2  ;;  %v545_v62 = vpop.f32.mrf.mxu3 }
 0x424   :  { %v1403_v0 = vpop.eup %1402 }
 0x425   :  { %v1405_v63 = vpop.eup %1404  ;;  %v555_v2 = vadd.f32 1.0, %v1403_v0 }
 0x426   :  { %v556_v6 = vadd.f32 1.0, %v1405_v63 }
 0x427   :  { %1406 = vrcp.f32 %v555_v2  ;;  %v568_v20 = vand.u32 2147483648, %v555_v2  ;;  %vm562_vm13 = vweird.f32 %v555_v2  ;;  %v566_v57 = vand.u32 2147483647, %v555_v2 }
 0x428   :  { %1408 = vrcp.f32 %v556_v6  ;;  %v583_v45 = vand.u32 2147483648, %v556_v6  ;;  %v581_v15 = vand.u32 2147483647, %v556_v6  ;;  %vm577_vm10 = vweird.f32 %v556_v6 }
 0x429   :  { %v569_v9 = vor.u32 1.1754944e-38, %v568_v20  ;;  %vm567_vm1 = vcmp.eq.f32.partialorder %v566_v57, 8.507059e+37 }
 0x42a   :  { %v584_v56 = vor.u32 1.1754944e-38, %v583_v45  ;;  %vm582_vm14 = vcmp.eq.f32.partialorder %v581_v15, 8.507059e+37 }
 0x42d   :  { %v1407_v7 = vpop.eup %1406 }
 0x42e   :  { %v1409_v8 = vpop.eup %1408  ;;  %v558_v10 = vmul.f32 %v1407_v7, %v555_v2  ;;  %vm563_vm9 = vweird.f32 %v1407_v7 }
 0x42f   :  { %v573_v60 = vmul.f32 %v1409_v8, %v556_v6  ;;  %vm578_vm8 = vweird.f32 %v1409_v8  ;;  %vm564_vm15 = vmor %vm562_vm13, %vm563_vm9 }
 0x430   :  { %v559_v11 = vsub.f32 1.0, %v558_v10  ;;  %vm579_vm11 = vmor %vm577_vm10, %vm578_vm8 }
 0x431   :  { %v574_v44 = vsub.f32 1.0, %v573_v60 }
 0x432   :  { %v560_v12 = vmul.f32 %v1407_v7, %v559_v11 }
 0x433   :  { %v575_v13 = vmul.f32 %v1409_v8, %v574_v44 }
 0x434   :  { %v561_v18 = vadd.f32 %v1407_v7, %v560_v12 }
 0x435   :  { %v576_v19 = vadd.f32 %v1409_v8, %v575_v13 }
 0x436   :  { %v565_v17 = vsel %vm564_vm15, %v1407_v7, %v561_v18 }
 0x437   :  { %v580_v24 = vsel %vm579_vm11, %v1409_v8, %v576_v19  ;;  %v570_v53 = vsel %vm567_vm1, %v569_v9, %v565_v17 }
 0x438   :  { %v585_v14 = vsel %vm582_vm14, %v584_v56, %v580_v24  ;;  %v593_v37 = vmul.f32 %v591_v34, %v570_v53 }
 0x439   :  { %v587_v32 = vmul.f32 2.0, %v585_v14 }
 0x43b   :  { %v1321_v48 = vadd.f32 -1.0, %v587_v32 }
 0x43d   :  { %v594_v33 = vmul.f32 %v1321_v48, %v570_v53 }
 0x43f   :  { %596 = vrot.lane.b32.xlu1 %v594_v33, %s1467_s21 }
 0x4b1   :  { %v597_v38 = vpop.permute.xlu1 %596 }
 0x4b2   :  { %v599_v40 = vadd.f32 %v597_v38, %v593_v37 }
 0x4b4   :  { %1410 = vtanh.f32 %v599_v40  ;;  %611 = vrot.lane.b32.xlu0 %v599_v40, %s1467_s21  ;;  %v1472_v40 = vmov 4  }
 0x4ba   :  { %v1411_v43 = vpop.eup %1410 }
 0x4bb   :  { %v601_v51 = vmul.f32 %v1411_v43, %v585_v14  ;;  %v712_v43 = vsel %vm238_vm12, 3, %v1472_v40 }
 0x4bc   :  { %vm713_vm11 = vcmp.lt.s32.totalorder %v712_v43, %v1776_v23 }
 0x4bd   :  { %605 = vrot.lane.b32.xlu2 %v601_v51, %s1467_s21 }
 0x517   :  { %v606_v54 = vpop.permute.xlu2 %605 }
 0x518   :  { %v608_v55 = vsel %vm603_vm2, %v606_v54, %v1819_v50 }
 0x519   :  { %609 = vst.msk [vmem:[#allocation3] sm:$0xff] %vm105_vm0, %v608_v55 }
 0x520   :  { %v1843_v58 = vld [vmem:[#allocation3] sm:$0xff] }
 0x521   :  { %v627_v59 = vpack.c.bf16 %v1843_v58, %v1843_v58 }
 0x523   :  { %1322 = vmatmul.msk.bf16.vlgmr.msrb.gmra.mxu2 %vm105_vm0, %v627_v59  ;;  %1323 = vmatmul.msk.bf16.vlgmr.msrb.gmra.mxu3 %vm105_vm0, %v627_v59 }
 0x524   :  { %1080 = vmatpush.bf16.msrb.mxu3 %v1575_v27  ;;  %1067 = vmatpush.bf16.msrb.mxu2 %v1586_v31 }
 0x526   :  { %v612_v61 = vpop.permute.xlu0 %611 }
 0x527   :  { %v614_v62 = vsel %vm603_vm2, %v612_v61, %v1813_v39 }
 0x528   :  { %615 = vst.msk [vmem:[#allocation4] sm:$0xff] %vm105_vm0, %v614_v62  ;;  %1081 = vmatpush.bf16.msrb.mxu3 %v1598_v35  ;;  %1068 = vmatpush.bf16.msrb.mxu2 %v1602_v36 }
 0x52c   :  { %1082 = vmatpush.bf16.msrb.mxu3 %v1618_v41  ;;  %1069 = vmatpush.bf16.msrb.mxu2 %v1622_v42 }
 0x52f   :  { %v1857_v50 = vld [vmem:[#allocation4] sm:$0xff] }
 0x530   :  { %700 = vrot.lane.b32.xlu1 %v1857_v50, %s1467_s21  ;;  %1083 = vmatpush.bf16.msrb.mxu3 %v1634_v46 }
 0x531   :  { %1070 = vmatpush.bf16.msrb.mxu2 %v1657_v52 }
 0x5a2   :  { %v701_v48 = vpop.permute.xlu1 %700 }
 0x5a6   :  { %v640_v27 = vpop.f32.mrf.mxu2  ;;  %v653_v31 = vpop.f32.mrf.mxu3 }
 0x5a7   :  { %v657_v39 = vadd.f32 %v640_v27, %v1723_v25  ;;  %v658_v35 = vadd.f32 %v653_v31, %v1725_v26 }
 0x5a9   :  { %v1324_v36 = vmul.f32 -1.442695, %v657_v39  ;;  %v1325_v0 = vmul.f32 -1.442695, %v658_v35 }
 0x5ab   :  { %1412 = vpow2.f32 %v1324_v36 }
 0x5ac   :  { %1414 = vpow2.f32 %v1325_v0 }
 0x5ae   :  { %v642_v41 = vpop.f32.mrf.mxu2  ;;  %v655_v42 = vpop.f32.mrf.mxu3 }
 0x5b1   :  { %v1413_v63 = vpop.eup %1412 }
 0x5b2   :  { %v1415_v2 = vpop.eup %1414  ;;  %v665_v6 = vadd.f32 1.0, %v1413_v63 }
 0x5b3   :  { %v666_v7 = vadd.f32 1.0, %v1415_v2 }
 0x5b4   :  { %1416 = vrcp.f32 %v665_v6  ;;  %v678_v15 = vand.u32 2147483648, %v665_v6  ;;  %vm672_vm7 = vweird.f32 %v665_v6  ;;  %v676_v19 = vand.u32 2147483647, %v665_v6 }
 0x5b5   :  { %1418 = vrcp.f32 %v666_v7  ;;  %v693_v26 = vand.u32 2147483648, %v666_v7  ;;  %v691_v12 = vand.u32 2147483647, %v666_v7  ;;  %vm687_vm5 = vweird.f32 %v666_v7 }
 0x5b6   :  { %v679_v14 = vor.u32 1.1754944e-38, %v678_v15  ;;  %vm677_vm10 = vcmp.eq.f32.partialorder %v676_v19, 8.507059e+37 }
 0x5b7   :  { %v694_v18 = vor.u32 1.1754944e-38, %v693_v26  ;;  %vm692_vm8 = vcmp.eq.f32.partialorder %v691_v12, 8.507059e+37 }
 0x5ba   :  { %v1417_v46 = vpop.eup %1416 }
 0x5bb   :  { %v1419_v52 = vpop.eup %1418  ;;  %v668_v8 = vmul.f32 %v1417_v46, %v665_v6  ;;  %vm673_vm4 = vweird.f32 %v1417_v46 }
 0x5bc   :  { %v683_v10 = vmul.f32 %v1419_v52, %v666_v7  ;;  %vm688_vm3 = vweird.f32 %v1419_v52  ;;  %vm674_vm9 = vmor %vm672_vm7, %vm673_vm4 }
 0x5bd   :  { %v669_v60 = vsub.f32 1.0, %v668_v8  ;;  %vm689_vm6 = vmor %vm687_vm5, %vm688_vm3 }
 0x5be   :  { %v684_v25 = vsub.f32 1.0, %v683_v10 }
 0x5bf   :  { %v670_v11 = vmul.f32 %v1417_v46, %v669_v60 }
 0x5c0   :  { %v685_v44 = vmul.f32 %v1419_v52, %v684_v25 }
 0x5c1   :  { %v671_v45 = vadd.f32 %v1417_v46, %v670_v11 }
 0x5c2   :  { %v686_v13 = vadd.f32 %v1419_v52, %v685_v44 }
 0x5c3   :  { %v675_v57 = vsel %vm674_vm9, %v1417_v46, %v671_v45 }
 0x5c4   :  { %v690_v20 = vsel %vm689_vm6, %v1419_v52, %v686_v13  ;;  %v680_v32 = vsel %vm677_vm10, %v679_v14, %v675_v57 }
 0x5c5   :  { %v695_v56 = vsel %vm692_vm8, %v694_v18, %v690_v20  ;;  %v703_v53 = vmul.f32 %v701_v48, %v680_v32 }
 0x5c6   :  { %v697_v24 = vmul.f32 2.0, %v695_v56 }
 0x5c8   :  { %v1326_v17 = vadd.f32 -1.0, %v697_v24 }
 0x5ca   :  { %v704_v9 = vmul.f32 %v1326_v17, %v680_v32 }
 0x5cc   :  { %706 = vrot.lane.b32.xlu2 %v704_v9, %s1467_s21 }
 0x626   :  { %v707_v33 = vpop.permute.xlu2 %706 }
 0x627   :  { %v709_v34 = vadd.f32 %v707_v33, %v703_v53  ;;  %v1473_v53 = vmov 3  }
 0x628   :  { %v820_v33 = vsel %vm238_vm12, 4, %v1473_v53 }
 0x629   :  { %1420 = vtanh.f32 %v709_v34  ;;  %721 = vrot.lane.b32.xlu1 %v709_v34, %s1467_s21  ;;  %vm821_vm6 = vcmp.lt.s32.totalorder %v820_v33, %v1776_v23 }
 0x62f   :  { %v1421_v37 = vpop.eup %1420 }
 0x630   :  { %v711_v38 = vmul.f32 %v1421_v37, %v695_v56 }
 0x632   :  { %715 = vrot.lane.b32.xlu0 %v711_v38, %s1467_s21 }
 0x69b   :  { %v722_v51 = vpop.permute.xlu1 %721 }
 0x69c   :  { %v724_v16 = vsel %vm713_vm11, %v722_v51, %v1857_v50 }
 0x69d   :  { %725 = vst.msk [vmem:[#allocation4] sm:$0xff] %vm105_vm0, %v724_v16 }
 0x6a4   :  { %v716_v4 = vpop.permute.xlu0 %715  ;;  %v1873_v54 = vld [vmem:[#allocation4] sm:$0xff] }
 0x6a5   :  { %v718_v55 = vsel %vm713_vm11, %v716_v4, %v1843_v58  ;;  %808 = vrot.lane.b32.xlu2 %v1873_v54, %s1467_s21 }
 0x6a6   :  { %719 = vst.msk [vmem:[#allocation3] sm:$0xff] %vm105_vm0, %v718_v55 }
 0x6ad   :  { %v1879_v59 = vld [vmem:[#allocation3] sm:$0xff] }
 0x6ae   :  { %v735_v61 = vpack.c.bf16 %v1879_v59, %v1879_v59 }
 0x6b0   :  { %1327 = vmatmul.msk.bf16.vlgmr.msrb.gmra.mxu0 %vm105_vm0, %v735_v61  ;;  %1328 = vmatmul.msk.bf16.vlgmr.msrb.gmra.mxu1 %vm105_vm0, %v735_v61 }
 0x6ff   :  { %v809_v24 = vpop.permute.xlu2 %808 }
 0x72d   :  { %v748_v62 = vpop.f32.mrf.mxu0  ;;  %v761_v50 = vpop.f32.mrf.mxu1 }
 0x72e   :  { %v765_v27 = vadd.f32 %v748_v62, %v1727_v28  ;;  %v766_v58 = vadd.f32 %v761_v50, %v1729_v29 }
 0x730   :  { %v1329_v31 = vmul.f32 -1.442695, %v765_v27  ;;  %v1330_v39 = vmul.f32 -1.442695, %v766_v58 }
 0x732   :  { %1422 = vpow2.f32 %v1329_v31 }
 0x733   :  { %1424 = vpow2.f32 %v1330_v39 }
 0x735   :  { %v750_v35 = vpop.f32.mrf.mxu0  ;;  %v763_v36 = vpop.f32.mrf.mxu1 }
 0x738   :  { %v1423_v0 = vpop.eup %1422 }
 0x739   :  { %v1425_v41 = vpop.eup %1424  ;;  %v773_v42 = vadd.f32 1.0, %v1423_v0 }
 0x73a   :  { %v774_v63 = vadd.f32 1.0, %v1425_v41 }
 0x73b   :  { %1426 = vrcp.f32 %v773_v42  ;;  %v786_v26 = vand.u32 2147483648, %v773_v42  ;;  %vm780_vm2 = vweird.f32 %v773_v42  ;;  %v784_v12 = vand.u32 2147483647, %v773_v42 }
 0x73c   :  { %1428 = vrcp.f32 %v774_v63  ;;  %v801_v29 = vand.u32 2147483648, %v774_v63  ;;  %v799_v60 = vand.u32 2147483647, %v774_v63  ;;  %vm795_vm15 = vweird.f32 %v774_v63 }
 0x73d   :  { %v787_v19 = vor.u32 1.1754944e-38, %v786_v26  ;;  %vm785_vm5 = vcmp.eq.f32.partialorder %v784_v12, 8.507059e+37 }
 0x73e   :  { %v802_v44 = vor.u32 1.1754944e-38, %v801_v29  ;;  %vm800_vm3 = vcmp.eq.f32.partialorder %v799_v60, 8.507059e+37 }
 0x741   :  { %v1427_v2 = vpop.eup %1426 }
 0x742   :  { %v1429_v6 = vpop.eup %1428  ;;  %v776_v7 = vmul.f32 %v1427_v2, %v773_v42  ;;  %vm781_vm14 = vweird.f32 %v1427_v2 }
 0x743   :  { %v791_v46 = vmul.f32 %v1429_v6, %v774_v63  ;;  %vm796_vm13 = vweird.f32 %v1429_v6  ;;  %vm782_vm4 = vmor %vm780_vm2, %vm781_vm14 }
 0x744   :  { %v777_v52 = vsub.f32 1.0, %v776_v7  ;;  %vm797_vm1 = vmor %vm795_vm15, %vm796_vm13 }
 0x745   :  { %v792_v28 = vsub.f32 1.0, %v791_v46 }
 0x746   :  { %v778_v8 = vmul.f32 %v1427_v2, %v777_v52 }
 0x747   :  { %v793_v10 = vmul.f32 %v1429_v6, %v792_v28 }
 0x748   :  { %v779_v25 = vadd.f32 %v1427_v2, %v778_v8 }
 0x749   :  { %v794_v11 = vadd.f32 %v1429_v6, %v793_v10 }
 0x74a   :  { %v783_v15 = vsel %vm782_vm4, %v1427_v2, %v779_v25 }
 0x74b   :  { %v798_v45 = vsel %vm797_vm1, %v1429_v6, %v794_v11  ;;  %v788_v56 = vsel %vm785_vm5, %v787_v19, %v783_v15 }
 0x74c   :  { %v803_v13 = vsel %vm800_vm3, %v802_v44, %v798_v45  ;;  %v811_v14 = vmul.f32 %v809_v24, %v788_v56 }
 0x74d   :  { %v805_v18 = vmul.f32 2.0, %v803_v13 }
 0x74f   :  { %v1331_v20 = vadd.f32 -1.0, %v805_v18 }
 0x751   :  { %v812_v57 = vmul.f32 %v1331_v20, %v788_v56 }
 0x753   :  { %814 = vrot.lane.b32.xlu0 %v812_v57, %s1467_s21  ;;  %v1474_v57 = vmov 2  }
 0x754   :  { %v928_v24 = vsel %vm238_vm12, 5, %v1474_v57 }
 0x755   :  { %vm929_vm1 = vcmp.lt.s32.totalorder %v928_v24, %v1776_v23 }
 0x7c5   :  { %v815_v17 = vpop.permute.xlu0 %814 }
 0x7c6   :  { %v817_v32 = vadd.f32 %v815_v17, %v811_v14 }
 0x7c8   :  { %1430 = vtanh.f32 %v817_v32  ;;  %829 = vrot.lane.b32.xlu2 %v817_v32, %s1467_s21 }
 0x7ce   :  { %v1431_v9 = vpop.eup %1430 }
 0x7cf   :  { %v819_v48 = vmul.f32 %v1431_v9, %v803_v13 }
 0x7d1   :  { %823 = vrot.lane.b32.xlu1 %v819_v48, %s1467_s21 }
 0x822   :  { %v830_v34 = vpop.permute.xlu2 %829 }
 0x823   :  { %v832_v37 = vsel %vm821_vm6, %v830_v34, %v1873_v54 }
 0x824   :  { %833 = vst.msk [vmem:[#allocation4] sm:$0xff] %vm105_vm0, %v832_v37 }
 0x82b   :  { %v1895_v38 = vld [vmem:[#allocation4] sm:$0xff] }
 0x82c   :  { %916 = vrot.lane.b32.xlu0 %v1895_v38, %s1467_s21 }
 0x843   :  { %v824_v40 = vpop.permute.xlu1 %823 }
 0x844   :  { %v826_v43 = vsel %vm821_vm6, %v824_v40, %v1879_v59 }
 0x845   :  { %827 = vst.msk [vmem:[#allocation3] sm:$0xff] %vm105_vm0, %v826_v43 }
 0x84c   :  { %v1901_v51 = vld [vmem:[#allocation3] sm:$0xff] }
 0x84d   :  { %v843_v16 = vpack.c.bf16 %v1901_v51, %v1901_v51 }
 0x84f   :  { %1332 = vmatmul.msk.bf16.vlgmr.msra.gmra.mxu2 %vm105_vm0, %v843_v16  ;;  %1333 = vmatmul.msk.bf16.vlgmr.msra.gmra.mxu3 %vm105_vm0, %v843_v16 }
 0x89e   :  { %v917_v13 = vpop.permute.xlu0 %916 }
 0x8d2   :  { %v856_v4 = vpop.f32.mrf.mxu2  ;;  %v869_v54 = vpop.f32.mrf.mxu3 }
 0x8d3   :  { %v873_v55 = vadd.f32 %v856_v4, %v1739_v47  ;;  %v874_v61 = vadd.f32 %v869_v54, %v1741_v49 }
 0x8d5   :  { %v1334_v62 = vmul.f32 -1.442695, %v873_v55  ;;  %v1335_v50 = vmul.f32 -1.442695, %v874_v61 }
 0x8d7   :  { %1432 = vpow2.f32 %v1334_v62 }
 0x8d8   :  { %1434 = vpow2.f32 %v1335_v50 }
 0x8da   :  { %v858_v59 = vpop.f32.mrf.mxu2  ;;  %v871_v27 = vpop.f32.mrf.mxu3 }
 0x8dd   :  { %v1433_v58 = vpop.eup %1432 }
 0x8de   :  { %v1435_v31 = vpop.eup %1434  ;;  %v881_v39 = vadd.f32 1.0, %v1433_v58 }
 0x8df   :  { %v882_v35 = vadd.f32 1.0, %v1435_v31 }
 0x8e0   :  { %1436 = vrcp.f32 %v881_v39  ;;  %v894_v28 = vand.u32 2147483648, %v881_v39  ;;  %vm888_vm11 = vweird.f32 %v881_v39  ;;  %v892_v29 = vand.u32 2147483647, %v881_v39 }
 0x8e1   :  { %1438 = vrcp.f32 %v882_v35  ;;  %v909_v49 = vand.u32 2147483648, %v882_v35  ;;  %v907_v7 = vand.u32 2147483647, %v882_v35  ;;  %vm903_vm9 = vweird.f32 %v882_v35 }
 0x8e2   :  { %v895_v26 = vor.u32 1.1754944e-38, %v894_v28  ;;  %vm893_vm15 = vcmp.eq.f32.partialorder %v892_v29, 8.507059e+37 }
 0x8e3   :  { %v910_v8 = vor.u32 1.1754944e-38, %v909_v49  ;;  %vm908_vm13 = vcmp.eq.f32.partialorder %v907_v7, 8.507059e+37 }
 0x8e6   :  { %v1437_v36 = vpop.eup %1436 }
 0x8e7   :  { %v1439_v0 = vpop.eup %1438  ;;  %v884_v41 = vmul.f32 %v1437_v36, %v881_v39  ;;  %vm889_vm8 = vweird.f32 %v1437_v36 }
 0x8e8   :  { %v899_v42 = vmul.f32 %v1439_v0, %v882_v35  ;;  %vm904_vm7 = vweird.f32 %v1439_v0  ;;  %vm890_vm14 = vmor %vm888_vm11, %vm889_vm8 }
 0x8e9   :  { %v885_v63 = vsub.f32 1.0, %v884_v41  ;;  %vm905_vm10 = vmor %vm903_vm9, %vm904_vm7 }
 0x8ea   :  { %v900_v47 = vsub.f32 1.0, %v899_v42 }
 0x8eb   :  { %v886_v2 = vmul.f32 %v1437_v36, %v885_v63 }
 0x8ec   :  { %v901_v6 = vmul.f32 %v1439_v0, %v900_v47 }
 0x8ed   :  { %v887_v46 = vadd.f32 %v1437_v36, %v886_v2 }
 0x8ee   :  { %v902_v52 = vadd.f32 %v1439_v0, %v901_v6 }
 0x8ef   :  { %v891_v25 = vsel %vm890_vm14, %v1437_v36, %v887_v46 }
 0x8f0   :  { %v906_v10 = vsel %vm905_vm10, %v1439_v0, %v902_v52  ;;  %v896_v12 = vsel %vm893_vm15, %v895_v26, %v891_v25 }
 0x8f1   :  { %v911_v60 = vsel %vm908_vm13, %v910_v8, %v906_v10  ;;  %v919_v15 = vmul.f32 %v917_v13, %v896_v12 }
 0x8f2   :  { %v913_v11 = vmul.f32 2.0, %v911_v60 }
 0x8f4   :  { %v1336_v44 = vadd.f32 -1.0, %v913_v11 }
 0x8f6   :  { %v920_v45 = vmul.f32 %v1336_v44, %v896_v12  ;;  %v1475_v44 = vmov 1  }
 0x8f7   :  { %v1036_v12 = vsel %vm238_vm12, 6, %v1475_v44 }
 0x8f8   :  { %922 = vrot.lane.b32.xlu1 %v920_v45, %s1467_s21  ;;  %vm1037_vm10 = vcmp.lt.s32.totalorder %v1036_v12, %v1776_v23 }
 0x96a   :  { %v923_v18 = vpop.permute.xlu1 %922 }
 0x96b   :  { %v925_v19 = vadd.f32 %v923_v18, %v919_v15 }
 0x96d   :  { %1440 = vtanh.f32 %v925_v19  ;;  %937 = vrot.lane.b32.xlu0 %v925_v19, %s1467_s21 }
 0x973   :  { %v1441_v20 = vpop.eup %1440 }
 0x974   :  { %v927_v56 = vmul.f32 %v1441_v20, %v911_v60 }
 0x976   :  { %931 = vrot.lane.b32.xlu2 %v927_v56, %s1467_s21 }
 0x9d0   :  { %v932_v14 = vpop.permute.xlu2 %931 }
 0x9d1   :  { %v934_v17 = vsel %vm929_vm1, %v932_v14, %v1901_v51 }
 0x9d2   :  { %935 = vst.msk [vmem:[#allocation3] sm:$0xff] %vm105_vm0, %v934_v17 }
 0x9d9   :  { %v1917_v32 = vld [vmem:[#allocation3] sm:$0xff] }
 0x9da   :  { %v951_v9 = vpack.c.bf16 %v1917_v32, %v1917_v32 }
 0x9dc   :  { %1337 = vmatmul.msk.bf16.vlgmr.msra.gmra.mxu0 %vm105_vm0, %v951_v9  ;;  %1338 = vmatmul.msk.bf16.vlgmr.msra.gmra.mxu1 %vm105_vm0, %v951_v9 }
 0x9df   :  { %v938_v48 = vpop.permute.xlu0 %937 }
 0x9e0   :  { %v940_v53 = vsel %vm929_vm1, %v938_v48, %v1895_v38 }
 0x9e1   :  { %941 = vst.msk [vmem:[#allocation4] sm:$0xff] %vm105_vm0, %v940_v53 }
 0x9e8   :  { %v1925_v33 = vld [vmem:[#allocation4] sm:$0xff] }
 0x9e9   :  { %1024 = vrot.lane.b32.xlu1 %v1925_v33, %s1467_s21 }
 0xa59   :  { %v964_v34 = vpop.f32.mrf.mxu0  ;;  %v977_v37 = vpop.f32.mrf.mxu1 }
 0xa5a   :  { %v981_v40 = vadd.f32 %v964_v34, %v1751_v3  ;;  %v982_v43 = vadd.f32 %v977_v37, %v1753_v5 }
 0xa5b   :  { %v1025_v29 = vpop.permute.xlu1 %1024 }
 0xa5c   :  { %v1339_v51 = vmul.f32 -1.442695, %v981_v40  ;;  %v1340_v16 = vmul.f32 -1.442695, %v982_v43 }
 0xa5e   :  { %1442 = vpow2.f32 %v1339_v51 }
 0xa5f   :  { %1444 = vpow2.f32 %v1340_v16 }
 0xa61   :  { %v966_v4 = vpop.f32.mrf.mxu0  ;;  %v979_v54 = vpop.f32.mrf.mxu1 }
 0xa64   :  { %v1443_v38 = vpop.eup %1442 }
 0xa65   :  { %v1445_v55 = vpop.eup %1444  ;;  %v989_v61 = vadd.f32 1.0, %v1443_v38 }
 0xa66   :  { %v990_v62 = vadd.f32 1.0, %v1445_v55 }
 0xa67   :  { %1446 = vrcp.f32 %v989_v61  ;;  %v1002_v42 = vand.u32 2147483648, %v989_v61  ;;  %vm996_vm6 = vweird.f32 %v989_v61  ;;  %v1000_v47 = vand.u32 2147483647, %v989_v61 }
 0xa68   :  { %1448 = vrcp.f32 %v990_v62  ;;  %v1017_v5 = vand.u32 2147483648, %v990_v62  ;;  %v1015_v36 = vand.u32 2147483647, %v990_v62  ;;  %vm1011_vm4 = vweird.f32 %v990_v62 }
 0xa69   :  { %v1003_v46 = vor.u32 1.1754944e-38, %v1002_v42  ;;  %vm1001_vm9 = vcmp.eq.f32.partialorder %v1000_v47, 8.507059e+37 }
 0xa6a   :  { %v1018_v63 = vor.u32 1.1754944e-38, %v1017_v5  ;;  %vm1016_vm7 = vcmp.eq.f32.partialorder %v1015_v36, 8.507059e+37 }
 0xa6d   :  { %v1447_v50 = vpop.eup %1446 }
 0xa6e   :  { %v1449_v59 = vpop.eup %1448  ;;  %v992_v27 = vmul.f32 %v1447_v50, %v989_v61  ;;  %vm997_vm3 = vweird.f32 %v1447_v50 }
 0xa6f   :  { %v1007_v58 = vmul.f32 %v1449_v59, %v990_v62  ;;  %vm1012_vm2 = vweird.f32 %v1449_v59  ;;  %vm998_vm8 = vmor %vm996_vm6, %vm997_vm3 }
 0xa70   :  { %v993_v31 = vsub.f32 1.0, %v992_v27  ;;  %vm1013_vm5 = vmor %vm1011_vm4, %vm1012_vm2 }
 0xa71   :  { %v1008_v3 = vsub.f32 1.0, %v1007_v58 }
 0xa72   :  { %v994_v39 = vmul.f32 %v1447_v50, %v993_v31 }
 0xa73   :  { %v1009_v35 = vmul.f32 %v1449_v59, %v1008_v3 }
 0xa74   :  { %v995_v0 = vadd.f32 %v1447_v50, %v994_v39 }
 0xa75   :  { %v1010_v41 = vadd.f32 %v1449_v59, %v1009_v35 }
 0xa76   :  { %v999_v6 = vsel %vm998_vm8, %v1447_v50, %v995_v0 }
 0xa77   :  { %v1014_v2 = vsel %vm1013_vm5, %v1449_v59, %v1010_v41  ;;  %v1004_v28 = vsel %vm1001_vm9, %v1003_v46, %v999_v6  ;;  %v1165_v46 = vld [vmem:[%s2004_s5 + $0x30] sm:$0xff] }
 0xa78   :  { %v1019_v49 = vsel %vm1016_vm7, %v1018_v63, %v1014_v2  ;;  %v1027_v10 = vmul.f32 %v1025_v29, %v1004_v28 }
 0xa79   :  { %v1021_v7 = vmul.f32 2.0, %v1019_v49 }
 0xa7b   :  { %v1341_v52 = vadd.f32 -1.0, %v1021_v7  ;;  %v1166_v7 = vld [vmem:[%s2004_s5 + $0x38] sm:$0xff] }
 0xa7c   :  { %1182 = vmatpush.msrb.mxu0 %v1166_v7 }
 0xa7d   :  { %v1028_v8 = vmul.f32 %v1341_v52, %v1004_v28  ;;  %v1164_v52 = vld [vmem:[%s2004_s5 + $0x28] sm:$0xff]  ;;  %v1163_v28 = vld [vmem:[%s2004_s5 + $0x20] sm:$0xff] }
 0xa7e   :  { %1183 = vmatpush.msrb.mxu0 %v1165_v46 }
 0xa7f   :  { %1030 = vrot.lane.b32.xlu2 %v1028_v8, %s1467_s21  ;;  %v1144_v8 = vsel %vm238_vm12, 7, %v1468_v30  ;;  %v1159_v30 = vld [vmem:[%s2004_s5] sm:$0xff] }
 0xa80   :  { %1184 = vmatpush.msrb.mxu0 %v1164_v52  ;;  %vm1145_vm5 = vcmp.lt.s32.totalorder %v1144_v8, %v1776_v23 }
 0xa82   :  { %1185 = vmatpush.msrb.mxu0 %v1163_v28 }
 0xad9   :  { %v1031_v60 = vpop.permute.xlu2 %1030 }
 0xada   :  { %v1033_v25 = vadd.f32 %v1031_v60, %v1027_v10  ;;  %v1162_v60 = vld [vmem:[%s2004_s5 + $0x18] sm:$0xff] }
 0xadb   :  { %1186 = vmatpush.msrb.mxu0 %v1162_v60 }
 0xadc   :  { %1450 = vtanh.f32 %v1033_v25  ;;  %1045 = vrot.lane.b32.xlu1 %v1033_v25, %s1467_s21  ;;  %v1161_v25 = vld [vmem:[%s2004_s5 + $0x10] sm:$0xff] }
 0xadd   :  { %1187 = vmatpush.msrb.mxu0 %v1161_v25 }
 0xadf   :  { %1188 = vmatpush.msrb.mxu0 %v1160_v1 }
 0xae1   :  { %1189 = vmatpush.msrb.mxu0 %v1159_v30 }
 0xae2   :  { %v1451_v11 = vpop.eup %1450 }
 0xae3   :  { %v1035_v26 = vmul.f32 %v1451_v11, %v1019_v49  ;;  %v12_v11 = vstv %s2005_s6 }
 0xae4   :  { %13 = vst [vmem:[#allocation5] sm:$0x1] %v12_v11 }
 0xae5   :  { %1039 = vrot.lane.b32.xlu0 %v1035_v26, %s1467_s21 }
 0xb4e   :  { %v1046_v45 = vpop.permute.xlu1 %1045 }
 0xb4f   :  { %v1048_v13 = vsel %vm1037_vm10, %v1046_v45, %v1925_v33  ;;  %v1381_v45 = vld [vmem:[#allocation5] ss:$0 sm:$0xff] }
 0xb50   :  { %1049 = vst.msk [vmem:[#allocation4] sm:$0xff] %vm105_vm0, %v1048_v13 }
 0xb57   :  { %v1040_v15 = vpop.permute.xlu0 %1039  ;;  %v1939_v18 = vld [vmem:[#allocation4] sm:$0xff] }
 0xb58   :  { %v1042_v19 = vsel %vm1037_vm10, %v1040_v15, %v1917_v32  ;;  %1132 = vrot.lane.b32.xlu2 %v1939_v18, %s1467_s21 }
 0xb59   :  { %1043 = vst.msk [vmem:[#allocation3] sm:$0xff] %vm105_vm0, %v1042_v19 }
 0xb60   :  { %v1945_v20 = vld [vmem:[#allocation3] sm:$0xff] }
 0xb61   :  { %v1059_v56 = vpack.c.bf16 %v1945_v20, %v1945_v20 }
 0xb63   :  { %1342 = vmatmul.msk.bf16.vlgmr.msrb.gmra.mxu2 %vm105_vm0, %v1059_v56  ;;  %1343 = vmatmul.msk.bf16.vlgmr.msrb.gmra.mxu3 %vm105_vm0, %v1059_v56 }
 0xbb2   :  { %v1133_v42 = vpop.permute.xlu2 %1132 }
 0xbe6   :  { %v1072_v57 = vpop.f32.mrf.mxu2  ;;  %v1085_v24 = vpop.f32.mrf.mxu3 }
 0xbe7   :  { %v1089_v14 = vadd.f32 %v1072_v57, %v1761_v21  ;;  %v1090_v17 = vadd.f32 %v1085_v24, %v1763_v22 }
 0xbe9   :  { %v1344_v32 = vmul.f32 -1.442695, %v1089_v14  ;;  %v1345_v9 = vmul.f32 -1.442695, %v1090_v17 }
 0xbeb   :  { %1452 = vpow2.f32 %v1344_v32 }
 0xbec   :  { %1454 = vpow2.f32 %v1345_v9 }
 0xbee   :  { %v1074_v48 = vpop.f32.mrf.mxu2  ;;  %v1087_v53 = vpop.f32.mrf.mxu3 }
 0xbf1   :  { %v1453_v33 = vpop.eup %1452 }
 0xbf2   :  { %v1455_v34 = vpop.eup %1454  ;;  %v1097_v37 = vadd.f32 1.0, %v1453_v33 }
 0xbf3   :  { %v1098_v40 = vadd.f32 1.0, %v1455_v34 }
 0xbf4   :  { %1456 = vrcp.f32 %v1097_v37  ;;  %v1110_v59 = vand.u32 2147483648, %v1097_v37  ;;  %vm1104_vm1 = vweird.f32 %v1097_v37  ;;  %v1108_v58 = vand.u32 2147483647, %v1097_v37 }
 0xbf5   :  { %1458 = vrcp.f32 %v1098_v40  ;;  %v1125_v22 = vand.u32 2147483648, %v1098_v40  ;;  %v1123_v61 = vand.u32 2147483647, %v1098_v40  ;;  %vm1119_vm14 = vweird.f32 %v1098_v40 }
 0xbf6   :  { %v1111_v35 = vor.u32 1.1754944e-38, %v1110_v59  ;;  %vm1109_vm4 = vcmp.eq.f32.partialorder %v1108_v58, 8.507059e+37 }
 0xbf7   :  { %v1126_v27 = vor.u32 1.1754944e-38, %v1125_v22  ;;  %vm1124_vm2 = vcmp.eq.f32.partialorder %v1123_v61, 8.507059e+37 }
 0xbfa   :  { %v1457_v43 = vpop.eup %1456 }
 0xbfb   :  { %v1459_v51 = vpop.eup %1458  ;;  %v1100_v16 = vmul.f32 %v1457_v43, %v1097_v37  ;;  %vm1105_vm13 = vweird.f32 %v1457_v43 }
 0xbfc   :  { %v1115_v4 = vmul.f32 %v1459_v51, %v1098_v40  ;;  %vm1120_vm11 = vweird.f32 %v1459_v51  ;;  %vm1106_vm3 = vmor %vm1104_vm1, %vm1105_vm13 }
 0xbfd   :  { %v1101_v54 = vsub.f32 1.0, %v1100_v16  ;;  %vm1121_vm15 = vmor %vm1119_vm14, %vm1120_vm11 }
 0xbfe   :  { %v1116_v21 = vsub.f32 1.0, %v1115_v4 }
 0xbff   :  { %v1102_v38 = vmul.f32 %v1457_v43, %v1101_v54 }
 0xc00   :  { %v1117_v55 = vmul.f32 %v1459_v51, %v1116_v21 }
 0xc01   :  { %v1103_v62 = vadd.f32 %v1457_v43, %v1102_v38 }
 0xc02   :  { %v1118_v50 = vadd.f32 %v1459_v51, %v1117_v55 }
 0xc03   :  { %v1107_v39 = vsel %vm1106_vm3, %v1457_v43, %v1103_v62 }
 0xc04   :  { %v1122_v31 = vsel %vm1121_vm15, %v1459_v51, %v1118_v50  ;;  %v1112_v0 = vsel %vm1109_vm4, %v1111_v35, %v1107_v39 }
 0xc05   :  { %v1127_v3 = vsel %vm1124_vm2, %v1126_v27, %v1122_v31  ;;  %v1135_v63 = vmul.f32 %v1133_v42, %v1112_v0 }
 0xc06   :  { %v1129_v5 = vmul.f32 2.0, %v1127_v3 }
 0xc08   :  { %v1346_v36 = vadd.f32 -1.0, %v1129_v5 }
 0xc0a   :  { %v1136_v41 = vmul.f32 %v1346_v36, %v1112_v0 }
 0xc0c   :  { %1138 = vrot.lane.b32.xlu0 %v1136_v41, %s1467_s21 }
 0xc7e   :  { %v1139_v47 = vpop.permute.xlu0 %1138 }
 0xc7f   :  { %v1141_v2 = vadd.f32 %v1139_v47, %v1135_v63 }
 0xc81   :  { %1460 = vtanh.f32 %v1141_v2  ;;  %1153 = vrot.lane.b32.xlu2 %v1141_v2, %s1467_s21 }
 0xc87   :  { %v1461_v49 = vpop.eup %1460 }
 0xc88   :  { %v1143_v6 = vmul.f32 %v1461_v49, %v1127_v3 }
 0xc8a   :  { %1147 = vrot.lane.b32.xlu1 %v1143_v6, %s1467_s21 }
 0xcdb   :  { %v1154_v29 = vpop.permute.xlu2 %1153 }
 0xcdc   :  { %v1156_v10 = vsel %vm1145_vm5, %v1154_v29, %v1939_v18 }
 0xcdd   :  { %1157 = vst.msk [vmem:[#allocation4] sm:$0xff] %vm105_vm0, %v1156_v10 }
 0xcfc   :  { %v1148_v26 = vpop.permute.xlu1 %1147 }
 0xcfd   :  { %v1150_v44 = vsel %vm1145_vm5, %v1148_v26, %v1945_v20 }
 0xcfe   :  { %1151 = vst.msk [vmem:[#allocation3] sm:$0xff] %vm105_vm0, %v1150_v44 }
 0xd05   :  { %v1158_v12 = vld [vmem:[#allocation3] sm:$0xff] }
 0xd06   :  { %1347 = vmatmul.msk.f32.vlgmr.msrb.gmra.mxu0 %vm105_vm0, %v1158_v12  ;;  %vm1213_vm0 = vcmask 7168  }
 0xd83   :  { %v1191_v13 = vpop.f32.mrf.mxu0 }
 0xd84   :  { %v1192_v15 = vadd.f32 %v1381_v45, %v1191_v13 }
 0xd86   :  { %v1348_v18 = vmul.f32 -1.442695, %v1192_v15 }
 0xd88   :  { %1462 = vpow2.f32 %v1348_v18 }
 0xd8e   :  { %v1463_v19 = vpop.eup %1462 }
 0xd8f   :  { %v1197_v56 = vadd.f32 1.0, %v1463_v19 }
 0xd91   :  { %1464 = vrcp.f32 %v1197_v56  ;;  %v1209_v17 = vand.u32 2147483648, %v1197_v56  ;;  %v1207_v23 = vand.u32 2147483647, %v1197_v56  ;;  %vm1203_vm6 = vweird.f32 %v1197_v56 }
 0xd93   :  { %v1210_v9 = vor.u32 1.1754944e-38, %v1209_v17  ;;  %vm1208_vm8 = vcmp.eq.f32.partialorder %v1207_v23, 8.507059e+37 }
 0xd97   :  { %v1465_v57 = vpop.eup %1464 }
 0xd98   :  { %v1199_v24 = vmul.f32 %v1465_v57, %v1197_v56  ;;  %vm1204_vm12 = vweird.f32 %v1465_v57 }
 0xd99   :  { %vm1205_vm7 = vmor %vm1203_vm6, %vm1204_vm12 }
 0xd9a   :  { %v1200_v14 = vsub.f32 1.0, %v1199_v24 }
 0xd9c   :  { %v1201_v32 = vmul.f32 %v1465_v57, %v1200_v14 }
 0xd9e   :  { %v1202_v20 = vadd.f32 %v1465_v57, %v1201_v32 }
 0xda0   :  { %v1206_v48 = vsel %vm1205_vm7, %v1465_v57, %v1202_v20 }
 0xda1   :  { %v1211_v53 = vsel %vm1208_vm8, %v1210_v9, %v1206_v48 }
 0xda2   :  { %1214 = vst.msk [vmem:[%s2006_s7] sm:$0xff] %vm1213_vm0, %v1211_v53 }

// kernel: _lambda_.2
= control target key start
LH: loop header
LB: loop body
LE: loop exit
PB: predicated region body
PF: predicated region fallthrough
CT: control target
= control target key end

     0   :  { %vm73_vm0 = vcmask 261120   ;;  %vm160_vm1 = vcmask 523264   ;;  %v1536_v33 = vmov 0.0   ;;  %s1537_s18 = smov 64   ;;  %v178_v49 = vlaneseq  ;;  %s2175_s1 = inlined_call_operand.vmem [shape: bf16[32,256], index: 1, kind: input, shape index: {}]   ;;  %s2176_s0 = inlined_call_operand.vmem [shape: bf16[8,8,32], index: 0, kind: input, shape index: {}]   ;;  %s2177_s2 = inlined_call_operand.vmem [shape: bf16[64,256], index: 2, kind: input, shape index: {}]   ;;  %s2178_s3 = inlined_call_operand.vmem [shape: f32[1,256], index: 3, kind: input, shape index: {}]   ;;  %s2179_s4 = inlined_call_operand.vmem [shape: s32[8,1], index: 4, kind: input, shape index: {}]   ;;  %s2180_s5 = inlined_call_operand.vmem [shape: bf16[8,8,64], index: 5, kind: output, shape index: {}]  }
   0x1   :  { %v1326_v0 = vld [vmem:[%s2175_s1 + $0x10] sm:$0xf]  ;;  %v1433_v1 = vld [vmem:[%s2175_s1 + $0x14] sm:$0xf0]  ;;  %v1432_v2 = vld [vmem:[%s2175_s1 + $0x14] sm:$0xf] }
   0x2   :  { %v1327_v3 = vor.u32 %v1433_v1, %v1326_v0  ;;  %v1328_v4 = vld [vmem:[%s2175_s1 + $0x18] sm:$0xf0]  ;;  %v1318_v5 = vld [vmem:[%s2175_s1] sm:$0xf]  ;;  %v1431_v6 = vld [vmem:[%s2175_s1 + $0x4] sm:$0xf0] }
   0x3   :  { %v1331_v7 = vor.u32 %v1432_v2, %v1328_v4  ;;  %v1430_v8 = vld [vmem:[%s2175_s1 + $0x4] sm:$0xf]  ;;  %v1320_v9 = vld [vmem:[%s2175_s1 + $0x8] sm:$0xf0]  ;;  %v1319_v10 = vor.u32 %v1431_v6, %v1318_v5  ;;  %v1440_v13 = vld [vmem:[%s2177_s2 + $0x34] sm:$0xf] }
   0x4   :  { %92 = vmatpush.bf16.msra.mxu0 %v1327_v3  ;;  %v1323_v11 = vor.u32 %v1430_v8, %v1320_v9  ;;  %v1426_v12 = vld [vmem:[%s2176_s0] sm:$0xff]  ;;  %v1368_v14 = vld [vmem:[%s2177_s2 + $0x38] sm:$0xf0]  ;;  %v1366_v16 = vld [vmem:[%s2177_s2 + $0x30] sm:$0xf]  ;;  %161 = vst.msk [vmem:[#allocation3] sm:$0xff] %vm160_vm1, %v1536_v33 }
   0x5   :  { %121 = vmatpush.bf16.msra.mxu1 %v1331_v7  ;;  %v1611_v15 = vor.u32 %v1440_v13, %v1368_v14  ;;  %v1441_v17 = vld [vmem:[%s2177_s2 + $0x34] sm:$0xf0]  ;;  %v1438_v18 = vld [vmem:[%s2177_s2 + $0x24] sm:$0xf]  ;;  %v1360_v20 = vld [vmem:[%s2177_s2 + $0x28] sm:$0xf0] }
   0x6   :  { %v1622_v19 = vor.u32 %v1441_v17, %v1366_v16  ;;  %v1358_v21 = vld [vmem:[%s2177_s2 + $0x20] sm:$0xf]  ;;  %v1439_v22 = vld [vmem:[%s2177_s2 + $0x24] sm:$0xf0]  ;;  %v1634_v23 = vor.u32 %v1438_v18, %v1360_v20  ;;  %v1436_v25 = vld [vmem:[%s2177_s2 + $0x14] sm:$0xf] }
   0x7   :  { %284 = vmatpush.bf16.msra.mxu3 %v1611_v15  ;;  %v1638_v24 = vor.u32 %v1439_v22, %v1358_v21  ;;  %v1352_v26 = vld [vmem:[%s2177_s2 + $0x18] sm:$0xf0]  ;;  %v1350_v27 = vld [vmem:[%s2177_s2 + $0x10] sm:$0xf]  ;;  %v1437_v28 = vld [vmem:[%s2177_s2 + $0x14] sm:$0xf0] }
   0x8   :  { %93 = vmatpush.bf16.msra.mxu0 %v1319_v10  ;;  %271 = vmatpush.bf16.msra.mxu2 %v1622_v19  ;;  %v1654_v29 = vor.u32 %v1436_v25, %v1352_v26  ;;  %v1658_v30 = vor.u32 %v1437_v28, %v1350_v27  ;;  %v1434_v31 = vld [vmem:[%s2177_s2 + $0x4] sm:$0xf]  ;;  %v1344_v32 = vld [vmem:[%s2177_s2 + $0x8] sm:$0xf0]  ;;  %162 = vst.msk [vmem:[#allocation4] sm:$0xff] %vm160_vm1, %v1536_v33  ;;  %v1428_v42 = vld [vmem:[%s2176_s0 + $0x10] sm:$0xff] }
   0x9   :  { %122 = vmatpush.bf16.msra.mxu1 %v1323_v11  ;;  %v1670_v34 = vor.u32 %v1434_v31, %v1344_v32  ;;  %v1427_v35 = vld [vmem:[%s2176_s0 + $0x8] sm:$0xff]  ;;  %v1342_v38 = vld [vmem:[%s2177_s2] sm:$0xf]  ;;  %v1429_v43 = vld [vmem:[%s2176_s0 + $0x18] sm:$0xff]  ;;  %v1740_v53 = vand.u32 127, %v178_v49 }
   0xa   :  { %v1435_v39 = vld [vmem:[%s2177_s2 + $0x4] sm:$0xf0]  ;;  %v172_v63 = vld [vmem:[%s2178_s3] sm:$0x3] }
   0xb   :  { %1332 = vmatmul.msk.bf16.vlgmr.msra.gmra.mxu0 %vm73_vm0, %v1426_v12  ;;  %285 = vmatpush.bf16.msra.mxu3 %v1634_v23  ;;  %v1679_v36 = vld [vmem:[#allocation3] sm:$0xff]  ;;  %v1693_v40 = vor.u32 %v1435_v39, %v1342_v38  ;;  %v180_v54 = vadd.s32 128, %v1740_v53  ;;  %v185_v59 = vand.u32 63, %v1740_v53  ;;  %v175_v4 = vperm.slane %v172_v63, 1 }
   0xc   :  { %1336 = vmatmul.msk.bf16.vlgmr.msra.gmra.mxu1 %vm73_vm0, %v1426_v12  ;;  %825 = vmatpush.bf16.msrb.mxu0 %v1622_v19  ;;  %v223_v37 = vpack.c.bf16 %v1679_v36, %v1679_v36  ;;  %v174_v5 = vperm.slane %v172_v63, 0  ;;  %v1806_v2 = vld [vmem:[%s2179_s4] sm:$0xff]  ;;  %vm207_vm13 = vcmp.lt.s32.totalorder %v1740_v53, 32 }
   0xd   :  { %838 = vmatpush.bf16.msrb.mxu1 %v1611_v15  ;;  %272 = vmatpush.bf16.msra.mxu2 %v1638_v24  ;;  %v192_v60 = vand.u32 63, %v180_v54  ;;  %vm205_vm2 = vcmp.lt.s32.totalorder %v185_v59, 32 }
   0xf   :  { %286 = vmatpush.bf16.msra.mxu3 %v1654_v29  ;;  %v1695_v41 = vld [vmem:[#allocation4] sm:$0xff]  ;;  %vm206_vm3 = vcmp.lt.s32.totalorder %v192_v60, 32 }
  0x10   :  { %826 = vmatpush.bf16.msrb.mxu0 %v1638_v24  ;;  %336 = vrot.lane.b32.xlu0 %v1695_v41, %s1537_s18  ;;  %vm1751_vm4 = vmpackc.low %vm206_vm3, %vm205_vm2 }
  0x11   :  { %839 = vmatpush.bf16.msrb.mxu1 %v1634_v23  ;;  %273 = vmatpush.bf16.msra.mxu2 %v1658_v30 }
  0x13   :  { %287 = vmatpush.bf16.msra.mxu3 %v1670_v34 }
  0x14   :  { %827 = vmatpush.bf16.msrb.mxu0 %v1658_v30 }
  0x15   :  { %840 = vmatpush.bf16.msrb.mxu1 %v1654_v29  ;;  %274 = vmatpush.bf16.msra.mxu2 %v1693_v40 }
  0x16   :  { %1373 = vmatmul.msk.bf16.vlgmr.msra.gmra.mxu3 %vm160_vm1, %v223_v37 }
  0x17   :  { %426 = vmatpush.bf16.msrb.mxu3 %v1611_v15 }
  0x18   :  { %828 = vmatpush.bf16.msrb.mxu0 %v1693_v40  ;;  %1372 = vmatmul.msk.bf16.vlgmr.msra.gmra.mxu2 %vm160_vm1, %v223_v37 }
  0x19   :  { %841 = vmatpush.bf16.msrb.mxu1 %v1670_v34  ;;  %413 = vmatpush.bf16.msrb.mxu2 %v1622_v19 }
  0x1b   :  { %1333 = vmatmul.msk.bf16.gmra.mxu0 %vm73_vm0, %v1427_v35  ;;  %427 = vmatpush.bf16.msrb.mxu3 %v1634_v23 }
  0x1c   :  { %1337 = vmatmul.msk.bf16.gmra.mxu1 %vm73_vm0, %v1427_v35  ;;  %1069 = vmatpush.bf16.msra.mxu0 %v1622_v19 }
  0x1d   :  { %1082 = vmatpush.bf16.msra.mxu1 %v1611_v15  ;;  %414 = vmatpush.bf16.msrb.mxu2 %v1638_v24 }
  0x1f   :  { %428 = vmatpush.bf16.msrb.mxu3 %v1654_v29 }
  0x20   :  { %1070 = vmatpush.bf16.msra.mxu0 %v1638_v24 }
  0x21   :  { %1083 = vmatpush.bf16.msra.mxu1 %v1634_v23  ;;  %415 = vmatpush.bf16.msrb.mxu2 %v1658_v30 }
  0x23   :  { %429 = vmatpush.bf16.msrb.mxu3 %v1670_v34 }
  0x24   :  { %1071 = vmatpush.bf16.msra.mxu0 %v1658_v30 }
  0x25   :  { %1084 = vmatpush.bf16.msra.mxu1 %v1654_v29  ;;  %416 = vmatpush.bf16.msrb.mxu2 %v1693_v40 }
  0x27   :  { %564 = vmatpush.bf16.msra.mxu3 %v1611_v15 }
  0x28   :  { %1072 = vmatpush.bf16.msra.mxu0 %v1693_v40 }
  0x29   :  { %551 = vmatpush.bf16.msra.mxu2 %v1622_v19  ;;  %1085 = vmatpush.bf16.msra.mxu1 %v1670_v34 }
  0x2b   :  { %1334 = vmatmul.msk.bf16.gmra.mxu0 %vm73_vm0, %v1428_v42  ;;  %565 = vmatpush.bf16.msra.mxu3 %v1634_v23 }
  0x2c   :  { %1338 = vmatmul.msk.bf16.gmra.mxu1 %vm73_vm0, %v1428_v42 }
  0x2d   :  { %552 = vmatpush.bf16.msra.mxu2 %v1638_v24 }
  0x2f   :  { %566 = vmatpush.bf16.msra.mxu3 %v1654_v29 }
  0x31   :  { %553 = vmatpush.bf16.msra.mxu2 %v1658_v30 }
  0x33   :  { %567 = vmatpush.bf16.msra.mxu3 %v1670_v34 }
  0x35   :  { %554 = vmatpush.bf16.msra.mxu2 %v1693_v40 }
  0x3b   :  { %1335 = vmatmul.msk.bf16.gmra.mxu0 %vm73_vm0, %v1429_v43 }
  0x3c   :  { %1339 = vmatmul.msk.bf16.gmra.mxu1 %vm73_vm0, %v1429_v43 }
  0x88   :  { %v1736_v44 = vpop.f32.mrf.mxu0 }
  0x89   :  { %v1738_v45 = vpop.f32.mrf.mxu1 }
  0x8a   :  { %v144_v60 = vpack.c.bf16 %v1738_v45, %v1736_v44 }
  0x90   :  { %v97_v46 = vpop.f32.mrf.mxu0 }
  0x91   :  { %v126_v47 = vpop.f32.mrf.mxu1 }
  0x92   :  { %v145_v48 = vpack.c.bf16 %v126_v47, %v97_v46 }
  0x98   :  { %v100_v50 = vpop.f32.mrf.mxu0 }
  0x99   :  { %v129_v51 = vpop.f32.mrf.mxu1  ;;  %v1743_v56 = vpop.f32.mrf.mxu3 }
  0x9a   :  { %v146_v52 = vpack.c.bf16 %v129_v51, %v100_v50 }
  0x9b   :  { %v1746_v61 = vpop.f32.mrf.mxu2 }
  0xa0   :  { %v102_v55 = vpop.f32.mrf.mxu0 }
  0xa1   :  { %v131_v57 = vpop.f32.mrf.mxu1  ;;  %v291_v0 = vpop.f32.mrf.mxu3 }
  0xa2   :  { %v147_v58 = vpack.c.bf16 %v131_v57, %v102_v55 }
  0xa3   :  { %v278_v8 = vpop.f32.mrf.mxu2 }
  0xa8   :  { %v105_v62 = vpop.f32.mrf.mxu0 }
  0xa9   :  { %v134_v1 = vpop.f32.mrf.mxu1 }
  0xaa   :  { %v148_v3 = vpack.c.bf16 %v134_v1, %v105_v62 }
  0xac   :  { %v676_v6 = vsel %vm1751_vm4, %v147_v58, %v148_v3  ;;  %v812_v7 = vsel %vm1751_vm4, %v148_v3, %v147_v58 }
  0xad   :  { %v677_v9 = vunpack.c.l.bf16 %v676_v6  ;;  %v678_v10 = vunpack.c.h.bf16 %v676_v6  ;;  %v813_v11 = vunpack.c.l.bf16 %v812_v7  ;;  %v814_v12 = vunpack.c.h.bf16 %v812_v7 }
  0xaf   :  { %v1759_v13 = vadd.f32 %v677_v9, %v174_v5  ;;  %v1761_v14 = vadd.f32 %v678_v10, %v175_v4  ;;  %v1763_v16 = vadd.f32 %v813_v11, %v174_v5  ;;  %v1765_v17 = vadd.f32 %v814_v12, %v175_v4 }
  0xb0   :  { %v107_v18 = vpop.f32.mrf.mxu0 }
  0xb1   :  { %v136_v20 = vpop.f32.mrf.mxu1 }
  0xb2   :  { %v149_v21 = vpack.c.bf16 %v136_v20, %v107_v18  ;;  %v1538_v18 = vmov 0  }
  0xb3   :  { %1452 = vset.pattern.permute.xlu1 %v1538_v18  ;;  %1453 = vset.pattern.permute.xlu2 %v1538_v18 }
  0xb4   :  { %v538_v22 = vsel %vm1751_vm4, %v146_v52, %v149_v21  ;;  %v934_v25 = vsel %vm1751_vm4, %v149_v21, %v146_v52  ;;  %350 = vperm.xlu1 %1452, %v1806_v2   ;;  %1454 = vset.pattern.permute.xlu0 %v1538_v18 }
  0xb5   :  { %v539_v26 = vunpack.c.l.bf16 %v538_v22  ;;  %v540_v27 = vunpack.c.h.bf16 %v538_v22  ;;  %v935_v28 = vunpack.c.l.bf16 %v934_v25  ;;  %v936_v31 = vunpack.c.h.bf16 %v934_v25 }
  0xb7   :  { %v1771_v32 = vadd.f32 %v539_v26, %v174_v5  ;;  %v1773_v33 = vadd.f32 %v540_v27, %v175_v4  ;;  %v1775_v35 = vadd.f32 %v935_v28, %v174_v5  ;;  %v1777_v37 = vadd.f32 %v936_v31, %v175_v4 }
  0xb8   :  { %v110_v38 = vpop.f32.mrf.mxu0 }
  0xb9   :  { %v139_v39 = vpop.f32.mrf.mxu1 }
  0xba   :  { %v150_v42 = vpack.c.bf16 %v139_v39, %v110_v38 }
  0xbc   :  { %v400_v43 = vsel %vm1751_vm4, %v145_v48, %v150_v42  ;;  %v1056_v46 = vsel %vm1751_vm4, %v150_v42, %v145_v48 }
  0xbd   :  { %v401_v47 = vunpack.c.l.bf16 %v400_v43  ;;  %v402_v49 = vunpack.c.h.bf16 %v400_v43  ;;  %v1057_v50 = vunpack.c.l.bf16 %v1056_v46  ;;  %v1058_v51 = vunpack.c.h.bf16 %v1056_v46 }
  0xbf   :  { %v1783_v52 = vadd.f32 %v401_v47, %v174_v5  ;;  %v1785_v54 = vadd.f32 %v402_v49, %v175_v4  ;;  %v1787_v55 = vadd.f32 %v1057_v50, %v174_v5  ;;  %v1789_v57 = vadd.f32 %v1058_v51, %v175_v4 }
  0xc0   :  { %v112_v58 = vpop.f32.mrf.mxu0 }
  0xc1   :  { %v141_v59 = vpop.f32.mrf.mxu1 }
  0xc2   :  { %v151_v62 = vpack.c.bf16 %v141_v59, %v112_v58 }
  0xc4   :  { %v218_v48 = vsel %vm1751_vm4, %v144_v60, %v151_v62  ;;  %v1178_v63 = vsel %vm1751_vm4, %v151_v62, %v144_v60 }
  0xc5   :  { %v220_v0 = vunpack.c.h.bf16 %v218_v48  ;;  %v219_v1 = vunpack.c.l.bf16 %v218_v48  ;;  %v1179_v3 = vunpack.c.l.bf16 %v1178_v63  ;;  %v1180_v6 = vunpack.c.h.bf16 %v1178_v63 }
  0xc7   :  { %v222_v7 = vadd.f32 %v220_v0, %v175_v4  ;;  %v221_v8 = vadd.f32 %v219_v1, %v174_v5  ;;  %v1797_v9 = vadd.f32 %v1179_v3, %v174_v5  ;;  %v1799_v10 = vadd.f32 %v1180_v6, %v175_v4  ;;  %v337_v0 = vpop.permute.xlu0 %336 }
  0xc9   :  { %v294_v11 = vadd.f32 %v1743_v56, %v222_v7  ;;  %v293_v44 = vadd.f32 %v1746_v61, %v221_v8 }
  0xcb   :  { %v1375_v45 = vmul.f32 -1.442695, %v294_v11  ;;  %v1374_v12 = vmul.f32 -1.442695, %v293_v44  ;;  %v1539_v44 = vmov 7  }
  0xcd   :  { %1455 = vpow2.f32 %v1375_v45  ;;  %v348_v45 = vsel %vm207_vm13, 0, %v1539_v44 }
  0xce   :  { %1457 = vpow2.f32 %v1374_v12 }
  0xd3   :  { %v1456_v56 = vpop.eup %1455 }
  0xd4   :  { %v1458_v61 = vpop.eup %1457  ;;  %v302_v4 = vadd.f32 1.0, %v1456_v56 }
  0xd5   :  { %v301_v5 = vadd.f32 1.0, %v1458_v61 }
  0xd6   :  { %1459 = vrcp.f32 %v302_v4  ;;  %v329_v28 = vand.u32 2147483648, %v302_v4  ;;  %v327_v38 = vand.u32 2147483647, %v302_v4  ;;  %vm323_vm7 = vweird.f32 %v302_v4 }
  0xd7   :  { %1461 = vrcp.f32 %v301_v5  ;;  %v314_v46 = vand.u32 2147483648, %v301_v5  ;;  %vm308_vm9 = vweird.f32 %v301_v5  ;;  %v312_v49 = vand.u32 2147483647, %v301_v5 }
  0xd8   :  { %v330_v47 = vor.u32 1.1754944e-38, %v329_v28  ;;  %vm328_vm10 = vcmp.eq.f32.partialorder %v327_v38, 8.507059e+37 }
  0xd9   :  { %v315_v60 = vor.u32 1.1754944e-38, %v314_v46  ;;  %vm313_vm12 = vcmp.eq.f32.partialorder %v312_v49, 8.507059e+37 }
  0xdc   :  { %v1460_v20 = vpop.eup %1459 }
  0xdd   :  { %v1462_v21 = vpop.eup %1461  ;;  %v319_v22 = vmul.f32 %v1460_v20, %v302_v4  ;;  %vm324_vm5 = vweird.f32 %v1460_v20 }
  0xde   :  { %v304_v25 = vmul.f32 %v1462_v21, %v301_v5  ;;  %vm309_vm6 = vweird.f32 %v1462_v21  ;;  %vm325_vm8 = vmor %vm323_vm7, %vm324_vm5 }
  0xdf   :  { %v320_v26 = vsub.f32 1.0, %v319_v22  ;;  %vm310_vm11 = vmor %vm308_vm9, %vm309_vm6 }
  0xe0   :  { %v305_v27 = vsub.f32 1.0, %v304_v25 }
  0xe1   :  { %v321_v31 = vmul.f32 %v1460_v20, %v320_v26 }
  0xe2   :  { %v306_v39 = vmul.f32 %v1462_v21, %v305_v27 }
  0xe3   :  { %v322_v42 = vadd.f32 %v1460_v20, %v321_v31 }
  0xe4   :  { %v307_v43 = vadd.f32 %v1462_v21, %v306_v39 }
  0xe5   :  { %v326_v50 = vsel %vm325_vm8, %v1460_v20, %v322_v42 }
  0xe6   :  { %v331_v51 = vsel %vm328_vm10, %v330_v47, %v326_v50  ;;  %v311_v58 = vsel %vm310_vm11, %v1462_v21, %v307_v43 }
  0xe7   :  { %v333_v59 = vmul.f32 2.0, %v331_v51  ;;  %v316_v48 = vsel %vm313_vm12, %v315_v60, %v311_v58 }
  0xe8   :  { %v339_v1 = vmul.f32 %v337_v0, %v316_v48 }
  0xe9   :  { %v1376_v62 = vadd.f32 -1.0, %v333_v59 }
  0xeb   :  { %v340_v63 = vmul.f32 %v1376_v62, %v316_v48 }
  0xed   :  { %342 = vrot.lane.b32.xlu0 %v340_v63, %s1537_s18 }
 0x126   :  { %v1819_v11 = vpop.permute.xlu1 %350 }
 0x127   :  { %vm352_vm14 = vcmp.lt.s32.totalorder %v348_v45, %v1819_v11 }
 0x15f   :  { %v343_v3 = vpop.permute.xlu0 %342 }
 0x160   :  { %v345_v6 = vadd.f32 %v343_v3, %v339_v1 }
 0x162   :  { %1463 = vtanh.f32 %v345_v6  ;;  %360 = vrot.lane.b32.xlu2 %v345_v6, %s1537_s18 }
 0x168   :  { %v1464_v7 = vpop.eup %1463 }
 0x169   :  { %v1814_v8 = vmul.f32 %v1464_v7, %v331_v51 }
 0x16b   :  { %354 = vrot.lane.b32.xlu1 %v1814_v8, %s1537_s18 }
 0x1bc   :  { %v361_v12 = vpop.permute.xlu2 %360 }
 0x1bd   :  { %v363_v56 = vsel %vm352_vm14, %v361_v12, %v1695_v41 }
 0x1be   :  { %364 = vst.msk [vmem:[#allocation4] sm:$0xff] %vm160_vm1, %v363_v56 }
 0x1c5   :  { %v1826_v61 = vld [vmem:[#allocation4] sm:$0xff] }
 0x1c6   :  { %478 = vrot.lane.b32.xlu2 %v1826_v61, %s1537_s18 }
 0x1dd   :  { %v355_v4 = vpop.permute.xlu1 %354 }
 0x1de   :  { %v357_v5 = vsel %vm352_vm14, %v355_v4, %v1679_v36 }
 0x1df   :  { %358 = vst.msk [vmem:[#allocation3] sm:$0xff] %vm160_vm1, %v357_v5 }
 0x1e6   :  { %v1832_v20 = vld [vmem:[#allocation3] sm:$0xff] }
 0x1e7   :  { %v405_v21 = vpack.c.bf16 %v1832_v20, %v1832_v20 }
 0x1e9   :  { %1378 = vmatmul.msk.bf16.vlgmr.msrb.gmra.mxu2 %vm160_vm1, %v405_v21  ;;  %1379 = vmatmul.msk.bf16.vlgmr.msrb.gmra.mxu3 %vm160_vm1, %v405_v21 }
 0x1ea   :  { %702 = vmatpush.bf16.msrb.mxu3 %v1611_v15  ;;  %689 = vmatpush.bf16.msrb.mxu2 %v1622_v19 }
 0x1ee   :  { %703 = vmatpush.bf16.msrb.mxu3 %v1634_v23  ;;  %690 = vmatpush.bf16.msrb.mxu2 %v1638_v24 }
 0x1f2   :  { %704 = vmatpush.bf16.msrb.mxu3 %v1654_v29  ;;  %691 = vmatpush.bf16.msrb.mxu2 %v1658_v30 }
 0x1f6   :  { %705 = vmatpush.bf16.msrb.mxu3 %v1670_v34  ;;  %692 = vmatpush.bf16.msrb.mxu2 %v1693_v40 }
 0x220   :  { %v479_v5 = vpop.permute.xlu2 %478 }
 0x26c   :  { %v418_v36 = vpop.f32.mrf.mxu2  ;;  %v431_v41 = vpop.f32.mrf.mxu3 }
 0x26d   :  { %v435_v22 = vadd.f32 %v418_v36, %v1783_v52  ;;  %v436_v25 = vadd.f32 %v431_v41, %v1785_v54 }
 0x26f   :  { %v1380_v26 = vmul.f32 -1.442695, %v435_v22  ;;  %v1381_v27 = vmul.f32 -1.442695, %v436_v25 }
 0x271   :  { %1465 = vpow2.f32 %v1380_v26  ;;  %v1540_v26 = vmov 6  }
 0x272   :  { %1467 = vpow2.f32 %v1381_v27  ;;  %v490_v27 = vsel %vm207_vm13, 1, %v1540_v26 }
 0x273   :  { %vm491_vm8 = vcmp.lt.s32.totalorder %v490_v27, %v1819_v11 }
 0x274   :  { %v420_v28 = vpop.f32.mrf.mxu2  ;;  %v433_v31 = vpop.f32.mrf.mxu3 }
 0x277   :  { %v1466_v38 = vpop.eup %1465 }
 0x278   :  { %v1468_v39 = vpop.eup %1467  ;;  %v443_v42 = vadd.f32 1.0, %v1466_v38 }
 0x279   :  { %v444_v43 = vadd.f32 1.0, %v1468_v39 }
 0x27a   :  { %1469 = vrcp.f32 %v443_v42  ;;  %v456_v63 = vand.u32 2147483648, %v443_v42  ;;  %vm450_vm4 = vweird.f32 %v443_v42  ;;  %v454_v1 = vand.u32 2147483647, %v443_v42 }
 0x27b   :  { %1471 = vrcp.f32 %v444_v43  ;;  %v471_v54 = vand.u32 2147483648, %v444_v43  ;;  %v469_v60 = vand.u32 2147483647, %v444_v43  ;;  %vm465_vm2 = vweird.f32 %v444_v43 }
 0x27c   :  { %v457_v45 = vor.u32 1.1754944e-38, %v456_v63  ;;  %vm455_vm7 = vcmp.eq.f32.partialorder %v454_v1, 8.507059e+37 }
 0x27d   :  { %v472_v0 = vor.u32 1.1754944e-38, %v471_v54  ;;  %vm470_vm5 = vcmp.eq.f32.partialorder %v469_v60, 8.507059e+37 }
 0x280   :  { %v1470_v46 = vpop.eup %1469 }
 0x281   :  { %v1472_v47 = vpop.eup %1471  ;;  %v446_v49 = vmul.f32 %v1470_v46, %v443_v42  ;;  %vm451_vm0 = vweird.f32 %v1470_v46 }
 0x282   :  { %v461_v50 = vmul.f32 %v1472_v47, %v444_v43  ;;  %vm466_vm15 = vweird.f32 %v1472_v47  ;;  %vm452_vm6 = vmor %vm450_vm4, %vm451_vm0 }
 0x283   :  { %v447_v51 = vsub.f32 1.0, %v446_v49  ;;  %vm467_vm3 = vmor %vm465_vm2, %vm466_vm15 }
 0x284   :  { %v462_v52 = vsub.f32 1.0, %v461_v50 }
 0x285   :  { %v448_v58 = vmul.f32 %v1470_v46, %v447_v51 }
 0x286   :  { %v463_v59 = vmul.f32 %v1472_v47, %v462_v52 }
 0x287   :  { %v449_v62 = vadd.f32 %v1470_v46, %v448_v58 }
 0x288   :  { %v464_v48 = vadd.f32 %v1472_v47, %v463_v59 }
 0x289   :  { %v453_v7 = vsel %vm452_vm6, %v1470_v46, %v449_v62 }
 0x28a   :  { %v468_v3 = vsel %vm467_vm3, %v1472_v47, %v464_v48  ;;  %v458_v56 = vsel %vm455_vm7, %v457_v45, %v453_v7 }
 0x28b   :  { %v473_v6 = vsel %vm470_vm5, %v472_v0, %v468_v3  ;;  %v481_v21 = vmul.f32 %v479_v5, %v458_v56 }
 0x28c   :  { %v475_v44 = vmul.f32 2.0, %v473_v6 }
 0x28e   :  { %v1382_v12 = vadd.f32 -1.0, %v475_v44 }
 0x290   :  { %v482_v4 = vmul.f32 %v1382_v12, %v458_v56 }
 0x292   :  { %484 = vrot.lane.b32.xlu0 %v482_v4, %s1537_s18 }
 0x304   :  { %v485_v36 = vpop.permute.xlu0 %484 }
 0x305   :  { %v487_v41 = vadd.f32 %v485_v36, %v481_v21 }
 0x307   :  { %1473 = vtanh.f32 %v487_v41  ;;  %499 = vrot.lane.b32.xlu2 %v487_v41, %s1537_s18 }
 0x30d   :  { %v1474_v22 = vpop.eup %1473 }
 0x30e   :  { %v1850_v25 = vmul.f32 %v1474_v22, %v473_v6 }
 0x310   :  { %493 = vrot.lane.b32.xlu1 %v1850_v25, %s1537_s18 }
 0x361   :  { %v500_v28 = vpop.permute.xlu2 %499 }
 0x362   :  { %v502_v31 = vsel %vm491_vm8, %v500_v28, %v1826_v61 }
 0x363   :  { %503 = vst.msk [vmem:[#allocation4] sm:$0xff] %vm160_vm1, %v502_v31 }
 0x36a   :  { %v1859_v38 = vld [vmem:[#allocation4] sm:$0xff] }
 0x36b   :  { %616 = vrot.lane.b32.xlu0 %v1859_v38, %s1537_s18 }
 0x382   :  { %v494_v39 = vpop.permute.xlu1 %493 }
 0x383   :  { %v496_v42 = vsel %vm491_vm8, %v494_v39, %v1832_v20 }
 0x384   :  { %497 = vst.msk [vmem:[#allocation3] sm:$0xff] %vm160_vm1, %v496_v42 }
 0x38b   :  { %v1865_v43 = vld [vmem:[#allocation3] sm:$0xff] }
 0x38c   :  { %v543_v46 = vpack.c.bf16 %v1865_v43, %v1865_v43 }
 0x38e   :  { %1385 = vmatmul.msk.bf16.vlgmr.msra.gmra.mxu2 %vm160_vm1, %v543_v46  ;;  %1386 = vmatmul.msk.bf16.vlgmr.msra.gmra.mxu3 %vm160_vm1, %v543_v46 }
 0x38f   :  { %960 = vmatpush.bf16.msra.mxu3 %v1611_v15  ;;  %947 = vmatpush.bf16.msra.mxu2 %v1622_v19 }
 0x393   :  { %961 = vmatpush.bf16.msra.mxu3 %v1634_v23  ;;  %948 = vmatpush.bf16.msra.mxu2 %v1638_v24 }
 0x397   :  { %962 = vmatpush.bf16.msra.mxu3 %v1654_v29  ;;  %949 = vmatpush.bf16.msra.mxu2 %v1658_v30 }
 0x39b   :  { %963 = vmatpush.bf16.msra.mxu3 %v1670_v34  ;;  %950 = vmatpush.bf16.msra.mxu2 %v1693_v40 }
 0x3dd   :  { %v617_v39 = vpop.permute.xlu0 %616 }
 0x411   :  { %v556_v61 = vpop.f32.mrf.mxu2  ;;  %v569_v20 = vpop.f32.mrf.mxu3 }
 0x412   :  { %v573_v47 = vadd.f32 %v556_v61, %v1771_v32  ;;  %v574_v49 = vadd.f32 %v569_v20, %v1773_v33 }
 0x414   :  { %v1387_v50 = vmul.f32 -1.442695, %v573_v47  ;;  %v1388_v51 = vmul.f32 -1.442695, %v574_v49  ;;  %v1541_v49 = vmov 5  }
 0x416   :  { %1475 = vpow2.f32 %v1387_v50  ;;  %v628_v50 = vsel %vm207_vm13, 2, %v1541_v49 }
 0x417   :  { %1477 = vpow2.f32 %v1388_v51  ;;  %vm629_vm3 = vcmp.lt.s32.totalorder %v628_v50, %v1819_v11  ;;  %v1542_v50 = vmov 4  }
 0x419   :  { %v558_v52 = vpop.f32.mrf.mxu2  ;;  %v571_v58 = vpop.f32.mrf.mxu3 }
 0x41c   :  { %v1476_v54 = vpop.eup %1475 }
 0x41d   :  { %v1478_v59 = vpop.eup %1477  ;;  %v581_v60 = vadd.f32 1.0, %v1476_v54 }
 0x41e   :  { %v582_v62 = vadd.f32 1.0, %v1478_v59 }
 0x41f   :  { %1479 = vrcp.f32 %v581_v60  ;;  %v594_v56 = vand.u32 2147483648, %v581_v60  ;;  %vm588_vm14 = vweird.f32 %v581_v60  ;;  %v592_v5 = vand.u32 2147483647, %v581_v60 }
 0x420   :  { %1481 = vrcp.f32 %v582_v62  ;;  %v609_v33 = vand.u32 2147483648, %v582_v62  ;;  %v607_v44 = vand.u32 2147483647, %v582_v62  ;;  %vm603_vm11 = vweird.f32 %v582_v62 }
 0x421   :  { %v595_v26 = vor.u32 1.1754944e-38, %v594_v56  ;;  %vm593_vm2 = vcmp.eq.f32.partialorder %v592_v5, 8.507059e+37 }
 0x422   :  { %v610_v4 = vor.u32 1.1754944e-38, %v609_v33  ;;  %vm608_vm15 = vcmp.eq.f32.partialorder %v607_v44, 8.507059e+37 }
 0x425   :  { %v1480_v48 = vpop.eup %1479 }
 0x426   :  { %v1482_v63 = vpop.eup %1481  ;;  %v584_v0 = vmul.f32 %v1480_v48, %v581_v60  ;;  %vm589_vm10 = vweird.f32 %v1480_v48 }
 0x427   :  { %v599_v1 = vmul.f32 %v1482_v63, %v582_v62  ;;  %vm604_vm9 = vweird.f32 %v1482_v63  ;;  %vm590_vm0 = vmor %vm588_vm14, %vm589_vm10 }
 0x428   :  { %v585_v3 = vsub.f32 1.0, %v584_v0  ;;  %vm605_vm12 = vmor %vm603_vm11, %vm604_vm9 }
 0x429   :  { %v600_v32 = vsub.f32 1.0, %v599_v1 }
 0x42a   :  { %v586_v6 = vmul.f32 %v1480_v48, %v585_v3 }
 0x42b   :  { %v601_v7 = vmul.f32 %v1482_v63, %v600_v32 }
 0x42c   :  { %v587_v45 = vadd.f32 %v1480_v48, %v586_v6 }
 0x42d   :  { %v602_v12 = vadd.f32 %v1482_v63, %v601_v7 }
 0x42e   :  { %v591_v41 = vsel %vm590_vm0, %v1480_v48, %v587_v45 }
 0x42f   :  { %v606_v21 = vsel %vm605_vm12, %v1482_v63, %v602_v12  ;;  %v596_v28 = vsel %vm593_vm2, %v595_v26, %v591_v41 }
 0x430   :  { %v611_v36 = vsel %vm608_vm15, %v610_v4, %v606_v21  ;;  %v619_v42 = vmul.f32 %v617_v39, %v596_v28 }
 0x431   :  { %v613_v22 = vmul.f32 2.0, %v611_v36 }
 0x433   :  { %v1389_v27 = vadd.f32 -1.0, %v613_v22 }
 0x435   :  { %v620_v31 = vmul.f32 %v1389_v27, %v596_v28 }
 0x437   :  { %622 = vrot.lane.b32.xlu1 %v620_v31, %s1537_s18 }
 0x4a9   :  { %v623_v46 = vpop.permute.xlu1 %622 }
 0x4aa   :  { %v625_v61 = vadd.f32 %v623_v46, %v619_v42 }
 0x4ac   :  { %1483 = vtanh.f32 %v625_v61  ;;  %637 = vrot.lane.b32.xlu0 %v625_v61, %s1537_s18 }
 0x4b2   :  { %v1484_v20 = vpop.eup %1483 }
 0x4b3   :  { %v1883_v47 = vmul.f32 %v1484_v20, %v611_v36 }
 0x4b5   :  { %631 = vrot.lane.b32.xlu2 %v1883_v47, %s1537_s18 }
 0x50f   :  { %v632_v51 = vpop.permute.xlu2 %631 }
 0x510   :  { %v634_v52 = vsel %vm629_vm3, %v632_v51, %v1865_v43  ;;  %v766_v51 = vsel %vm207_vm13, 3, %v1542_v50  ;;  %v1543_v50 = vmov 3  }
 0x511   :  { %635 = vst.msk [vmem:[#allocation3] sm:$0xff] %vm160_vm1, %v634_v52  ;;  %vm767_vm12 = vcmp.lt.s32.totalorder %v766_v51, %v1819_v11  ;;  %v902_v51 = vsel %vm207_vm13, 4, %v1543_v50 }
 0x518   :  { %v1892_v58 = vld [vmem:[#allocation3] sm:$0xff] }
 0x519   :  { %v681_v54 = vpack.c.bf16 %v1892_v58, %v1892_v58 }
 0x51b   :  { %1392 = vmatmul.msk.bf16.vlgmr.msrb.gmra.mxu2 %vm160_vm1, %v681_v54  ;;  %1393 = vmatmul.msk.bf16.vlgmr.msrb.gmra.mxu3 %vm160_vm1, %v681_v54 }
 0x51c   :  { %1204 = vmatpush.bf16.msrb.mxu3 %v1611_v15  ;;  %1191 = vmatpush.bf16.msrb.mxu2 %v1622_v19 }
 0x51e   :  { %v638_v59 = vpop.permute.xlu0 %637 }
 0x51f   :  { %v640_v60 = vsel %vm629_vm3, %v638_v59, %v1859_v38 }
 0x520   :  { %641 = vst.msk [vmem:[#allocation4] sm:$0xff] %vm160_vm1, %v640_v60  ;;  %1205 = vmatpush.bf16.msrb.mxu3 %v1634_v23  ;;  %1192 = vmatpush.bf16.msrb.mxu2 %v1638_v24 }
 0x524   :  { %1206 = vmatpush.bf16.msrb.mxu3 %v1654_v29  ;;  %1193 = vmatpush.bf16.msrb.mxu2 %v1658_v30 }
 0x527   :  { %v1906_v43 = vld [vmem:[#allocation4] sm:$0xff] }
 0x528   :  { %754 = vrot.lane.b32.xlu1 %v1906_v43, %s1537_s18  ;;  %1207 = vmatpush.bf16.msrb.mxu3 %v1670_v34 }
 0x529   :  { %1194 = vmatpush.bf16.msrb.mxu2 %v1693_v40 }
 0x59a   :  { %v755_v39 = vpop.permute.xlu1 %754 }
 0x59e   :  { %v694_v15 = vpop.f32.mrf.mxu2  ;;  %v707_v19 = vpop.f32.mrf.mxu3 }
 0x59f   :  { %v711_v38 = vadd.f32 %v694_v15, %v1759_v13  ;;  %v712_v23 = vadd.f32 %v707_v19, %v1761_v14 }
 0x5a1   :  { %v1394_v24 = vmul.f32 -1.442695, %v711_v38  ;;  %v1395_v62 = vmul.f32 -1.442695, %v712_v23 }
 0x5a3   :  { %1485 = vpow2.f32 %v1394_v24 }
 0x5a4   :  { %1487 = vpow2.f32 %v1395_v62 }
 0x5a6   :  { %v696_v29 = vpop.f32.mrf.mxu2  ;;  %v709_v30 = vpop.f32.mrf.mxu3 }
 0x5a9   :  { %v1486_v48 = vpop.eup %1485 }
 0x5aa   :  { %v1488_v63 = vpop.eup %1487  ;;  %v719_v0 = vadd.f32 1.0, %v1486_v48 }
 0x5ab   :  { %v720_v1 = vadd.f32 1.0, %v1488_v63 }
 0x5ac   :  { %1489 = vrcp.f32 %v719_v0  ;;  %v732_v56 = vand.u32 2147483648, %v719_v0  ;;  %vm726_vm8 = vweird.f32 %v719_v0  ;;  %v730_v5 = vand.u32 2147483647, %v719_v0 }
 0x5ad   :  { %1491 = vrcp.f32 %v720_v1  ;;  %v747_v14 = vand.u32 2147483648, %v720_v1  ;;  %v745_v44 = vand.u32 2147483647, %v720_v1  ;;  %vm741_vm6 = vweird.f32 %v720_v1 }
 0x5ae   :  { %v733_v26 = vor.u32 1.1754944e-38, %v732_v56  ;;  %vm731_vm11 = vcmp.eq.f32.partialorder %v730_v5, 8.507059e+37 }
 0x5af   :  { %v748_v4 = vor.u32 1.1754944e-38, %v747_v14  ;;  %vm746_vm9 = vcmp.eq.f32.partialorder %v745_v44, 8.507059e+37 }
 0x5b2   :  { %v1490_v34 = vpop.eup %1489 }
 0x5b3   :  { %v1492_v40 = vpop.eup %1491  ;;  %v722_v3 = vmul.f32 %v1490_v34, %v719_v0  ;;  %vm727_vm5 = vweird.f32 %v1490_v34 }
 0x5b4   :  { %v737_v32 = vmul.f32 %v1492_v40, %v720_v1  ;;  %vm742_vm4 = vweird.f32 %v1492_v40  ;;  %vm728_vm10 = vmor %vm726_vm8, %vm727_vm5 }
 0x5b5   :  { %v723_v6 = vsub.f32 1.0, %v722_v3  ;;  %vm743_vm7 = vmor %vm741_vm6, %vm742_vm4 }
 0x5b6   :  { %v738_v13 = vsub.f32 1.0, %v737_v32 }
 0x5b7   :  { %v724_v33 = vmul.f32 %v1490_v34, %v723_v6 }
 0x5b8   :  { %v739_v7 = vmul.f32 %v1492_v40, %v738_v13 }
 0x5b9   :  { %v725_v45 = vadd.f32 %v1490_v34, %v724_v33 }
 0x5ba   :  { %v740_v12 = vadd.f32 %v1492_v40, %v739_v7 }
 0x5bb   :  { %v729_v41 = vsel %vm728_vm10, %v1490_v34, %v725_v45 }
 0x5bc   :  { %v744_v21 = vsel %vm743_vm7, %v1492_v40, %v740_v12  ;;  %v734_v28 = vsel %vm731_vm11, %v733_v26, %v729_v41  ;;  %vm903_vm7 = vcmp.lt.s32.totalorder %v902_v51, %v1819_v11 }
 0x5bd   :  { %v749_v36 = vsel %vm746_vm9, %v748_v4, %v744_v21  ;;  %v757_v42 = vmul.f32 %v755_v39, %v734_v28 }
 0x5be   :  { %v751_v22 = vmul.f32 2.0, %v749_v36 }
 0x5c0   :  { %v1396_v27 = vadd.f32 -1.0, %v751_v22 }
 0x5c2   :  { %v758_v31 = vmul.f32 %v1396_v27, %v734_v28 }
 0x5c4   :  { %760 = vrot.lane.b32.xlu2 %v758_v31, %s1537_s18 }
 0x61e   :  { %v761_v46 = vpop.permute.xlu2 %760 }
 0x61f   :  { %v763_v61 = vadd.f32 %v761_v46, %v757_v42 }
 0x621   :  { %1493 = vtanh.f32 %v763_v61  ;;  %775 = vrot.lane.b32.xlu1 %v763_v61, %s1537_s18 }
 0x627   :  { %v1494_v20 = vpop.eup %1493 }
 0x628   :  { %v1916_v49 = vmul.f32 %v1494_v20, %v749_v36 }
 0x62a   :  { %769 = vrot.lane.b32.xlu0 %v1916_v49, %s1537_s18 }
 0x693   :  { %v776_v52 = vpop.permute.xlu1 %775 }
 0x694   :  { %v778_v54 = vsel %vm767_vm12, %v776_v52, %v1906_v43 }
 0x695   :  { %779 = vst.msk [vmem:[#allocation4] sm:$0xff] %vm160_vm1, %v778_v54 }
 0x69c   :  { %v770_v59 = vpop.permute.xlu0 %769  ;;  %v1925_v60 = vld [vmem:[#allocation4] sm:$0xff] }
 0x69d   :  { %v772_v15 = vsel %vm767_vm12, %v770_v59, %v1892_v58  ;;  %890 = vrot.lane.b32.xlu2 %v1925_v60, %s1537_s18 }
 0x69e   :  { %773 = vst.msk [vmem:[#allocation3] sm:$0xff] %vm160_vm1, %v772_v15 }
 0x6a5   :  { %v1931_v19 = vld [vmem:[#allocation3] sm:$0xff] }
 0x6a6   :  { %v817_v38 = vpack.c.bf16 %v1931_v19, %v1931_v19 }
 0x6a8   :  { %1399 = vmatmul.msk.bf16.vlgmr.msrb.gmra.mxu0 %vm160_vm1, %v817_v38  ;;  %1400 = vmatmul.msk.bf16.vlgmr.msrb.gmra.mxu1 %vm160_vm1, %v817_v38 }
 0x6f7   :  { %v891_v31 = vpop.permute.xlu2 %890 }
 0x725   :  { %v830_v43 = vpop.f32.mrf.mxu0  ;;  %v843_v23 = vpop.f32.mrf.mxu1 }
 0x726   :  { %v847_v24 = vadd.f32 %v830_v43, %v1763_v16  ;;  %v848_v58 = vadd.f32 %v843_v23, %v1765_v17 }
 0x728   :  { %v1401_v62 = vmul.f32 -1.442695, %v847_v24  ;;  %v1402_v29 = vmul.f32 -1.442695, %v848_v58 }
 0x72a   :  { %1495 = vpow2.f32 %v1401_v62 }
 0x72b   :  { %1497 = vpow2.f32 %v1402_v29 }
 0x72d   :  { %v832_v30 = vpop.f32.mrf.mxu0  ;;  %v845_v48 = vpop.f32.mrf.mxu1 }
 0x730   :  { %v1496_v63 = vpop.eup %1495 }
 0x731   :  { %v1498_v0 = vpop.eup %1497  ;;  %v855_v1 = vadd.f32 1.0, %v1496_v63 }
 0x732   :  { %v856_v34 = vadd.f32 1.0, %v1498_v0 }
 0x733   :  { %1499 = vrcp.f32 %v855_v1  ;;  %v868_v12 = vand.u32 2147483648, %v855_v1  ;;  %vm862_vm3 = vweird.f32 %v855_v1  ;;  %v866_v4 = vand.u32 2147483647, %v855_v1 }
 0x734   :  { %1501 = vrcp.f32 %v856_v34  ;;  %v883_v17 = vand.u32 2147483648, %v856_v34  ;;  %v881_v7 = vand.u32 2147483647, %v856_v34  ;;  %vm877_vm0 = vweird.f32 %v856_v34 }
 0x735   :  { %v869_v22 = vor.u32 1.1754944e-38, %v868_v12  ;;  %vm867_vm6 = vcmp.eq.f32.partialorder %v866_v4, 8.507059e+37 }
 0x736   :  { %v884_v56 = vor.u32 1.1754944e-38, %v883_v17  ;;  %vm882_vm4 = vcmp.eq.f32.partialorder %v881_v7, 8.507059e+37 }
 0x739   :  { %v1500_v40 = vpop.eup %1499 }
 0x73a   :  { %v1502_v3 = vpop.eup %1501  ;;  %v858_v32 = vmul.f32 %v1500_v40, %v855_v1  ;;  %vm863_vm15 = vweird.f32 %v1500_v40 }
 0x73b   :  { %v873_v6 = vmul.f32 %v1502_v3, %v856_v34  ;;  %vm878_vm14 = vweird.f32 %v1502_v3  ;;  %vm864_vm5 = vmor %vm862_vm3, %vm863_vm15 }
 0x73c   :  { %v859_v13 = vsub.f32 1.0, %v858_v32  ;;  %vm879_vm2 = vmor %vm877_vm0, %vm878_vm14 }
 0x73d   :  { %v874_v16 = vsub.f32 1.0, %v873_v6 }
 0x73e   :  { %v860_v33 = vmul.f32 %v1500_v40, %v859_v13 }
 0x73f   :  { %v875_v14 = vmul.f32 %v1502_v3, %v874_v16 }
 0x740   :  { %v861_v44 = vadd.f32 %v1500_v40, %v860_v33 }
 0x741   :  { %v876_v45 = vadd.f32 %v1502_v3, %v875_v14 }
 0x742   :  { %v865_v36 = vsel %vm864_vm5, %v1500_v40, %v861_v44 }
 0x743   :  { %v880_v5 = vsel %vm879_vm2, %v1502_v3, %v876_v45  ;;  %v870_v27 = vsel %vm867_vm6, %v869_v22, %v865_v36 }
 0x744   :  { %v885_v21 = vsel %vm882_vm4, %v884_v56, %v880_v5  ;;  %v893_v39 = vmul.f32 %v891_v31, %v870_v27 }
 0x745   :  { %v887_v41 = vmul.f32 2.0, %v885_v21 }
 0x747   :  { %v1403_v26 = vadd.f32 -1.0, %v887_v41 }
 0x749   :  { %v894_v28 = vmul.f32 %v1403_v26, %v870_v27 }
 0x74b   :  { %896 = vrot.lane.b32.xlu0 %v894_v28, %s1537_s18 }
 0x7bd   :  { %v897_v42 = vpop.permute.xlu0 %896 }
 0x7be   :  { %v899_v46 = vadd.f32 %v897_v42, %v893_v39 }
 0x7c0   :  { %1503 = vtanh.f32 %v899_v46  ;;  %911 = vrot.lane.b32.xlu2 %v899_v46, %s1537_s18 }
 0x7c6   :  { %v1504_v61 = vpop.eup %1503 }
 0x7c7   :  { %v1941_v20 = vmul.f32 %v1504_v61, %v885_v21  ;;  %v1544_v61 = vmov 2  }
 0x7c8   :  { %v1024_v50 = vsel %vm207_vm13, 5, %v1544_v61 }
 0x7c9   :  { %905 = vrot.lane.b32.xlu1 %v1941_v20, %s1537_s18  ;;  %vm1025_vm2 = vcmp.lt.s32.totalorder %v1024_v50, %v1819_v11 }
 0x81a   :  { %v912_v52 = vpop.permute.xlu2 %911 }
 0x81b   :  { %v914_v54 = vsel %vm903_vm7, %v912_v52, %v1925_v60 }
 0x81c   :  { %915 = vst.msk [vmem:[#allocation4] sm:$0xff] %vm160_vm1, %v914_v54 }
 0x823   :  { %v1950_v59 = vld [vmem:[#allocation4] sm:$0xff] }
 0x824   :  { %1012 = vrot.lane.b32.xlu0 %v1950_v59, %s1537_s18 }
 0x83b   :  { %v906_v15 = vpop.permute.xlu1 %905 }
 0x83c   :  { %v908_v38 = vsel %vm903_vm7, %v906_v15, %v1931_v19 }
 0x83d   :  { %909 = vst.msk [vmem:[#allocation3] sm:$0xff] %vm160_vm1, %v908_v38 }
 0x844   :  { %v1956_v43 = vld [vmem:[#allocation3] sm:$0xff] }
 0x845   :  { %v939_v23 = vpack.c.bf16 %v1956_v43, %v1956_v43 }
 0x847   :  { %1406 = vmatmul.msk.bf16.vlgmr.msra.gmra.mxu2 %vm160_vm1, %v939_v23  ;;  %1407 = vmatmul.msk.bf16.vlgmr.msra.gmra.mxu3 %vm160_vm1, %v939_v23 }
 0x896   :  { %v1013_v27 = vpop.permute.xlu0 %1012 }
 0x8ca   :  { %v952_v60 = vpop.f32.mrf.mxu2  ;;  %v965_v24 = vpop.f32.mrf.mxu3 }
 0x8cb   :  { %v969_v58 = vadd.f32 %v952_v60, %v1775_v35  ;;  %v970_v62 = vadd.f32 %v965_v24, %v1777_v37 }
 0x8cd   :  { %v1408_v29 = vmul.f32 -1.442695, %v969_v58  ;;  %v1409_v30 = vmul.f32 -1.442695, %v970_v62 }
 0x8cf   :  { %1505 = vpow2.f32 %v1408_v29 }
 0x8d0   :  { %1507 = vpow2.f32 %v1409_v30 }
 0x8d2   :  { %v954_v19 = vpop.f32.mrf.mxu2  ;;  %v967_v48 = vpop.f32.mrf.mxu3 }
 0x8d5   :  { %v1506_v63 = vpop.eup %1505 }
 0x8d6   :  { %v1508_v0 = vpop.eup %1507  ;;  %v977_v1 = vadd.f32 1.0, %v1506_v63 }
 0x8d7   :  { %v978_v34 = vadd.f32 1.0, %v1508_v0 }
 0x8d8   :  { %1509 = vrcp.f32 %v977_v1  ;;  %v990_v44 = vand.u32 2147483648, %v977_v1  ;;  %vm984_vm12 = vweird.f32 %v977_v1  ;;  %v988_v12 = vand.u32 2147483647, %v977_v1 }
 0x8d9   :  { %1511 = vrcp.f32 %v978_v34  ;;  %v1005_v37 = vand.u32 2147483648, %v978_v34  ;;  %v1003_v17 = vand.u32 2147483647, %v978_v34  ;;  %vm999_vm10 = vweird.f32 %v978_v34 }
 0x8da   :  { %v991_v36 = vor.u32 1.1754944e-38, %v990_v44  ;;  %vm989_vm0 = vcmp.eq.f32.partialorder %v988_v12, 8.507059e+37 }
 0x8db   :  { %v1006_v45 = vor.u32 1.1754944e-38, %v1005_v37  ;;  %vm1004_vm14 = vcmp.eq.f32.partialorder %v1003_v17, 8.507059e+37 }
 0x8de   :  { %v1510_v40 = vpop.eup %1509 }
 0x8df   :  { %v1512_v3 = vpop.eup %1511  ;;  %v980_v32 = vmul.f32 %v1510_v40, %v977_v1  ;;  %vm985_vm9 = vweird.f32 %v1510_v40 }
 0x8e0   :  { %v995_v6 = vmul.f32 %v1512_v3, %v978_v34  ;;  %vm1000_vm8 = vweird.f32 %v1512_v3  ;;  %vm986_vm15 = vmor %vm984_vm12, %vm985_vm9  ;;  %vm504_vm12 = vcmp.gt.s32.totalorder %v1806_v2, 1 }
 0x8e1   :  { %v981_v13 = vsub.f32 1.0, %v980_v32  ;;  %vm1001_vm11 = vmor %vm999_vm10, %vm1000_vm8 }
 0x8e2   :  { %v996_v35 = vsub.f32 1.0, %v995_v6 }
 0x8e3   :  { %v982_v16 = vmul.f32 %v1510_v40, %v981_v13 }
 0x8e4   :  { %v997_v33 = vmul.f32 %v1512_v3, %v996_v35 }
 0x8e5   :  { %v983_v14 = vadd.f32 %v1510_v40, %v982_v16 }
 0x8e6   :  { %v998_v7 = vadd.f32 %v1512_v3, %v997_v33 }
 0x8e7   :  { %v987_v5 = vsel %vm986_vm15, %v1510_v40, %v983_v14 }
 0x8e8   :  { %v1002_v56 = vsel %vm1001_vm11, %v1512_v3, %v998_v7  ;;  %v992_v22 = vsel %vm989_vm0, %v991_v36, %v987_v5  ;;  %vm365_vm11 = vcmp.gt.s32.totalorder %v1806_v2, 0 }
 0x8e9   :  { %v1007_v4 = vsel %vm1004_vm14, %v1006_v45, %v1002_v56  ;;  %v1015_v28 = vmul.f32 %v1013_v27, %v992_v22 }
 0x8ea   :  { %v1009_v21 = vmul.f32 2.0, %v1007_v4 }
 0x8ec   :  { %v1410_v41 = vadd.f32 -1.0, %v1009_v21 }
 0x8ee   :  { %v1016_v26 = vmul.f32 %v1410_v41, %v992_v22  ;;  %v367_v41 = vsel %vm365_vm11, 1, %v1538_v18  ;;  %v506_v22 = vsel %vm504_vm12, 1, %v1538_v18 }
 0x8f0   :  { %1018 = vrot.lane.b32.xlu1 %v1016_v26, %s1537_s18 }
 0x962   :  { %v1019_v31 = vpop.permute.xlu1 %1018 }
 0x963   :  { %v1021_v39 = vadd.f32 %v1019_v31, %v1015_v28 }
 0x965   :  { %1513 = vtanh.f32 %v1021_v39  ;;  %1033 = vrot.lane.b32.xlu0 %v1021_v39, %s1537_s18  ;;  %v1998_v39 = vld [vmem:[%s2179_s4] sm:$0xff] }
 0x966   :  { %vm366_vm14 = vcmp.gt.s32.totalorder %v1998_v39, 7 }
 0x96b   :  { %v1514_v42 = vpop.eup %1513 }
 0x96c   :  { %v1966_v46 = vmul.f32 %v1514_v42, %v1007_v4  ;;  %v380_v42 = vsel %vm366_vm14, 1, %v1538_v18 }
 0x96e   :  { %1027 = vrot.lane.b32.xlu2 %v1966_v46, %s1537_s18 }
 0x9c8   :  { %v1028_v51 = vpop.permute.xlu2 %1027 }
 0x9c9   :  { %v1030_v52 = vsel %vm1025_vm2, %v1028_v51, %v1956_v43 }
 0x9ca   :  { %1031 = vst.msk [vmem:[#allocation3] sm:$0xff] %vm160_vm1, %v1030_v52 }
 0x9d1   :  { %v1975_v54 = vld [vmem:[#allocation3] sm:$0xff] }
 0x9d2   :  { %v1061_v15 = vpack.c.bf16 %v1975_v54, %v1975_v54 }
 0x9d4   :  { %1413 = vmatmul.msk.bf16.vlgmr.msra.gmra.mxu0 %vm160_vm1, %v1061_v15  ;;  %1414 = vmatmul.msk.bf16.vlgmr.msra.gmra.mxu1 %vm160_vm1, %v1061_v15  ;;  %v1545_v15 = vmov 1  }
 0x9d7   :  { %v1034_v38 = vpop.permute.xlu0 %1033 }
 0x9d8   :  { %v1036_v23 = vsel %vm1025_vm2, %v1034_v38, %v1950_v59  ;;  %v1146_v38 = vsel %vm207_vm13, 6, %v1545_v15 }
 0x9d9   :  { %1037 = vst.msk [vmem:[#allocation4] sm:$0xff] %vm160_vm1, %v1036_v23  ;;  %vm1147_vm0 = vcmp.lt.s32.totalorder %v1146_v38, %v1819_v11 }
 0x9e0   :  { %v1983_v60 = vld [vmem:[#allocation4] sm:$0xff] }
 0x9e1   :  { %1134 = vrot.lane.b32.xlu1 %v1983_v60, %s1537_s18 }
 0xa51   :  { %v1074_v43 = vpop.f32.mrf.mxu0  ;;  %v1087_v24 = vpop.f32.mrf.mxu1 }
 0xa52   :  { %v1091_v58 = vadd.f32 %v1074_v43, %v1787_v55  ;;  %v1092_v62 = vadd.f32 %v1087_v24, %v1789_v57 }
 0xa53   :  { %v1135_v26 = vpop.permute.xlu1 %1134 }
 0xa54   :  { %v1415_v29 = vmul.f32 -1.442695, %v1091_v58  ;;  %v1416_v30 = vmul.f32 -1.442695, %v1092_v62 }
 0xa56   :  { %1515 = vpow2.f32 %v1415_v29 }
 0xa57   :  { %1517 = vpow2.f32 %v1416_v30 }
 0xa59   :  { %v1076_v19 = vpop.f32.mrf.mxu0  ;;  %v1089_v48 = vpop.f32.mrf.mxu1 }
 0xa5c   :  { %v1516_v59 = vpop.eup %1515 }
 0xa5d   :  { %v1518_v63 = vpop.eup %1517  ;;  %v1099_v0 = vadd.f32 1.0, %v1516_v59 }
 0xa5e   :  { %v1100_v1 = vadd.f32 1.0, %v1518_v63 }
 0xa5f   :  { %1519 = vrcp.f32 %v1099_v0  ;;  %v1112_v17 = vand.u32 2147483648, %v1099_v0  ;;  %vm1106_vm7 = vweird.f32 %v1099_v0  ;;  %v1110_v7 = vand.u32 2147483647, %v1099_v0 }
 0xa60   :  { %1521 = vrcp.f32 %v1100_v1  ;;  %v1127_v57 = vand.u32 2147483648, %v1100_v1  ;;  %v1125_v16 = vand.u32 2147483647, %v1100_v1  ;;  %vm1121_vm5 = vweird.f32 %v1100_v1 }
 0xa61   :  { %v1113_v4 = vor.u32 1.1754944e-38, %v1112_v17  ;;  %vm1111_vm10 = vcmp.eq.f32.partialorder %v1110_v7, 8.507059e+37 }
 0xa62   :  { %v1128_v14 = vor.u32 1.1754944e-38, %v1127_v57  ;;  %vm1126_vm8 = vcmp.eq.f32.partialorder %v1125_v16, 8.507059e+37 }
 0xa65   :  { %v1520_v34 = vpop.eup %1519 }
 0xa66   :  { %v1522_v40 = vpop.eup %1521  ;;  %v1102_v3 = vmul.f32 %v1520_v34, %v1099_v0  ;;  %vm1107_vm4 = vweird.f32 %v1520_v34 }
 0xa67   :  { %v1117_v32 = vmul.f32 %v1522_v40, %v1100_v1  ;;  %vm1122_vm3 = vweird.f32 %v1522_v40  ;;  %vm1108_vm9 = vmor %vm1106_vm7, %vm1107_vm4  ;;  %vm378_vm4 = vcmask 257024   ;;  %vm780_vm7 = vcmp.gt.s32.totalorder %v1998_v39, 3 }
 0xa68   :  { %v1103_v6 = vsub.f32 1.0, %v1102_v3  ;;  %vm1123_vm6 = vmor %vm1121_vm5, %vm1122_vm3  ;;  %vm643_vm3 = vcmp.gt.s32.totalorder %v1998_v39, 5  ;;  %vm642_vm5 = vcmp.gt.s32.totalorder %v1998_v39, 2  ;;  %v782_v0 = vsel %vm780_vm7, 1, %v1538_v18 }
 0xa69   :  { %v1118_v55 = vsub.f32 1.0, %v1117_v32 }
 0xa6a   :  { %v1104_v13 = vmul.f32 %v1520_v34, %v1103_v6 }
 0xa6b   :  { %v1119_v35 = vmul.f32 %v1522_v40, %v1118_v55 }
 0xa6c   :  { %v1105_v37 = vadd.f32 %v1520_v34, %v1104_v13 }
 0xa6d   :  { %v1120_v33 = vadd.f32 %v1522_v40, %v1119_v35 }
 0xa6e   :  { %v1109_v12 = vsel %vm1108_vm9, %v1520_v34, %v1105_v37 }
 0xa6f   :  { %v1124_v44 = vsel %vm1123_vm6, %v1522_v40, %v1120_v33  ;;  %v1114_v21 = vsel %vm1111_vm10, %v1113_v4, %v1109_v12  ;;  %vm781_vm6 = vcmp.gt.s32.totalorder %v1998_v39, 4 }
 0xa70   :  { %v1129_v45 = vsel %vm1126_vm8, %v1128_v14, %v1124_v44  ;;  %v1137_v27 = vmul.f32 %v1135_v26, %v1114_v21  ;;  %v795_v63 = vsel %vm781_vm6, 1, %v1538_v18  ;;  %vm392_vm8 = vcmask 519424  }
 0xa71   :  { %v1131_v56 = vmul.f32 2.0, %v1129_v45 }
 0xa73   :  { %v1417_v5 = vadd.f32 -1.0, %v1131_v56 }
 0xa75   :  { %v1138_v36 = vmul.f32 %v1417_v5, %v1114_v21 }
 0xa77   :  { %1140 = vrot.lane.b32.xlu2 %v1138_v36, %s1537_s18 }
 0xa7f   :  { %369 = vperm.xlu2 %1453, %v367_v41  }
 0xa87   :  { %508 = vperm.xlu2 %1453, %v506_v22  }
 0xad1   :  { %v1141_v28 = vpop.permute.xlu2 %1140 }
 0xad2   :  { %v1143_v31 = vadd.f32 %v1141_v28, %v1137_v27 }
 0xad4   :  { %1523 = vtanh.f32 %v1143_v31  ;;  %1155 = vrot.lane.b32.xlu1 %v1143_v31, %s1537_s18 }
 0xad9   :  { %v2002_v61 = vpop.permute.xlu2 %369 }
 0xada   :  { %v1524_v2 = vpop.eup %1523  ;;  %vm371_vm15 = vcmp.eq.s32.totalorder %v2002_v61, 1 }
 0xadb   :  { %v2004_v50 = vmul.f32 %v1524_v2, %v1129_v45  ;;  %v372_v51 = vsel %vm371_vm15, %v1814_v8, 0.0 }
 0xadc   :  { %382 = vperm.xlu1 %1452, %v380_v42   ;;  %v373_v52 = vpack.c.bf16 %v372_v51, %v372_v51 }
 0xadd   :  { %1149 = vrot.lane.b32.xlu0 %v2004_v50, %s1537_s18 }
 0xae1   :  { %v2049_v1 = vpop.permute.xlu2 %508 }
 0xae5   :  { %375 = vrot.lane.b32.xlu0 %v373_v52, %s1537_s18 }
 0xb46   :  { %v1156_v23 = vpop.permute.xlu1 %1155 }
 0xb47   :  { %v1158_v43 = vsel %vm1147_vm0, %v1156_v23, %v1983_v60  ;;  %v657_v60 = vsel %vm643_vm3, 1, %v1538_v18 }
 0xb48   :  { %1159 = vst.msk [vmem:[#allocation4] sm:$0xff] %vm160_vm1, %v1158_v43 }
 0xb4e   :  { %v2018_v24 = vpop.permute.xlu1 %382 }
 0xb4f   :  { %vm384_vm2 = vcmp.eq.s32.totalorder %v2018_v24, 1  ;;  %v1150_v58 = vpop.permute.xlu0 %1149  ;;  %v2021_v62 = vld [vmem:[#allocation4] sm:$0xff] }
 0xb50   :  { %v385_v29 = vsel %vm384_vm2, %v1814_v8, 0.0  ;;  %v1152_v30 = vsel %vm1147_vm0, %v1150_v58, %v1975_v54  ;;  %1256 = vrot.lane.b32.xlu2 %v2021_v62, %s1537_s18  ;;  %v644_v8 = vsel %vm642_vm5, 1, %v1538_v18 }
 0xb51   :  { %v386_v19 = vpack.c.bf16 %v385_v29, %v385_v29  ;;  %1153 = vst.msk [vmem:[#allocation3] sm:$0xff] %vm160_vm1, %v1152_v30 }
 0xb53   :  { %388 = vrot.lane.b32.xlu1 %v386_v19, %s1537_s18 }
 0xb57   :  { %v376_v48 = vpop.permute.xlu0 %375 }
 0xb58   :  { %379 = vst.msk [vmem:[%s2180_s5] sm:$0xf] %vm378_vm4, %v376_v48  ;;  %659 = vperm.xlu2 %1453, %v657_v60   ;;  %v2039_v54 = vld [vmem:[#allocation3] sm:$0xff] }
 0xb59   :  { %v1183_v59 = vpack.c.bf16 %v2039_v54, %v2039_v54 }
 0xb5b   :  { %646 = vperm.xlu1 %1452, %v644_v8   ;;  %1420 = vmatmul.msk.bf16.vlgmr.msrb.gmra.mxu2 %vm160_vm1, %v1183_v59 }
 0xb5c   :  { %1421 = vmatmul.msk.bf16.vlgmr.msrb.gmra.mxu3 %vm160_vm1, %v1183_v59 }
 0xb60   :  { %797 = vperm.xlu2 %1453, %v795_v63  }
 0xb63   :  { %784 = vperm.xlu1 %1452, %v782_v0  }
 0xbaa   :  { %v2051_v34 = vpop.permute.xlu2 %1256 }
 0xbb2   :  { %v2053_v40 = vpop.permute.xlu2 %659 }
 0xbba   :  { %v798_v6 = vpop.permute.xlu2 %797 }
 0xbbb   :  { %vm799_vm10 = vcmp.eq.s32.totalorder %v798_v6, 1 }
 0xbbc   :  { %v800_v57 = vsel %vm799_vm10, %v1916_v49, 0.0  ;;  %v916_v16 = vsel %vm799_vm10, %v1941_v20, 0.0  ;;  %vm510_vm10 = vcmp.eq.s32.totalorder %v2049_v1, 1 }
 0xbbd   :  { %v801_v35 = vpack.c.bf16 %v800_v57, %v800_v57  ;;  %v917_v14 = vpack.c.bf16 %v916_v16, %v916_v16 }
 0xbc5   :  { %v389_v3 = vpop.permute.xlu1 %388 }
 0xbc6   :  { %1377 = vst.msk [vmem:[%s2180_s5 + $0x1c] sm:$0xf] %vm392_vm8, %v389_v3  ;;  %v511_v3 = vsel %vm510_vm10, %v1850_v25, 0.0 }
 0xbcd   :  { %v647_v32 = vpop.permute.xlu1 %646 }
 0xbce   :  { %vm648_vm9 = vcmp.eq.s32.totalorder %v647_v32, 1  ;;  %v512_v32 = vpack.c.bf16 %v511_v3, %v511_v3 }
 0xbcf   :  { %v649_v55 = vsel %vm648_vm9, %v1883_v47, 0.0  ;;  %v1045_v12 = vsel %vm648_vm9, %v1966_v46, 0.0  ;;  %vm505_vm9 = vcmp.gt.s32.totalorder %v1998_v39, 6 }
 0xbd0   :  { %v650_v13 = vpack.c.bf16 %v649_v55, %v649_v55  ;;  %v1046_v5 = vpack.c.bf16 %v1045_v12, %v1045_v12  ;;  %v519_v0 = vsel %vm505_vm9, 1, %v1538_v18 }
 0xbd2   :  { %652 = vrot.lane.b32.xlu2 %v650_v13, %s1537_s18 }
 0xbd5   :  { %v785_v55 = vpop.permute.xlu1 %784 }
 0xbda   :  { %803 = vrot.lane.b32.xlu2 %v801_v35, %s1537_s18 }
 0xbde   :  { %v1196_v37 = vpop.f32.mrf.mxu2 }
 0xbdf   :  { %v1213_v33 = vadd.f32 %v1196_v37, %v1797_v9  ;;  %v1209_v17 = vpop.f32.mrf.mxu3 }
 0xbe0   :  { %v1214_v7 = vadd.f32 %v1209_v17, %v1799_v10 }
 0xbe1   :  { %v1422_v44 = vmul.f32 -1.442695, %v1213_v33 }
 0xbe2   :  { %v1423_v45 = vmul.f32 -1.442695, %v1214_v7  ;;  %919 = vrot.lane.b32.xlu2 %v917_v14, %s1537_s18 }
 0xbe3   :  { %1525 = vpow2.f32 %v1422_v44 }
 0xbe4   :  { %1527 = vpow2.f32 %v1423_v45 }
 0xbe6   :  { %v1198_v56 = vpop.f32.mrf.mxu2 }
 0xbe7   :  { %v1211_v4 = vpop.f32.mrf.mxu3 }
 0xbe9   :  { %v1526_v21 = vpop.eup %1525 }
 0xbea   :  { %v1528_v36 = vpop.eup %1527  ;;  %v1221_v41 = vadd.f32 1.0, %v1526_v21  ;;  %1048 = vrot.lane.b32.xlu2 %v1046_v5, %s1537_s18 }
 0xbeb   :  { %v1222_v9 = vadd.f32 1.0, %v1528_v36 }
 0xbec   :  { %1529 = vrcp.f32 %v1221_v41  ;;  %v1234_v23 = vand.u32 2147483648, %v1221_v41  ;;  %vm1228_vm3 = vweird.f32 %v1221_v41  ;;  %v1232_v58 = vand.u32 2147483647, %v1221_v41 }
 0xbed   :  { %1531 = vrcp.f32 %v1222_v9  ;;  %v1249_v2 = vand.u32 2147483648, %v1222_v9  ;;  %v1247_v52 = vand.u32 2147483647, %v1222_v9  ;;  %vm1243_vm14 = vweird.f32 %v1222_v9 }
 0xbee   :  { %v1235_v48 = vor.u32 1.1754944e-38, %v1234_v23  ;;  %vm1233_vm7 = vcmp.eq.f32.partialorder %v1232_v58, 8.507059e+37 }
 0xbef   :  { %v1250_v43 = vor.u32 1.1754944e-38, %v1249_v2  ;;  %vm1248_vm5 = vcmp.eq.f32.partialorder %v1247_v52, 8.507059e+37 }
 0xbf2   :  { %v1530_v10 = vpop.eup %1529 }
 0xbf3   :  { %v1532_v22 = vpop.eup %1531  ;;  %v1224_v26 = vmul.f32 %v1530_v10, %v1221_v41  ;;  %vm1229_vm12 = vweird.f32 %v1530_v10 }
 0xbf4   :  { %v1239_v27 = vmul.f32 %v1532_v22, %v1222_v9  ;;  %vm1244_vm11 = vweird.f32 %v1532_v22  ;;  %vm1230_vm6 = vmor %vm1228_vm3, %vm1229_vm12  ;;  %vm786_vm12 = vcmp.eq.s32.totalorder %v785_v55, 1 }
 0xbf5   :  { %v1225_v28 = vsub.f32 1.0, %v1224_v26  ;;  %vm1245_vm0 = vmor %vm1243_vm14, %vm1244_vm11  ;;  %vm661_vm11 = vcmp.eq.s32.totalorder %v2053_v40, 1  ;;  %v923_v13 = vsel %vm786_vm12, %v1941_v20, 0.0  ;;  %v787_v21 = vsel %vm786_vm12, %v1916_v49, 0.0 }
 0xbf6   :  { %v1240_v31 = vsub.f32 1.0, %v1239_v27  ;;  %v662_v6 = vsel %vm661_vm11, %v1883_v47, 0.0  ;;  %v924_v57 = vpack.c.bf16 %v923_v13, %v923_v13  ;;  %v1038_v24 = vsel %vm661_vm11, %v1966_v46, 0.0 }
 0xbf7   :  { %v1226_v42 = vmul.f32 %v1530_v10, %v1225_v28  ;;  %v663_v39 = vpack.c.bf16 %v662_v6, %v662_v6  ;;  %v1039_v49 = vpack.c.bf16 %v1038_v24, %v1038_v24  ;;  %v1167_v46 = vsel %vm510_vm10, %v2004_v50, 0.0 }
 0xbf8   :  { %v1241_v51 = vmul.f32 %v1532_v22, %v1240_v31  ;;  %v1168_v40 = vpack.c.bf16 %v1167_v46, %v1167_v46 }
 0xbf9   :  { %v1227_v15 = vadd.f32 %v1530_v10, %v1226_v42 }
 0xbfa   :  { %v1242_v38 = vadd.f32 %v1532_v22, %v1241_v51 }
 0xbfb   :  { %v1231_v19 = vsel %vm1230_vm6, %v1530_v10, %v1227_v15 }
 0xbfc   :  { %v1246_v29 = vsel %vm1245_vm0, %v1532_v22, %v1242_v38  ;;  %v1236_v59 = vsel %vm1233_vm7, %v1235_v48, %v1231_v19 }
 0xbfd   :  { %v1251_v30 = vsel %vm1248_vm5, %v1250_v43, %v1246_v29  ;;  %v1259_v37 = vmul.f32 %v2051_v34, %v1236_v59 }
 0xbfe   :  { %v1253_v60 = vmul.f32 2.0, %v1251_v30 }
 0xc00   :  { %v1424_v8 = vadd.f32 -1.0, %v1253_v60 }
 0xc02   :  { %v1260_v63 = vmul.f32 %v1424_v8, %v1236_v59 }
 0xc04   :  { %1262 = vrot.lane.b32.xlu0 %v1260_v63, %s1537_s18 }
 0xc0c   :  { %521 = vperm.xlu0 %1454, %v519_v0  }
 0xc14   :  { %514 = vrot.lane.b32.xlu0 %v512_v32, %s1537_s18 }
 0xc1c   :  { %665 = vrot.lane.b32.xlu0 %v663_v39, %s1537_s18 }
 0xc24   :  { %926 = vrot.lane.b32.xlu0 %v924_v57, %s1537_s18 }
 0xc2c   :  { %v653_v35 = vpop.permute.xlu2 %652 }
 0xc2d   :  { %1390 = vst.msk [vmem:[%s2180_s5 + $0x8] sm:$0xf] %vm378_vm4, %v653_v35 }
 0xc34   :  { %v804_v16 = vpop.permute.xlu2 %803 }
 0xc35   :  { %1398 = vst.msk [vmem:[%s2180_s5 + $0x10] sm:$0xf] %vm392_vm8, %v804_v16 }
 0xc3c   :  { %v920_v47 = vpop.permute.xlu2 %919 }
 0xc3d   :  { %1404 = vst.msk [vmem:[%s2180_s5 + $0x10] sm:$0xf] %vm378_vm4, %v920_v47 }
 0xc44   :  { %v1049_v20 = vpop.permute.xlu2 %1048 }
 0xc45   :  { %1412 = vst.msk [vmem:[%s2180_s5 + $0x8] sm:$0xf] %vm392_vm8, %v1049_v20 }
 0xc76   :  { %v1263_v33 = vpop.permute.xlu0 %1262 }
 0xc77   :  { %v1265_v17 = vadd.f32 %v1263_v33, %v1259_v37 }
 0xc79   :  { %1533 = vtanh.f32 %v1265_v17 }
 0xc7e   :  { %v522_v14 = vpop.permute.xlu0 %521 }
 0xc7f   :  { %v1534_v7 = vpop.eup %1533  ;;  %vm523_vm14 = vcmp.eq.s32.totalorder %v522_v14, 1 }
 0xc80   :  { %v524_v44 = vsel %vm523_vm14, %v1850_v25, 0.0  ;;  %v1160_v45 = vsel %vm523_vm14, %v2004_v50, 0.0  ;;  %v1267_v12 = vmul.f32 %v1534_v7, %v1251_v30  ;;  %v788_v25 = vpack.c.bf16 %v787_v21, %v787_v21 }
 0xc81   :  { %v525_v56 = vpack.c.bf16 %v524_v44, %v524_v44  ;;  %v1161_v4 = vpack.c.bf16 %v1160_v45, %v1160_v45  ;;  %v1268_v50 = vsel %vm207_vm13, 7, %v1538_v18 }
 0xc82   :  { %v1282_v5 = vsel %vm384_vm2, %v1267_v12, 0.0  ;;  %v1289_v9 = vsel %vm371_vm15, %v1267_v12, 0.0  ;;  %vm1269_vm15 = vcmp.lt.s32.totalorder %v1268_v50, %v1819_v11 }
 0xc83   :  { %1163 = vrot.lane.b32.xlu0 %v1161_v4, %s1537_s18  ;;  %527 = vrot.lane.b32.xlu1 %v525_v56, %s1537_s18  ;;  %v1283_v34 = vpack.c.bf16 %v1282_v5, %v1282_v5  ;;  %v1290_v10 = vpack.c.bf16 %v1289_v9, %v1289_v9 }
 0xc85   :  { %1285 = vrot.lane.b32.xlu2 %v1283_v34, %s1537_s18 }
 0xc86   :  { %v515_v36 = vpop.permute.xlu0 %514 }
 0xc87   :  { %1383 = vst.msk [vmem:[%s2180_s5 + $0x4] sm:$0xf] %vm378_vm4, %v515_v36 }
 0xc8b   :  { %790 = vrot.lane.b32.xlu1 %v788_v25, %s1537_s18  ;;  %1271 = vrot.lane.b32.xlu0 %v1267_v12, %s1537_s18 }
 0xc8e   :  { %v666_v41 = vpop.permute.xlu0 %665 }
 0xc8f   :  { %1391 = vst.msk [vmem:[%s2180_s5 + $0x14] sm:$0xf] %vm392_vm8, %v666_v41 }
 0xc93   :  { %1041 = vrot.lane.b32.xlu1 %v1039_v49, %s1537_s18  ;;  %1292 = vrot.lane.b32.xlu0 %v1290_v10, %s1537_s18 }
 0xc96   :  { %v927_v22 = vpop.permute.xlu0 %926 }
 0xc9b   :  { %1277 = vrot.lane.b32.xlu1 %v1265_v17, %s1537_s18 }
 0xca3   :  { %1170 = vrot.lane.b32.xlu1 %v1168_v40, %s1537_s18 }
 0xcdf   :  { %v1286_v61 = vpop.permute.xlu2 %1285 }
 0xce0   :  { %1425 = vst.msk [vmem:[%s2180_s5 + $0x1c] sm:$0xf] %vm378_vm4, %v1286_v61 }
 0xcf5   :  { %v528_v26 = vpop.permute.xlu1 %527  ;;  %v1164_v27 = vpop.permute.xlu0 %1163 }
 0xcf6   :  { %1384 = vst.msk [vmem:[%s2180_s5 + $0x18] sm:$0xf] %vm392_vm8, %v528_v26 }
 0xcf7   :  { %1418 = vst.msk [vmem:[%s2180_s5 + $0x18] sm:$0xf] %vm378_vm4, %v1164_v27 }
 0xcfd   :  { %v791_v1 = vpop.permute.xlu1 %790  ;;  %v1272_v28 = vpop.permute.xlu0 %1271 }
 0xcfe   :  { %1397 = vst.msk [vmem:[%s2180_s5 + $0xc] sm:$0xf] %vm378_vm4, %v791_v1  ;;  %v1274_v31 = vsel %vm1269_vm15, %v1272_v28, %v2039_v54 }
 0xcff   :  { %1405 = vst.msk [vmem:[%s2180_s5 + $0xc] sm:$0xf] %vm392_vm8, %v927_v22 }
 0xd00   :  { %1275 = vst.msk [vmem:[#allocation3] sm:$0xff] %vm160_vm1, %v1274_v31 }
 0xd05   :  { %v1042_v53 = vpop.permute.xlu1 %1041  ;;  %v1293_v18 = vpop.permute.xlu0 %1292 }
 0xd06   :  { %1411 = vst.msk [vmem:[%s2180_s5 + $0x14] sm:$0xf] %vm378_vm4, %v1042_v53 }
 0xd07   :  { %1295 = vst.msk [vmem:[%s2180_s5] sm:$0xf] %vm392_vm8, %v1293_v18 }
 0xd0d   :  { %v1278_v11 = vpop.permute.xlu1 %1277 }
 0xd0e   :  { %v1280_v54 = vsel %vm1269_vm15, %v1278_v11, %v2021_v62 }
 0xd0f   :  { %1281 = vst.msk [vmem:[#allocation4] sm:$0xff] %vm160_vm1, %v1280_v54 }
 0xd15   :  { %v1171_v42 = vpop.permute.xlu1 %1170 }
 0xd16   :  { %1419 = vst.msk [vmem:[%s2180_s5 + $0x4] sm:$0xf] %vm392_vm8, %v1171_v42 }

</bundles_post_ra>
